<compile_context>
chip_gen: v5e
topology: v5e:2x2
jax: 0.10.0
libtpu: 0.0.40
codegen_flags: <defaults>
</compile_context>

<pallas_src>
import math
import functools

import jax
import jax.numpy as jnp
from jax import lax
from jax.experimental import pallas as pl
from jax.experimental.pallas import tpu as pltpu

_LANE = 128


def _round_up(n, m):
    return ((n + m - 1) // m) * m


def _q_tiling(Tt):
    """Return (padded Tt, q tile). Small Tt -> one full tile; long -> 128/256."""
    if Tt <= 256:
        return Tt, Tt
    Tt_pad = _round_up(Tt, _LANE)
    tq = 256 if Tt_pad % 256 == 0 else _LANE
    return Tt_pad, tq


def _pad_heads_last(w, n_heads, dk, dkp):
    """(..., n_heads*dk) -> (..., n_heads*dkp), zero-padding each head slice."""
    lead = w.shape[:-1]
    w = w.reshape(*lead, n_heads, dk)
    w = jnp.pad(w, [(0, 0)] * len(lead) + [(0, 0), (0, dkp - dk)])
    return w.reshape(*lead, n_heads * dkp)


def _pad_heads_first(w, n_heads, dk, dkp):
    """(n_heads*dk, ...) -> (n_heads*dkp, ...), zero-padding each head slice."""
    tail = w.shape[1:]
    w = w.reshape(n_heads, dk, *tail)
    w = jnp.pad(w, [(0, 0), (0, dkp - dk)] + [(0, 0)] * len(tail))
    return w.reshape(n_heads * dkp, *tail)


# ---------------------------------------------------------------------------
# Fused kernel:  KV-proj (once per batch) -> q-proj -> MHA -> o-proj
# grid = (B, q_tiles); b "parallel", qi "arbitrary" (kv scratch carries).
# ---------------------------------------------------------------------------
def _mha_kernel(c_ref, x_ref, wkv_ref, bkv_ref, wq_ref, bq_ref, wo_ref, bo_ref,
                *refs, n_heads, dkp, return_attn):
    if return_attn:
        y_ref, p_ref, kv_sc = refs
    else:
        y_ref, kv_sc = refs
        p_ref = None
    cp = n_heads * dkp

    # ---- K/V projection, once per batch (qi == 0); scratch persists over qi.
    @pl.when(pl.program_id(1) == 0)
    def _():
        c2 = c_ref[0].astype(jnp.bfloat16)                        # (C, Ts) NCW
        kvt = jnp.dot(wkv_ref[...], c2,
                      preferred_element_type=jnp.float32)         # (2Cp, Ts)
        kv_sc[...] = (kvt + bkv_ref[...]).astype(jnp.bfloat16)

    # ---- q projection from the NCW x tile (contract the channel axis = dim 0).
    x2 = x_ref[0].astype(jnp.bfloat16)                            # (C, tq)
    q = lax.dot_general(x2, wq_ref[...], (((0,), (0,)), ((), ())),
                        preferred_element_type=jnp.float32)       # (tq, Cp) f32
    q = (q + bq_ref[...]).astype(jnp.bfloat16)                    # scale pre-folded

    tq = q.shape[0]
    cout = wo_ref.shape[1]
    y_acc = jnp.zeros((tq, cout), jnp.float32)

    for h in range(n_heads):                                      # small, unrolled
        lo = h * dkp
        q_h = q[:, lo:lo + dkp]                                   # (tq, Dkp) lane-aligned
        kT_h = kv_sc[lo:lo + dkp, :]                              # (Dkp, Ts) sublane-aligned
        vT_h = kv_sc[cp + lo:cp + lo + dkp, :]                    # (Dkp, Ts)

        s = jnp.dot(q_h, kT_h, preferred_element_type=jnp.float32)   # (tq, Ts) f32
        m = jnp.max(s, axis=-1, keepdims=True)
        e = jnp.exp(s - m)
        denom = jnp.sum(e, axis=-1, keepdims=True)
        p = e * (1.0 / denom)        # exact normalize (divide only the (tq,1) column)

        if p_ref is not None:        # attention probs only when requested (bf16)
            p_ref[0, h] = p.astype(p_ref.dtype)

        o_h = lax.dot_general(p.astype(jnp.bfloat16), vT_h,
                              (((1,), (1,)), ((), ())),
                              preferred_element_type=jnp.float32)     # (tq, Dkp)
        # per-head o-projection accumulate (no H-way lane concat)
        y_acc = y_acc + jnp.dot(o_h.astype(jnp.bfloat16),
                                wo_ref[lo:lo + dkp, :],
                                preferred_element_type=jnp.float32)   # (tq, Cout)

    y = y_acc + bo_ref[...]
    y_ref[0] = y.T.astype(y_ref.dtype)        # NCW write: (Cout, tq), time lane-dense


def fused_forward(x, c, wkv_p, bkv_p, wq_p, bq_p, wo_p, bo_p, *,
                  n_heads, dkp, return_attn=False):
    """x: (B, C, Tt) NCW, c: (B, C, Ts) NCW -> y: (B, Cout, Tt) [, p bf16]."""
    B, C, Tt = x.shape
    Ts = c.shape[2]
    Cout = wo_p.shape[1]
    cp = n_heads * dkp

    Tt_pad, tq = _q_tiling(Tt)
    if Tt_pad != Tt:
        # padded query rows only produce extra output rows, sliced away below
        x = jnp.pad(x, ((0, 0), (0, 0), (0, Tt_pad - Tt)))
    grid = (B, Tt_pad // tq)

    kernel = functools.partial(_mha_kernel, n_heads=n_heads, dkp=dkp,
                               return_attn=return_attn)

    in_specs = [
        pl.BlockSpec((1, C, Ts), lambda b, qi: (b, 0, 0)),     # c (resident per batch)
        pl.BlockSpec((1, C, tq), lambda b, qi: (b, 0, qi)),    # x tile (NCW)
        pl.BlockSpec((2 * cp, C), lambda b, qi: (0, 0)),       # [Wk;Wv] padded, bf16
        pl.BlockSpec((2 * cp, 1), lambda b, qi: (0, 0)),       # [bk;bv] padded
        pl.BlockSpec((C, cp), lambda b, qi: (0, 0)),           # Wq^T padded+scaled, bf16
        pl.BlockSpec((1, cp), lambda b, qi: (0, 0)),           # bq padded+scaled
        pl.BlockSpec((cp, Cout), lambda b, qi: (0, 0)),        # Wo^T padded, bf16
        pl.BlockSpec((1, Cout), lambda b, qi: (0, 0)),         # bo
    ]
    out_shape = [jax.ShapeDtypeStruct((B, Cout, Tt_pad), x.dtype)]
    out_specs = [pl.BlockSpec((1, Cout, tq), lambda b, qi: (b, 0, qi))]
    if return_attn:
        out_shape.append(jax.ShapeDtypeStruct((B, n_heads, Tt_pad, Ts), jnp.bfloat16))
        out_specs.append(pl.BlockSpec((1, n_heads, tq, Ts),
                                      lambda b, qi: (b, 0, qi, 0)))

    result = pl.pallas_call(
        kernel,
        out_shape=tuple(out_shape) if return_attn else out_shape[0],
        grid=grid,
        in_specs=in_specs,
        out_specs=tuple(out_specs) if return_attn else out_specs[0],
        scratch_shapes=[pltpu.VMEM((2 * cp, Ts), jnp.bfloat16)],   # resident kT/vT
        compiler_params=pltpu.CompilerParams(
            # b shards across v7x TensorCores; qi is arbitrary because the kv
            # scratch (and its pl.when init) carries across q tiles.
            dimension_semantics=("parallel", "arbitrary")),
    )(c, x, wkv_p, bkv_p, wq_p, bq_p, wo_p, bo_p)

    if return_attn:
        y, p = result
    else:
        y, p = result, None
    if Tt_pad != Tt:
        y = y[:, :, :Tt]
        if p is not None:
            p = p[:, :, :Tt, :]
    return y, p


# ---------------------------------------------------------------------------
# Module wrapper (weight packing: pre-transposed, per-head 128-padded,
# 1/sqrt(Dk) folded into Wq/bq, bf16 storage for all MXU operands)
# ---------------------------------------------------------------------------
class MultiHeadAttentionPallas:
    def __init__(self, channels, out_channels, n_heads, key, p_dropout=0.0):
        assert channels % n_heads == 0
        self.channels = channels
        self.out_channels = out_channels
        self.n_heads = n_heads
        self.k_channels = channels // n_heads
        self.dkp = _round_up(self.k_channels, _LANE)   # per-head width, lane aligned
        self.p_dropout = p_dropout                     # identity at inference
        self.attn = None

        keys = jax.random.split(key, 8)

        def xavier_uniform(k, cout, cin):
            bound = math.sqrt(6.0 / (cin + cout))
            return jax.random.uniform(k, (cout, cin), jnp.float32, -bound, bound)

        def conv_bias(k, cout, cin):
            bound = 1.0 / math.sqrt(cin)
            return jax.random.uniform(k, (cout,), jnp.float32, -bound, bound)

        # PyTorch-layout parameters (kept in f32 for the reference).
        self.w_q = xavier_uniform(keys[0], channels, channels)
        self.b_q = conv_bias(keys[1], channels, channels)
        self.w_k = xavier_uniform(keys[2], channels, channels)
        self.b_k = conv_bias(keys[3], channels, channels)
        self.w_v = xavier_uniform(keys[4], channels, channels)
        self.b_v = conv_bias(keys[5], channels, channels)
        self.w_o = xavier_uniform(keys[6], out_channels, channels)
        self.b_o = conv_bias(keys[7], out_channels, channels)

        H, Dk, Dkp = n_heads, self.k_channels, self.dkp
        scale = 1.0 / math.sqrt(Dk)

        # Wq^T, scaled, per-head columns padded -> (C, H*Dkp), bf16.
        self.wq_p = _pad_heads_last((self.w_q * scale).T, H, Dk, Dkp).astype(jnp.bfloat16)
        self.bq_p = _pad_heads_last((self.b_q * scale)[None, :], H, Dk, Dkp)   # f32
        # [Wk; Wv] with per-head rows padded -> (2*H*Dkp, C), bf16; produces kT/vT.
        wk_p = _pad_heads_first(self.w_k, H, Dk, Dkp)
        wv_p = _pad_heads_first(self.w_v, H, Dk, Dkp)
        self.wkv_p = jnp.concatenate([wk_p, wv_p], axis=0).astype(jnp.bfloat16)
        bk_p = _pad_heads_first(self.b_k[:, None], H, Dk, Dkp)
        bv_p = _pad_heads_first(self.b_v[:, None], H, Dk, Dkp)
        self.bkv_p = jnp.concatenate([bk_p, bv_p], axis=0)                     # f32
        # Wo^T with per-head rows padded -> (H*Dkp, Cout), bf16.
        self.wo_p = _pad_heads_first(self.w_o.T, H, Dk, Dkp).astype(jnp.bfloat16)
        self.bo_p = self.b_o.reshape(1, out_channels)                          # f32

    def __call__(self, x, c, attn_mask=None, return_attn=False):
        # x: (B, channels, T_t), c: (B, channels, T_s) -- PyTorch NCW layout.
        assert attn_mask is None  # TODO(synk): attn_mask / block_length masking not implemented
        y, p = fused_forward(x, c, self.wkv_p, self.bkv_p, self.wq_p, self.bq_p,
                             self.wo_p, self.bo_p, n_heads=self.n_heads,
                             dkp=self.dkp, return_attn=return_attn)
        # probs are opt-in (bf16): always writing them dominates HBM traffic.
        self.attn = p
        return y


# ---------------------------------------------------------------------------
# Pure-JAX f32 reference (Precision.HIGHEST) for verification
# ---------------------------------------------------------------------------
def reference_forward(mod, x, c):
    B, C, Tt = x.shape
    Ts = c.shape[2]
    H, Dk = mod.n_heads, mod.k_channels
    hp = functools.partial(jnp.einsum, precision=jax.lax.Precision.HIGHEST)
    q = hp("bct,oc->bot", x, mod.w_q) + mod.b_q[None, :, None]
    k = hp("bct,oc->bot", c, mod.w_k) + mod.b_k[None, :, None]
    v = hp("bct,oc->bot", c, mod.w_v) + mod.b_v[None, :, None]
    q = jnp.transpose(q.reshape(B, H, Dk, Tt), (0, 1, 3, 2))
    k = jnp.transpose(k.reshape(B, H, Dk, Ts), (0, 1, 3, 2))
    v = jnp.transpose(v.reshape(B, H, Dk, Ts), (0, 1, 3, 2))
    scores = hp("bhtd,bhsd->bhts", q / math.sqrt(Dk), k)
    p = jax.nn.softmax(scores, axis=-1)
    out = hp("bhts,bhsd->bhtd", p, v)
    out = jnp.transpose(out, (0, 1, 3, 2)).reshape(B, C, Tt)
    y = hp("bct,oc->bot", out, mod.w_o) + mod.b_o[None, :, None]
    return y, p


def _norm_err(a, b):
    a = jnp.asarray(a, jnp.float32)
    b = jnp.asarray(b, jnp.float32)
    return float(jnp.max(jnp.abs(a - b)) / (jnp.max(jnp.abs(b)) + 1e-6))


if __name__ == "__main__":
    key = jax.random.PRNGKey(0)
    k_param, k_x, k_c = jax.random.split(key, 3)

    B, channels, out_channels, n_heads = 2, 32, 32, 4
    Tt, Ts = 16, 24

    mod = MultiHeadAttentionPallas(channels, out_channels, n_heads, k_param)

    x = jax.random.normal(k_x, (B, channels, Tt), jnp.float32)
    c = jax.random.normal(k_c, (B, channels, Ts), jnp.float32)

    y_ref, p_ref = reference_forward(mod, x, c)

    # default path: no attention-prob writeback
    y = mod(x, c)
    y = jax.block_until_ready(y)
    assert y.shape == (B, out_channels, Tt)
    assert mod.attn is None
    # tolerance sized for bf16 MXU operands with f32 accumulation
    assert _norm_err(y, y_ref) < 4e-2, "output mismatch vs reference"

    # opt-in path: attention probabilities requested
    y2 = mod(x, c, return_attn=True)
    y2 = jax.block_until_ready(y2)
    assert _norm_err(y2, y_ref) < 4e-2, "output mismatch (attn path)"
    assert mod.attn.shape == (B, n_heads, Tt, Ts)
    attn_err = float(jnp.max(jnp.abs(mod.attn.astype(jnp.float32) - p_ref)))
    assert attn_err < 3e-2, "attn mismatch vs reference"

    print("KERNEL_OK")
</pallas_src>

<mosaic_0001>
module attributes {stable_mosaic.version = 11 : i64} {
  func.func @_mha_kernel(%arg0: i32, %arg1: i32, %arg2: memref<1x32x24xf32, #tpu.memory_space<vmem>>, %arg3: memref<1x32x16xf32, #tpu.memory_space<vmem>>, %arg4: memref<1024x32xbf16, #tpu.memory_space<vmem>>, %arg5: memref<1024x1xf32, #tpu.memory_space<vmem>>, %arg6: memref<32x512xbf16, #tpu.memory_space<vmem>>, %arg7: memref<1x512xf32, #tpu.memory_space<vmem>>, %arg8: memref<512x32xbf16, #tpu.memory_space<vmem>>, %arg9: memref<1x32xf32, #tpu.memory_space<vmem>>, %arg10: memref<1x32x16xf32, #tpu.memory_space<vmem>>, %arg11: memref<1024x24xbf16, #tpu.memory_space<vmem>>) attributes {dimension_semantics = [#tpu.dimension_semantics<parallel>, #tpu.dimension_semantics<arbitrary>], iteration_bounds = array<i64: 2, 1>, scalar_prefetch = 0 : i64, scratch_operands = 1 : i64, tpu.core_type = #tpu.core_type<tc>, window_params = [{transform_indices = @transform_0, window_bounds = array<i64: 1, 32, 24>}, {transform_indices = @transform_1, window_bounds = array<i64: 1, 32, 16>}, {pipeline_mode = #tpu.pipeline_mode<synchronous>, transform_indices = @transform_2, window_bounds = array<i64: 1024, 32>}, {pipeline_mode = #tpu.pipeline_mode<synchronous>, transform_indices = @transform_3, window_bounds = array<i64: 1024, 1>}, {pipeline_mode = #tpu.pipeline_mode<synchronous>, transform_indices = @transform_4, window_bounds = array<i64: 32, 512>}, {pipeline_mode = #tpu.pipeline_mode<synchronous>, transform_indices = @transform_5, window_bounds = array<i64: 1, 512>}, {pipeline_mode = #tpu.pipeline_mode<synchronous>, transform_indices = @transform_6, window_bounds = array<i64: 512, 32>}, {pipeline_mode = #tpu.pipeline_mode<synchronous>, transform_indices = @transform_7, window_bounds = array<i64: 1, 32>}, {transform_indices = @transform_8, window_bounds = array<i64: 1, 32, 16>}]} {
    %c0_i32 = arith.constant 0 : i32
    %0 = arith.cmpi eq, %arg1, %c0_i32 : i32
    %1 = arith.extui %0 : i1 to i32
    %c0_i32_0 = arith.constant 0 : i32
    %2 = arith.cmpi ne, %1, %c0_i32_0 : i32
    scf.if %2 {
      %c0_54 = arith.constant 0 : index
      %c0_55 = arith.constant 0 : index
      %c0_56 = arith.constant 0 : index
      %104 = vector.load %arg2[%c0_54, %c0_55, %c0_56] : memref<1x32x24xf32, #tpu.memory_space<vmem>>, vector<1x32x24xf32>
      %105 = vector.shape_cast %104 : vector<1x32x24xf32> to vector<32x24xf32>
      %106 = arith.truncf %105 : vector<32x24xf32> to vector<32x24xbf16>
      %c0_57 = arith.constant 0 : index
      %c0_58 = arith.constant 0 : index
      %107 = vector.load %arg4[%c0_57, %c0_58] : memref<1024x32xbf16, #tpu.memory_space<vmem>>, vector<1024x32xbf16>
      %cst_59 = arith.constant dense<0.000000e+00> : vector<1024x24xf32>
      %108 = tpu.matmul %107, %106, %cst_59 {dimension_numbers = #tpu.dot_dimension_numbers<[1], [0], [0], [1], [0, 0, 1, 1], [], []>} : vector<1024x32xbf16>, vector<32x24xbf16>, vector<1024x24xf32> -> vector<1024x24xf32>
      %c0_60 = arith.constant 0 : index
      %c0_61 = arith.constant 0 : index
      %109 = vector.load %arg5[%c0_60, %c0_61] : memref<1024x1xf32, #tpu.memory_space<vmem>>, vector<1024x1xf32>
      %110 = vector.broadcast %109 : vector<1024x1xf32> to vector<1024x24xf32>
      %111 = arith.addf %108, %110 : vector<1024x24xf32>
      %112 = arith.truncf %111 : vector<1024x24xf32> to vector<1024x24xbf16>
      %c0_62 = arith.constant 0 : index
      %c0_63 = arith.constant 0 : index
      %113 = vector.load %arg11[%c0_62, %c0_63] : memref<1024x24xbf16, #tpu.memory_space<vmem>>, vector<1024x24xbf16>
      tpu.vector_store %arg11[%c0_62, %c0_63], %112 {strides = array<i32>} : memref<1024x24xbf16, #tpu.memory_space<vmem>>, vector<1024x24xbf16>,
    } else {
    }
    %c0 = arith.constant 0 : index
    %c0_1 = arith.constant 0 : index
    %c0_2 = arith.constant 0 : index
    %3 = vector.load %arg3[%c0, %c0_1, %c0_2] : memref<1x32x16xf32, #tpu.memory_space<vmem>>, vector<1x32x16xf32>
    %4 = vector.shape_cast %3 : vector<1x32x16xf32> to vector<32x16xf32>
    %5 = arith.truncf %4 : vector<32x16xf32> to vector<32x16xbf16>
    %c0_3 = arith.constant 0 : index
    %c0_4 = arith.constant 0 : index
    %6 = vector.load %arg6[%c0_3, %c0_4] : memref<32x512xbf16, #tpu.memory_space<vmem>>, vector<32x512xbf16>
    %cst = arith.constant dense<0.000000e+00> : vector<16x512xf32>
    %7 = tpu.matmul %5, %6, %cst {dimension_numbers = #tpu.dot_dimension_numbers<[0], [0], [1], [1], [0, 1, 1, 1], [], []>} : vector<32x16xbf16>, vector<32x512xbf16>, vector<16x512xf32> -> vector<16x512xf32>
    %c0_5 = arith.constant 0 : index
    %c0_6 = arith.constant 0 : index
    %8 = vector.load %arg7[%c0_5, %c0_6] : memref<1x512xf32, #tpu.memory_space<vmem>>, vector<1x512xf32>
    %9 = vector.broadcast %8 : vector<1x512xf32> to vector<16x512xf32>
    %10 = arith.addf %7, %9 : vector<16x512xf32>
    %11 = arith.truncf %10 : vector<16x512xf32> to vector<16x512xbf16>
    %cst_7 = arith.constant 0.000000e+00 : f32
    %12 = vector.broadcast %cst_7 : f32 to vector<16x32xf32>
    %13 = vector.extract_strided_slice %11 {offsets = [0, 0], sizes = [16, 128], strides = [1, 1]} : vector<16x512xbf16> to vector<16x128xbf16>
    %c0_8 = arith.constant 0 : index
    %c0_9 = arith.constant 0 : index
    %14 = vector.load %arg11[%c0_8, %c0_9] : memref<1024x24xbf16, #tpu.memory_space<vmem>>, vector<128x24xbf16>
    %c512 = arith.constant 512 : index
    %c0_10 = arith.constant 0 : index
    %15 = vector.load %arg11[%c512, %c0_10] : memref<1024x24xbf16, #tpu.memory_space<vmem>>, vector<128x24xbf16>
    %cst_11 = arith.constant dense<0.000000e+00> : vector<16x24xf32>
    %16 = tpu.matmul %13, %14, %cst_11 {dimension_numbers = #tpu.dot_dimension_numbers<[1], [0], [0], [1], [0, 0, 1, 1], [], []>} : vector<16x128xbf16>, vector<128x24xbf16>, vector<16x24xf32> -> vector<16x24xf32>
    %cst_12 = arith.constant dense<0xFF800000> : vector<16xf32>
    %17 = vector.multi_reduction <maximumf>, %16, %cst_12 [1] : vector<16x24xf32> to vector<16xf32>
    %18 = vector.shape_cast %17 : vector<16xf32> to vector<16x1xf32>
    %19 = vector.broadcast %18 : vector<16x1xf32> to vector<16x24xf32>
    %20 = arith.subf %16, %19 : vector<16x24xf32>
    %21 = math.exp %20 : vector<16x24xf32>
    %cst_13 = arith.constant dense<0.000000e+00> : vector<16xf32>
    %22 = vector.multi_reduction <add>, %21, %cst_13 [1] : vector<16x24xf32> to vector<16xf32>
    %23 = vector.shape_cast %22 : vector<16xf32> to vector<16x1xf32>
    %cst_14 = arith.constant 1.000000e+00 : f32
    %24 = vector.broadcast %cst_14 : f32 to vector<16x1xf32>
    %25 = arith.divf %24, %23 : vector<16x1xf32>
    %26 = vector.broadcast %25 : vector<16x1xf32> to vector<16x24xf32>
    %27 = arith.mulf %21, %26 : vector<16x24xf32>
    %28 = arith.truncf %27 : vector<16x24xf32> to vector<16x24xbf16>
    %cst_15 = arith.constant dense<0.000000e+00> : vector<16x128xf32>
    %29 = tpu.matmul %28, %15, %cst_15 {dimension_numbers = #tpu.dot_dimension_numbers<[1], [1], [0], [0], [0, 0, 1, 0], [], []>} : vector<16x24xbf16>, vector<128x24xbf16>, vector<16x128xf32> -> vector<16x128xf32>
    %30 = arith.truncf %29 : vector<16x128xf32> to vector<16x128xbf16>
    %c0_16 = arith.constant 0 : index
    %c0_17 = arith.constant 0 : index
    %31 = vector.load %arg8[%c0_16, %c0_17] : memref<512x32xbf16, #tpu.memory_space<vmem>>, vector<128x32xbf16>
    %cst_18 = arith.constant dense<0.000000e+00> : vector<16x32xf32>
    %32 = tpu.matmul %30, %31, %cst_18 {dimension_numbers = #tpu.dot_dimension_numbers<[1], [0], [0], [1], [0, 0, 1, 1], [], []>} : vector<16x128xbf16>, vector<128x32xbf16>, vector<16x32xf32> -> vector<16x32xf32>
    %33 = arith.addf %12, %32 : vector<16x32xf32>
    %34 = vector.extract_strided_slice %11 {offsets = [0, 128], sizes = [16, 128], strides = [1, 1]} : vector<16x512xbf16> to vector<16x128xbf16>
    %c128 = arith.constant 128 : index
    %c0_19 = arith.constant 0 : index
    %35 = vector.load %arg11[%c128, %c0_19] : memref<1024x24xbf16, #tpu.memory_space<vmem>>, vector<128x24xbf16>
    %c640 = arith.constant 640 : index
    %c0_20 = arith.constant 0 : index
    %36 = vector.load %arg11[%c640, %c0_20] : memref<1024x24xbf16, #tpu.memory_space<vmem>>, vector<128x24xbf16>
    %cst_21 = arith.constant dense<0.000000e+00> : vector<16x24xf32>
    %37 = tpu.matmul %34, %35, %cst_21 {dimension_numbers = #tpu.dot_dimension_numbers<[1], [0], [0], [1], [0, 0, 1, 1], [], []>} : vector<16x128xbf16>, vector<128x24xbf16>, vector<16x24xf32> -> vector<16x24xf32>
    %cst_22 = arith.constant dense<0xFF800000> : vector<16xf32>
    %38 = vector.multi_reduction <maximumf>, %37, %cst_22 [1] : vector<16x24xf32> to vector<16xf32>
    %39 = vector.shape_cast %38 : vector<16xf32> to vector<16x1xf32>
    %40 = vector.broadcast %39 : vector<16x1xf32> to vector<16x24xf32>
    %41 = arith.subf %37, %40 : vector<16x24xf32>
    %42 = math.exp %41 : vector<16x24xf32>
    %cst_23 = arith.constant dense<0.000000e+00> : vector<16xf32>
    %43 = vector.multi_reduction <add>, %42, %cst_23 [1] : vector<16x24xf32> to vector<16xf32>
    %44 = vector.shape_cast %43 : vector<16xf32> to vector<16x1xf32>
    %cst_24 = arith.constant 1.000000e+00 : f32
    %45 = vector.broadcast %cst_24 : f32 to vector<16x1xf32>
    %46 = arith.divf %45, %44 : vector<16x1xf32>
    %47 = vector.broadcast %46 : vector<16x1xf32> to vector<16x24xf32>
    %48 = arith.mulf %42, %47 : vector<16x24xf32>
    %49 = arith.truncf %48 : vector<16x24xf32> to vector<16x24xbf16>
    %cst_25 = arith.constant dense<0.000000e+00> : vector<16x128xf32>
    %50 = tpu.matmul %49, %36, %cst_25 {dimension_numbers = #tpu.dot_dimension_numbers<[1], [1], [0], [0], [0, 0, 1, 0], [], []>} : vector<16x24xbf16>, vector<128x24xbf16>, vector<16x128xf32> -> vector<16x128xf32>
    %51 = arith.truncf %50 : vector<16x128xf32> to vector<16x128xbf16>
    %c128_26 = arith.constant 128 : index
    %c0_27 = arith.constant 0 : index
    %52 = vector.load %arg8[%c128_26, %c0_27] : memref<512x32xbf16, #tpu.memory_space<vmem>>, vector<128x32xbf16>
    %cst_28 = arith.constant dense<0.000000e+00> : vector<16x32xf32>
    %53 = tpu.matmul %51, %52, %cst_28 {dimension_numbers = #tpu.dot_dimension_numbers<[1], [0], [0], [1], [0, 0, 1, 1], [], []>} : vector<16x128xbf16>, vector<128x32xbf16>, vector<16x32xf32> -> vector<16x32xf32>
    %54 = arith.addf %33, %53 : vector<16x32xf32>
    %55 = vector.extract_strided_slice %11 {offsets = [0, 256], sizes = [16, 128], strides = [1, 1]} : vector<16x512xbf16> to vector<16x128xbf16>
    %c256 = arith.constant 256 : index
    %c0_29 = arith.constant 0 : index
    %56 = vector.load %arg11[%c256, %c0_29] : memref<1024x24xbf16, #tpu.memory_space<vmem>>, vector<128x24xbf16>
    %c768 = arith.constant 768 : index
    %c0_30 = arith.constant 0 : index
    %57 = vector.load %arg11[%c768, %c0_30] : memref<1024x24xbf16, #tpu.memory_space<vmem>>, vector<128x24xbf16>
    %cst_31 = arith.constant dense<0.000000e+00> : vector<16x24xf32>
    %58 = tpu.matmul %55, %56, %cst_31 {dimension_numbers = #tpu.dot_dimension_numbers<[1], [0], [0], [1], [0, 0, 1, 1], [], []>} : vector<16x128xbf16>, vector<128x24xbf16>, vector<16x24xf32> -> vector<16x24xf32>
    %cst_32 = arith.constant dense<0xFF800000> : vector<16xf32>
    %59 = vector.multi_reduction <maximumf>, %58, %cst_32 [1] : vector<16x24xf32> to vector<16xf32>
    %60 = vector.shape_cast %59 : vector<16xf32> to vector<16x1xf32>
    %61 = vector.broadcast %60 : vector<16x1xf32> to vector<16x24xf32>
    %62 = arith.subf %58, %61 : vector<16x24xf32>
    %63 = math.exp %62 : vector<16x24xf32>
    %cst_33 = arith.constant dense<0.000000e+00> : vector<16xf32>
    %64 = vector.multi_reduction <add>, %63, %cst_33 [1] : vector<16x24xf32> to vector<16xf32>
    %65 = vector.shape_cast %64 : vector<16xf32> to vector<16x1xf32>
    %cst_34 = arith.constant 1.000000e+00 : f32
    %66 = vector.broadcast %cst_34 : f32 to vector<16x1xf32>
    %67 = arith.divf %66, %65 : vector<16x1xf32>
    %68 = vector.broadcast %67 : vector<16x1xf32> to vector<16x24xf32>
    %69 = arith.mulf %63, %68 : vector<16x24xf32>
    %70 = arith.truncf %69 : vector<16x24xf32> to vector<16x24xbf16>
    %cst_35 = arith.constant dense<0.000000e+00> : vector<16x128xf32>
    %71 = tpu.matmul %70, %57, %cst_35 {dimension_numbers = #tpu.dot_dimension_numbers<[1], [1], [0], [0], [0, 0, 1, 0], [], []>} : vector<16x24xbf16>, vector<128x24xbf16>, vector<16x128xf32> -> vector<16x128xf32>
    %72 = arith.truncf %71 : vector<16x128xf32> to vector<16x128xbf16>
    %c256_36 = arith.constant 256 : index
    %c0_37 = arith.constant 0 : index
    %73 = vector.load %arg8[%c256_36, %c0_37] : memref<512x32xbf16, #tpu.memory_space<vmem>>, vector<128x32xbf16>
    %cst_38 = arith.constant dense<0.000000e+00> : vector<16x32xf32>
    %74 = tpu.matmul %72, %73, %cst_38 {dimension_numbers = #tpu.dot_dimension_numbers<[1], [0], [0], [1], [0, 0, 1, 1], [], []>} : vector<16x128xbf16>, vector<128x32xbf16>, vector<16x32xf32> -> vector<16x32xf32>
    %75 = arith.addf %54, %74 : vector<16x32xf32>
    %76 = vector.extract_strided_slice %11 {offsets = [0, 384], sizes = [16, 128], strides = [1, 1]} : vector<16x512xbf16> to vector<16x128xbf16>
    %c384 = arith.constant 384 : index
    %c0_39 = arith.constant 0 : index
    %77 = vector.load %arg11[%c384, %c0_39] : memref<1024x24xbf16, #tpu.memory_space<vmem>>, vector<128x24xbf16>
    %c896 = arith.constant 896 : index
    %c0_40 = arith.constant 0 : index
    %78 = vector.load %arg11[%c896, %c0_40] : memref<1024x24xbf16, #tpu.memory_space<vmem>>, vector<128x24xbf16>
    %cst_41 = arith.constant dense<0.000000e+00> : vector<16x24xf32>
    %79 = tpu.matmul %76, %77, %cst_41 {dimension_numbers = #tpu.dot_dimension_numbers<[1], [0], [0], [1], [0, 0, 1, 1], [], []>} : vector<16x128xbf16>, vector<128x24xbf16>, vector<16x24xf32> -> vector<16x24xf32>
    %cst_42 = arith.constant dense<0xFF800000> : vector<16xf32>
    %80 = vector.multi_reduction <maximumf>, %79, %cst_42 [1] : vector<16x24xf32> to vector<16xf32>
    %81 = vector.shape_cast %80 : vector<16xf32> to vector<16x1xf32>
    %82 = vector.broadcast %81 : vector<16x1xf32> to vector<16x24xf32>
    %83 = arith.subf %79, %82 : vector<16x24xf32>
    %84 = math.exp %83 : vector<16x24xf32>
    %cst_43 = arith.constant dense<0.000000e+00> : vector<16xf32>
    %85 = vector.multi_reduction <add>, %84, %cst_43 [1] : vector<16x24xf32> to vector<16xf32>
    %86 = vector.shape_cast %85 : vector<16xf32> to vector<16x1xf32>
    %cst_44 = arith.constant 1.000000e+00 : f32
    %87 = vector.broadcast %cst_44 : f32 to vector<16x1xf32>
    %88 = arith.divf %87, %86 : vector<16x1xf32>
    %89 = vector.broadcast %88 : vector<16x1xf32> to vector<16x24xf32>
    %90 = arith.mulf %84, %89 : vector<16x24xf32>
    %91 = arith.truncf %90 : vector<16x24xf32> to vector<16x24xbf16>
    %cst_45 = arith.constant dense<0.000000e+00> : vector<16x128xf32>
    %92 = tpu.matmul %91, %78, %cst_45 {dimension_numbers = #tpu.dot_dimension_numbers<[1], [1], [0], [0], [0, 0, 1, 0], [], []>} : vector<16x24xbf16>, vector<128x24xbf16>, vector<16x128xf32> -> vector<16x128xf32>
    %93 = arith.truncf %92 : vector<16x128xf32> to vector<16x128xbf16>
    %c384_46 = arith.constant 384 : index
    %c0_47 = arith.constant 0 : index
    %94 = vector.load %arg8[%c384_46, %c0_47] : memref<512x32xbf16, #tpu.memory_space<vmem>>, vector<128x32xbf16>
    %cst_48 = arith.constant dense<0.000000e+00> : vector<16x32xf32>
    %95 = tpu.matmul %93, %94, %cst_48 {dimension_numbers = #tpu.dot_dimension_numbers<[1], [0], [0], [1], [0, 0, 1, 1], [], []>} : vector<16x128xbf16>, vector<128x32xbf16>, vector<16x32xf32> -> vector<16x32xf32>
    %96 = arith.addf %75, %95 : vector<16x32xf32>
    %c0_49 = arith.constant 0 : index
    %c0_50 = arith.constant 0 : index
    %97 = vector.load %arg9[%c0_49, %c0_50] : memref<1x32xf32, #tpu.memory_space<vmem>>, vector<1x32xf32>
    %98 = vector.broadcast %97 : vector<1x32xf32> to vector<16x32xf32>
    %99 = arith.addf %96, %98 : vector<16x32xf32>
    %100 = tpu.transpose %99, [1, 0] : vector<16x32xf32> -> vector<32x16xf32>
    %c0_51 = arith.constant 0 : index
    %c0_52 = arith.constant 0 : index
    %c0_53 = arith.constant 0 : index
    %101 = vector.load %arg10[%c0_51, %c0_52, %c0_53] : memref<1x32x16xf32, #tpu.memory_space<vmem>>, vector<1x32x16xf32>
    %102 = vector.shape_cast %101 : vector<1x32x16xf32> to vector<32x16xf32>
    %103 = vector.shape_cast %100 : vector<32x16xf32> to vector<1x32x16xf32>
    tpu.vector_store %arg10[%c0_51, %c0_52, %c0_53], %103 {strides = array<i32>} : memref<1x32x16xf32, #tpu.memory_space<vmem>>, vector<1x32x16xf32>,
    return
  }
  func.func @transform_0(%arg0: i32, %arg1: i32) -> (i32, i32, i32) {
    %c0_i32 = arith.constant 0 : i32
    %c0_i32_0 = arith.constant 0 : i32
    %c0_i32_1 = arith.constant 0 : i32
    return %arg0, %c0_i32, %c0_i32_0 : i32, i32, i32
  }
  func.func @transform_1(%arg0: i32, %arg1: i32) -> (i32, i32, i32) {
    %c0_i32 = arith.constant 0 : i32
    %c0_i32_0 = arith.constant 0 : i32
    return %arg0, %c0_i32, %arg1 : i32, i32, i32
  }
  func.func @transform_2(%arg0: i32, %arg1: i32) -> (i32, i32) {
    %c0_i32 = arith.constant 0 : i32
    %c0_i32_0 = arith.constant 0 : i32
    %c0_i32_1 = arith.constant 0 : i32
    return %c0_i32, %c0_i32_0 : i32, i32
  }
  func.func @transform_3(%arg0: i32, %arg1: i32) -> (i32, i32) {
    %c0_i32 = arith.constant 0 : i32
    %c0_i32_0 = arith.constant 0 : i32
    %c0_i32_1 = arith.constant 0 : i32
    return %c0_i32, %c0_i32_0 : i32, i32
  }
  func.func @transform_4(%arg0: i32, %arg1: i32) -> (i32, i32) {
    %c0_i32 = arith.constant 0 : i32
    %c0_i32_0 = arith.constant 0 : i32
    %c0_i32_1 = arith.constant 0 : i32
    return %c0_i32, %c0_i32_0 : i32, i32
  }
  func.func @transform_5(%arg0: i32, %arg1: i32) -> (i32, i32) {
    %c0_i32 = arith.constant 0 : i32
    %c0_i32_0 = arith.constant 0 : i32
    %c0_i32_1 = arith.constant 0 : i32
    return %c0_i32, %c0_i32_0 : i32, i32
  }
  func.func @transform_6(%arg0: i32, %arg1: i32) -> (i32, i32) {
    %c0_i32 = arith.constant 0 : i32
    %c0_i32_0 = arith.constant 0 : i32
    %c0_i32_1 = arith.constant 0 : i32
    return %c0_i32, %c0_i32_0 : i32, i32
  }
  func.func @transform_7(%arg0: i32, %arg1: i32) -> (i32, i32) {
    %c0_i32 = arith.constant 0 : i32
    %c0_i32_0 = arith.constant 0 : i32
    %c0_i32_1 = arith.constant 0 : i32
    return %c0_i32, %c0_i32_0 : i32, i32
  }
  func.func @transform_8(%arg0: i32, %arg1: i32) -> (i32, i32, i32) {
    %c0_i32 = arith.constant 0 : i32
    %c0_i32_0 = arith.constant 0 : i32
    return %arg0, %c0_i32, %arg1 : i32, i32, i32
  }
}

</mosaic_0001>

<bundles_post_ra>
// kernel: tpu_custom_call.1
= control target key start
LH: loop header
LB: loop body
LE: loop exit
PB: predicated region body
PF: predicated region fallthrough
CT: control target
= control target key end

     0   :  { %s4956_s27 = smov 0   ;;  %s4958_s28 = smov 0   ;;  %s6407_s0 = inlined_call_operand.vmem [shape: f32[2,32,24], index: 0, kind: input, shape index: {}]   ;;  %s6408_s1 = inlined_call_operand.vmem [shape: f32[2,32,16], index: 1, kind: input, shape index: {}]   ;;  %s6409_s2 = inlined_call_operand.vmem [shape: bf16[1024,32], index: 2, kind: input, shape index: {}]   ;;  %s6410_s3 = inlined_call_operand.vmem [shape: f32[1024,1], index: 3, kind: input, shape index: {}]   ;;  %s6411_s4 = inlined_call_operand.vmem [shape: bf16[32,512], index: 4, kind: input, shape index: {}]   ;;  %s6412_s5 = inlined_call_operand.vmem [shape: f32[1,512], index: 5, kind: input, shape index: {}]   ;;  %s6413_s6 = inlined_call_operand.vmem [shape: bf16[512,32], index: 6, kind: input, shape index: {}]   ;;  %s6414_s7 = inlined_call_operand.vmem [shape: f32[1,32], index: 7, kind: input, shape index: {}]   ;;  %s6415_s8 = inlined_call_operand.vmem [shape: f32[2,32,16], index: 8, kind: output, shape index: {}]  }
   0x1   :  { %s4960_s29 = smov 0  }
   0x2 LB: > { %s30_s30 = sadd.s32 1, %s4904_s28  ;;  %p3894_p0 = scmp.ge.s32.totalorder %s4908_s29, 1  ;;  %s4908_s29 = sphi %s4960_s29, %s18_s29   ;;  %s4904_s28 = sphi %s4958_s28, %s6483_s28   ;;  %s4900_s27 = sphi %s4956_s27, %s6482_s27  }
   0x3   : > { %p32_p1 = scmp.ge.s32.totalorder %s30_s30, 2  ;;  %p291_p2 = scmp.lt.s32.totalorder %s4908_s29, 3 }
   0x5   : > { %s6485_s30 = smov (%p32_p1, %s30_s30), 0  ;;  %p292_p3 = pnand %p3894_p0, %p291_p2 }
   0x7   : > { %295 = sbr.rel (%p292_p3) target bundleno = 2041 (0x7f9), region = 52 }
   0xc   : > { %v526_v0 = vld [vmem:[%s6410_s3 + $0xf0] sm:$0xff]  ;;  %v524_v1 = vld [vmem:[%s6410_s3 + $0xe0] sm:$0xff]  ;;  %p336_p4 = scmp.lt.s32.totalorder %s4900_s27, 1  ;;  %v4910_v2 = vmov 0   ;;  %v527_v3 = vld [vmem:[%s6410_s3 + $0xf8] sm:$0xff]  ;;  %vm1584_vm0 = vcmask 261120  }
   0xd   : > { %4851 = vset.pattern.permute.xlu2 %v4910_v2  ;;  %4850 = vset.pattern.permute.xlu1 %v4910_v2  ;;  %v525_v12 = vld [vmem:[%s6410_s3 + $0xe8] sm:$0xff]  ;;  %v4650_v14 = vld [vmem:[%s6409_s2] sm:$0xff]  ;;  %v522_v15 = vld [vmem:[%s6410_s3 + $0xd0] sm:$0xff]  ;;  %vm2234_vm1 = vcmask 191488   ;;  %vm2607_vm2 = vcmask 195584  }
   0xe   : > { %776 = vperm.xlu1 %4850, %v526_v0   ;;  %766 = vperm.xlu2 %4851, %v524_v1   ;;  %s6487_s27 = smov (!%p336_p4, %s4900_s27), 1  ;;  %v4688_v16 = vld [vmem:[%s6409_s2 + $0x130] sm:$0xff]  ;;  %v523_v17 = vld [vmem:[%s6410_s3 + $0xd8] sm:$0xff]  ;;  %v4675_v20 = vld [vmem:[%s6409_s2 + $0xc8] sm:$0xff] }
   0xf   : > { %s4982_s13 = sshll.u32 %s6487_s27, 5  ;;  %v521_v22 = vld [vmem:[%s6410_s3 + $0xc8] sm:$0xff]  ;;  %v518_v23 = vld [vmem:[%s6410_s3 + $0xb0] sm:$0xff]  ;;  %v4718_v24 = vld [vmem:[%s6411_s4 + $0x24] sm:$0xf] }
  0x10   : > { %s4988_s16 = scalar_lea.vmem %s6408_s1, %s4982_s13  ;;  %s340_s19 = scalar_lea.vmem %s6407_s0, %s4982_s13  ;;  %v4241_v25 = vld [vmem:[%s6411_s4 + $0x30] sm:$0xf0]  ;;  %v4651_v27 = vld [vmem:[%s6409_s2 + $0x8] sm:$0xff]  ;;  %v519_v28 = vld [vmem:[%s6410_s3 + $0xb8] sm:$0xff] }
  0x11   : > { %v2363_v4 = vld [vmem:[%s4988_s16] sm:$0xff]  ;;  %v2364_v5 = vld [vmem:[%s4988_s16 + $0x8] sm:$0xff]  ;;  %v364_v6 = vld [vmem:[%s340_s19 + $0x10] sm:$0xff]  ;;  %v4244_v26 = vor.u32 %v4718_v24, %v4241_v25  ;;  %s356_s17 = scalar_lea.vmem %s6415_s8, %s4982_s13 }
  0x12   : > { %v2367_v7 = vpack.c.bf16 %v2364_v5, %v2363_v4  ;;  %v365_v8 = vld [vmem:[%s340_s19 + $0x18] sm:$0xff]  ;;  %v362_v9 = vld [vmem:[%s340_s19] sm:$0xff]  ;;  %v363_v10 = vld [vmem:[%s340_s19 + $0x8] sm:$0xff] }
  0x13   : > { %v367_v11 = vpack.c.bf16 %v365_v8, %v364_v6  ;;  %v366_v13 = vpack.c.bf16 %v363_v10, %v362_v9  ;;  %v2365_v18 = vld [vmem:[%s4988_s16 + $0x10] sm:$0xff]  ;;  %v2366_v19 = vld [vmem:[%s4988_s16 + $0x18] sm:$0xff]  ;;  %v516_v30 = vld [vmem:[%s6410_s3 + $0xa0] sm:$0xff] }
  0x14   : > { %2387 = vxpose.xlu0.c.b16.start [1/2] (short) (narrow) %v2367_v7, 16  ;;  %v2368_v21 = vpack.c.bf16 %v2366_v19, %v2365_v18  ;;  %v4689_v29 = vld [vmem:[%s6409_s2 + $0x138] sm:$0xff]  ;;  %v4676_v31 = vld [vmem:[%s6409_s2 + $0xd0] sm:$0xff]  ;;  %v517_v32 = vld [vmem:[%s6410_s3 + $0xa8] sm:$0xff] }
  0x15   : > { %1783 = vmatpush.bf16.msra.mxu0 %v367_v11  ;;  %4819 = vmatpush.bf16.msra.mxu2 %v367_v11  ;;  %v514_v33 = vld [vmem:[%s6410_s3 + $0x90] sm:$0xff]  ;;  %v515_v35 = vld [vmem:[%s6410_s3 + $0x98] sm:$0xff]  ;;  %v4690_v36 = vld [vmem:[%s6409_s2 + $0x140] sm:$0xff] }
  0x16   : > { %781 = vperm.xlu1 %4850, %v527_v3   ;;  %771 = vperm.xlu2 %4851, %v525_v12   ;;  %v4652_v34 = vld [vmem:[%s6409_s2 + $0x10] sm:$0xff]  ;;  %v4702_v37 = vld [vmem:[%s6409_s2 + $0x1a0] sm:$0xff]  ;;  %v4677_v41 = vld [vmem:[%s6409_s2 + $0xd8] sm:$0xff] }
  0x17   : > { %4818 = vmatpush.bf16.msra.mxu1 %v367_v11  ;;  %4820 = vmatpush.bf16.msra.mxu3 %v367_v11  ;;  %v512_v38 = vld [vmem:[%s6410_s3 + $0x80] sm:$0xff]  ;;  %v4720_v40 = vld [vmem:[%s6411_s4 + $0x2c] sm:$0xf0]  ;;  %v513_v43 = vld [vmem:[%s6410_s3 + $0x88] sm:$0xff] }
  0x18   : > { %v4239_v39 = vld [vmem:[%s6411_s4 + $0x20] sm:$0xf]  ;;  %v590_v44 = vld [vmem:[%s6410_s3 + $0x2f0] sm:$0xff]  ;;  %v4653_v45 = vld [vmem:[%s6409_s2 + $0x18] sm:$0xff] }
  0x19   : > { %1784 = vmatpush.bf16.msra.mxu0 %v366_v13  ;;  %4822 = vmatpush.bf16.msra.mxu2 %v366_v13  ;;  %v4240_v42 = vor.u32 %v4720_v40, %v4239_v39  ;;  %v591_v46 = vld [vmem:[%s6410_s3 + $0x2f8] sm:$0xff]  ;;  %v4691_v47 = vld [vmem:[%s6409_s2 + $0x148] sm:$0xff]  ;;  %v588_v49 = vld [vmem:[%s6410_s3 + $0x2e0] sm:$0xff] }
  0x1a   : > { %v4703_v48 = vld [vmem:[%s6409_s2 + $0x1a8] sm:$0xff]  ;;  %v4678_v50 = vld [vmem:[%s6409_s2 + $0xe0] sm:$0xff]  ;;  %v586_v52 = vld [vmem:[%s6410_s3 + $0x2d0] sm:$0xff] }
  0x1b   : > { %4821 = vmatpush.bf16.msra.mxu1 %v366_v13  ;;  %4823 = vmatpush.bf16.msra.mxu3 %v366_v13  ;;  %v589_v51 = vld [vmem:[%s6410_s3 + $0x2e8] sm:$0xff]  ;;  %v4654_v53 = vld [vmem:[%s6409_s2 + $0x20] sm:$0xff]  ;;  %v511_v54 = vld [vmem:[%s6410_s3 + $0x78] sm:$0xff] }
  0x1c   : > { %4157 = vmatmul.msk.bf16.vlgmr.msra.gmra.mxu0 %vm1584_vm0, %v4650_v14  ;;  %4195 = vmatmul.msk.bf16.vlgmr.msra.gmra.mxu2 %vm1584_vm0, %v4688_v16  ;;  %v4692_v55 = vld [vmem:[%s6409_s2 + $0x150] sm:$0xff]  ;;  %v4679_v58 = vld [vmem:[%s6409_s2 + $0xe8] sm:$0xff]  ;;  %v584_v59 = vld [vmem:[%s6410_s3 + $0x2c0] sm:$0xff] }
  0x1d   : > { %2467 = vmatpush.bf16.msrb.mxu2 %v4244_v26  ;;  %v4704_v56 = vld [vmem:[%s6409_s2 + $0x1b0] sm:$0xff]  ;;  %v509_v60 = vld [vmem:[%s6410_s3 + $0x68] sm:$0xff]  ;;  %v507_v63 = vld [vmem:[%s6410_s3 + $0x58] sm:$0xff] }
  0x1e   : > { %756 = vperm.xlu1 %4850, %v522_v15   ;;  %761 = vperm.xlu2 %4851, %v523_v17   ;;  %v510_v57 = vld [vmem:[%s6410_s3 + $0x70] sm:$0xff]  ;;  %v4655_v62 = vld [vmem:[%s6409_s2 + $0x28] sm:$0xff]  ;;  %v4693_v0 = vld [vmem:[%s6409_s2 + $0x158] sm:$0xff] }
  0x1f   : > { %4182 = vmatmul.msk.bf16.vlgmr.msra.gmra.mxu1 %vm1584_vm0, %v4675_v20  ;;  %4209 = vmatmul.msk.bf16.vlgmr.msra.gmra.mxu3 %vm1584_vm0, %v4702_v37  ;;  %v4705_v1 = vld [vmem:[%s6409_s2 + $0x1b8] sm:$0xff]  ;;  %v506_v3 = vld [vmem:[%s6410_s3 + $0x50] sm:$0xff]  ;;  %v505_v7 = vld [vmem:[%s6410_s3 + $0x48] sm:$0xff] }
  0x20   : > { %2453 = vmatpush.bf16.msrb.mxu1 %v4240_v42  ;;  %v4680_v5 = vld [vmem:[%s6409_s2 + $0xf0] sm:$0xff]  ;;  %v503_v10 = vld [vmem:[%s6410_s3 + $0x38] sm:$0xff]  ;;  %v4694_v11 = vld [vmem:[%s6409_s2 + $0x160] sm:$0xff] }
  0x21   : > { %v582_v6 = vld [vmem:[%s6410_s3 + $0x2b0] sm:$0xff]  ;;  %v4706_v13 = vld [vmem:[%s6409_s2 + $0x1c0] sm:$0xff]  ;;  %v4681_v16 = vld [vmem:[%s6409_s2 + $0xf8] sm:$0xff] }
  0x22   : > { %v4656_v9 = vld [vmem:[%s6409_s2 + $0x30] sm:$0xff]  ;;  %v580_v17 = vld [vmem:[%s6410_s3 + $0x2a0] sm:$0xff]  ;;  %v501_v18 = vld [vmem:[%s6410_s3 + $0x28] sm:$0xff] }
  0x23   : > { %v502_v12 = vld [vmem:[%s6410_s3 + $0x30] sm:$0xff]  ;;  %v520_v26 = vld [vmem:[%s6410_s3 + $0xc0] sm:$0xff] }
  0x24   : > { %2388 = vxpose.xlu0.c.b16.end [2/2] (short) (narrow) %v2368_v21, 16  ;;  %v4657_v21 = vld [vmem:[%s6409_s2 + $0x38] sm:$0xff]  ;;  %v498_v24 = vld [vmem:[%s6410_s3 + $0x10] sm:$0xff]  ;;  %v508_v39 = vld [vmem:[%s6410_s3 + $0x60] sm:$0xff] }
  0x25   : > { %v4708_v37 = vld [vmem:[%s6409_s2 + $0x1d0] sm:$0xff] }
  0x26   : > { %751 = vperm.xlu1 %4850, %v521_v22   ;;  %736 = vperm.xlu2 %4851, %v518_v23   ;;  %v4695_v22 = vld [vmem:[%s6409_s2 + $0x168] sm:$0xff] }
  0x27   : > { %v4707_v23 = vld [vmem:[%s6409_s2 + $0x1c8] sm:$0xff] }
  0x2c   : > { %4158 = vmatmul.msk.bf16.gmra.mxu0 %vm1584_vm0, %v4651_v27  ;;  %4196 = vmatmul.msk.bf16.gmra.mxu2 %vm1584_vm0, %v4689_v29  ;;  %v587_v29 = vld [vmem:[%s6410_s3 + $0x2d8] sm:$0xff] }
  0x2e   : > { %741 = vperm.xlu1 %4850, %v519_v28   ;;  %726 = vperm.xlu2 %4851, %v516_v30   ;;  %v4682_v28 = vld [vmem:[%s6409_s2 + $0x100] sm:$0xff] }
  0x2f   : > { %4183 = vmatmul.msk.bf16.gmra.mxu1 %vm1584_vm0, %v4676_v31  ;;  %4210 = vmatmul.msk.bf16.gmra.mxu3 %vm1584_vm0, %v4703_v48  ;;  %v4658_v31 = vld [vmem:[%s6409_s2 + $0x40] sm:$0xff] }
  0x36   : > { %731 = vperm.xlu1 %4850, %v517_v32   ;;  %716 = vperm.xlu2 %4851, %v514_v33   ;;  %v4714_v33 = vld [vmem:[%s6411_s4 + $0x4] sm:$0xf] }
  0x3c   : > { %4159 = vmatmul.msk.bf16.gmra.mxu0 %vm1584_vm0, %v4652_v34  ;;  %4197 = vmatmul.msk.bf16.gmra.mxu2 %vm1584_vm0, %v4690_v36  ;;  %v4225_v34 = vld [vmem:[%s6411_s4 + $0x10] sm:$0xf0] }
  0x3d   : > { %v4696_v36 = vld [vmem:[%s6409_s2 + $0x170] sm:$0xff] }
  0x3e   : > { %721 = vperm.xlu1 %4850, %v515_v35   ;;  %706 = vperm.xlu2 %4851, %v512_v38   ;;  %v4228_v35 = vor.u32 %v4714_v33, %v4225_v34  ;;  %v4661_v33 = vld [vmem:[%s6409_s2 + $0x58] sm:$0xff] }
  0x3f   : > { %4184 = vmatmul.msk.bf16.gmra.mxu1 %vm1584_vm0, %v4677_v41  ;;  %4211 = vmatmul.msk.bf16.gmra.mxu3 %vm1584_vm0, %v4704_v56  ;;  %v4709_v56 = vld [vmem:[%s6409_s2 + $0x1d8] sm:$0xff] }
  0x40   : > { %2468 = vmatpush.bf16.msrb.mxu2 %v4228_v35 }
  0x46   : > { %711 = vperm.xlu1 %4850, %v513_v43   ;;  %1096 = vperm.xlu2 %4851, %v590_v44   ;;  %v4683_v43 = vld [vmem:[%s6409_s2 + $0x108] sm:$0xff] }
  0x4c   : > { %4160 = vmatmul.msk.bf16.gmra.mxu0 %vm1584_vm0, %v4653_v45  ;;  %4198 = vmatmul.msk.bf16.gmra.mxu2 %vm1584_vm0, %v4691_v47 }
  0x4e   : > { %1101 = vperm.xlu1 %4850, %v591_v46   ;;  %1086 = vperm.xlu2 %4851, %v588_v49   ;;  %v585_v46 = vld [vmem:[%s6410_s3 + $0x2c8] sm:$0xff] }
  0x4f   : > { %4185 = vmatmul.msk.bf16.gmra.mxu1 %vm1584_vm0, %v4678_v50  ;;  %4212 = vmatmul.msk.bf16.gmra.mxu3 %vm1584_vm0, %v4705_v1  ;;  %v4659_v49 = vld [vmem:[%s6409_s2 + $0x48] sm:$0xff] }
  0x56   : > { %1091 = vperm.xlu1 %4850, %v589_v51   ;;  %1076 = vperm.xlu2 %4851, %v586_v52   ;;  %v4223_v52 = vld [vmem:[%s6411_s4] sm:$0xf] }
  0x5c   : > { %4161 = vmatmul.msk.bf16.gmra.mxu0 %vm1584_vm0, %v4654_v53  ;;  %4199 = vmatmul.msk.bf16.gmra.mxu2 %vm1584_vm0, %v4692_v55  ;;  %v4716_v53 = vld [vmem:[%s6411_s4 + $0xc] sm:$0xf0]  ;;  %v4697_v55 = vld [vmem:[%s6409_s2 + $0x178] sm:$0xff] }
  0x5e   : > { %701 = vperm.xlu1 %4850, %v511_v54   ;;  %696 = vperm.xlu2 %4851, %v510_v57   ;;  %v4224_v54 = vor.u32 %v4716_v53, %v4223_v52 }
  0x5f   : > { %4186 = vmatmul.msk.bf16.gmra.mxu1 %vm1584_vm0, %v4679_v58  ;;  %4213 = vmatmul.msk.bf16.gmra.mxu3 %vm1584_vm0, %v4706_v13  ;;  %v504_v58 = vld [vmem:[%s6410_s3 + $0x40] sm:$0xff] }
  0x60   : > { %2454 = vmatpush.bf16.msrb.mxu1 %v4224_v54  ;;  %v4686_v54 = vld [vmem:[%s6409_s2 + $0x120] sm:$0xff] }
  0x66   : > { %1066 = vperm.xlu1 %4850, %v584_v59   ;;  %691 = vperm.xlu2 %4851, %v509_v60  }
  0x68   : > { %v5148_v61 = vpop.permute.xlu2 %766 }
  0x6c   : > { %4162 = vmatmul.msk.bf16.gmra.mxu0 %vm1584_vm0, %v4655_v62  ;;  %4200 = vmatmul.msk.bf16.gmra.mxu2 %vm1584_vm0, %v4693_v0 }
  0x6e   : > { %681 = vperm.xlu1 %4850, %v507_v63   ;;  %676 = vperm.xlu2 %4851, %v506_v3   ;;  %v4684_v63 = vld [vmem:[%s6409_s2 + $0x110] sm:$0xff]  ;;  %v583_v3 = vld [vmem:[%s6410_s3 + $0x2b8] sm:$0xff] }
  0x6f   : > { %4187 = vmatmul.msk.bf16.gmra.mxu1 %vm1584_vm0, %v4680_v5  ;;  %4214 = vmatmul.msk.bf16.gmra.mxu3 %vm1584_vm0, %v4707_v23 }
  0x70   : > { %v5168_v4 = vpop.permute.xlu2 %771 }
  0x76   : > { %1056 = vperm.xlu1 %4850, %v582_v6   ;;  %671 = vperm.xlu2 %4851, %v505_v7   ;;  %v4660_v7 = vld [vmem:[%s6409_s2 + $0x50] sm:$0xff] }
  0x78   : > { %v5180_v8 = vpop.permute.xlu2 %761 }
  0x7c   : > { %4163 = vmatmul.msk.bf16.gmra.mxu0 %vm1584_vm0, %v4656_v9  ;;  %4201 = vmatmul.msk.bf16.gmra.mxu2 %vm1584_vm0, %v4694_v11  ;;  %v4698_v11 = vld [vmem:[%s6409_s2 + $0x180] sm:$0xff] }
  0x7e   : > { %661 = vperm.xlu1 %4850, %v503_v10   ;;  %656 = vperm.xlu2 %4851, %v502_v12   ;;  %v4710_v12 = vld [vmem:[%s6409_s2 + $0x1e0] sm:$0xff] }
  0x7f   : > { %4188 = vmatmul.msk.bf16.gmra.mxu1 %vm1584_vm0, %v4681_v16  ;;  %4215 = vmatmul.msk.bf16.gmra.mxu3 %vm1584_vm0, %v4708_v37  ;;  %v500_v16 = vld [vmem:[%s6410_s3 + $0x20] sm:$0xff]  ;;  %v4699_v37 = vld [vmem:[%s6409_s2 + $0x188] sm:$0xff] }
  0x80   : > { %v5200_v14 = vpop.permute.xlu1 %776  ;;  %v5202_v15 = vpop.permute.xlu2 %736 }
  0x86   : > { %1046 = vperm.xlu1 %4850, %v580_v17   ;;  %651 = vperm.xlu2 %4851, %v501_v18  }
  0x88   : > { %v5214_v19 = vpop.permute.xlu1 %781  ;;  %v5216_v20 = vpop.permute.xlu2 %726 }
  0x8b   : > { %4852 = vset.pattern.permute.xlu0 %v4910_v2 }
  0x8c   : > { %4164 = vmatmul.msk.bf16.gmra.mxu0 %vm1584_vm0, %v4657_v21  ;;  %4202 = vmatmul.msk.bf16.gmra.mxu2 %vm1584_vm0, %v4695_v22  ;;  %v4685_v22 = vld [vmem:[%s6409_s2 + $0x118] sm:$0xff] }
  0x8e   : > { %636 = vperm.xlu2 %4851, %v498_v24  }
  0x8f   : > { %4189 = vmatmul.msk.bf16.gmra.mxu1 %vm1584_vm0, %v4682_v28  ;;  %4216 = vmatmul.msk.bf16.gmra.mxu3 %vm1584_vm0, %v4709_v56  ;;  %v581_v28 = vld [vmem:[%s6410_s3 + $0x2a8] sm:$0xff] }
  0x90   : > { %v5234_v25 = vpop.permute.xlu1 %756  ;;  %v5239_v27 = vpop.permute.xlu2 %716 }
  0x92   : > { %746 = vperm.xlu0 %4852, %v520_v26  }
  0x98   : > { %v5245_v2 = vpop.permute.xlu1 %751  ;;  %v5250_v30 = vpop.permute.xlu2 %706 }
  0x99   : > { %v5255_v32 = vpop.f32.mrf.mxu0 }
  0x9a   : > { %1081 = vperm.xlu0 %4852, %v587_v29  }
  0x9c   : > { %4165 = vmatmul.msk.bf16.gmra.mxu0 %vm1584_vm0, %v4658_v31  ;;  %4203 = vmatmul.msk.bf16.gmra.mxu2 %vm1584_vm0, %v4696_v36  ;;  %v5277_v40 = vpop.f32.mrf.mxu1 }
  0x9f   : > { %v5281_v42 = vpop.f32.mrf.mxu2  ;;  %4190 = vmatmul.msk.bf16.gmra.mxu1 %vm1584_vm0, %v4683_v43  ;;  %4217 = vmatmul.msk.bf16.gmra.mxu3 %vm1584_vm0, %v4710_v12 }
  0xa0   : > { %v5272_v38 = vpop.permute.xlu1 %741  ;;  %v5279_v41 = vpop.permute.xlu2 %1096 }
  0xa1   : > { %v5286_v44 = vpop.f32.mrf.mxu0 }
  0xa2   : > { %686 = vperm.xlu0 %4852, %v508_v39   ;;  %v5376_v24 = vpop.f32.mrf.mxu3  ;;  %v4711_v39 = vld [vmem:[%s6409_s2 + $0x1e8] sm:$0xff] }
  0xa4   : > { %v5294_v47 = vpop.f32.mrf.mxu1 }
  0xa5   : > { %6416 = vst [vmem:[#allocation3_spill] sm:$0xff] %v5294_v47 }
  0xa7   : > { %v5301_v50 = vpop.f32.mrf.mxu2 }
  0xa8   : > { %v5289_v45 = vpop.permute.xlu1 %731  ;;  %v5296_v48 = vpop.permute.xlu2 %1086 }
  0xa9   : > { %v5303_v51 = vpop.f32.mrf.mxu0 }
  0xaa   : > { %1071 = vperm.xlu0 %4852, %v585_v46   ;;  %v5391_v36 = vpop.f32.mrf.mxu3  ;;  %v496_v46 = vld [vmem:[%s6410_s3] sm:$0xff] }
  0xac   : > { %4166 = vmatmul.msk.bf16.gmra.mxu0 %vm1584_vm0, %v4659_v49  ;;  %4204 = vmatmul.msk.bf16.gmra.mxu2 %vm1584_vm0, %v4697_v55  ;;  %v5325_v59 = vpop.f32.mrf.mxu1 }
  0xaf   : > { %v5329_v62 = vpop.f32.mrf.mxu2  ;;  %4191 = vmatmul.msk.bf16.gmra.mxu1 %vm1584_vm0, %v4684_v63  ;;  %4218 = vmatmul.msk.bf16.gmra.mxu3 %vm1584_vm0, %v4711_v39  ;;  %v579_v63 = vld [vmem:[%s6410_s3 + $0x298] sm:$0xff] }
  0xb0   : > { %v5320_v57 = vpop.permute.xlu1 %721  ;;  %v5327_v60 = vpop.permute.xlu2 %1076 }
  0xb1   : > { %v5334_v0 = vpop.f32.mrf.mxu0 }
  0xb2   : > { %666 = vperm.xlu0 %4852, %v504_v58   ;;  %v5414_v56 = vpop.f32.mrf.mxu3 }
  0xb4   : > { %v5342_v5 = vpop.f32.mrf.mxu1 }
  0xb5   : > { %6417 = vst [vmem:[#allocation4_spill] sm:$0xff] %v5342_v5 }
  0xb7   : > { %v5349_v9 = vpop.f32.mrf.mxu2 }
  0xb8   : > { %v5337_v1 = vpop.permute.xlu1 %711  ;;  %v5344_v6 = vpop.permute.xlu2 %696  ;;  %6418 = vst [vmem:[#allocation5_spill] sm:$0xff] %v5349_v9 }
  0xb9   : > { %v5351_v10 = vpop.f32.mrf.mxu0 }
  0xba   : > { %1061 = vperm.xlu0 %4852, %v583_v3  }
  0xbc   : > { %4167 = vmatmul.msk.bf16.gmra.mxu0 %vm1584_vm0, %v4660_v7  ;;  %4205 = vmatmul.msk.bf16.gmra.mxu2 %vm1584_vm0, %v4698_v11  ;;  %v5367_v17 = vpop.f32.mrf.mxu1  ;;  %v4662_v11 = vld [vmem:[%s6409_s2 + $0x60] sm:$0xff] }
  0xbf   : > { %v5371_v21 = vpop.f32.mrf.mxu2  ;;  %4192 = vmatmul.msk.bf16.gmra.mxu1 %vm1584_vm0, %v4685_v22 }
  0xc0   : > { %v5362_v13 = vpop.permute.xlu1 %1101  ;;  %v5369_v18 = vpop.permute.xlu2 %691 }
  0xc1   : > { %v1798_v23 = vpop.f32.mrf.mxu0 }
  0xc2   : > { %646 = vperm.xlu0 %4852, %v500_v16  }
  0xc4   : > { %v5384_v29 = vpop.f32.mrf.mxu1 }
  0xc7   : > { %v5389_v34 = vpop.f32.mrf.mxu2 }
  0xc8   : > { %v5379_v26 = vpop.permute.xlu1 %1091  ;;  %v677_v31 = vpop.permute.xlu2 %676 }
  0xc9   : > { %v1801_v35 = vpop.f32.mrf.mxu0 }
  0xca   : > { %1051 = vperm.xlu0 %4852, %v581_v28   ;;  %v5431_v28 = vpop.f32.mrf.mxu3 }
  0xcb   : > { %6420 = vst [vmem:[#allocation7_spill] sm:$0xff] %v5431_v28 }
  0xcc   : > { %4168 = vmatmul.msk.bf16.gmra.mxu0 %vm1584_vm0, %v4661_v33  ;;  %4206 = vmatmul.msk.bf16.gmra.mxu2 %vm1584_vm0, %v4699_v37  ;;  %v5407_v49 = vpop.f32.mrf.mxu1  ;;  %v4700_v33 = vld [vmem:[%s6409_s2 + $0x190] sm:$0xff] }
  0xcd   : > { %6419 = vst [vmem:[#allocation6_spill] sm:$0xff] %v5407_v49  ;;  %v4712_v37 = vld [vmem:[%s6409_s2 + $0x1f0] sm:$0xff] }
  0xce   : > { %4219 = vmatmul.msk.bf16.gmra.mxu3 %vm1584_vm0, %v4712_v37 }
  0xcf   : > { %v5409_v53 = vpop.f32.mrf.mxu2  ;;  %4193 = vmatmul.msk.bf16.gmra.mxu1 %vm1584_vm0, %v4686_v54 }
  0xd0   : > { %v5402_v43 = vpop.permute.xlu1 %701  ;;  %v672_v52 = vpop.permute.xlu2 %671 }
  0xd1   : > { %v1803_v55 = vpop.f32.mrf.mxu0 }
  0xd2   : > { %626 = vperm.xlu0 %4852, %v496_v46  }
  0xd4   : > { %v5422_v3 = vpop.f32.mrf.mxu1 }
  0xd7   : > { %v5427_v12 = vpop.f32.mrf.mxu2 }
  0xd8   : > { %v5417_v58 = vpop.permute.xlu1 %1066  ;;  %v657_v7 = vpop.permute.xlu2 %656 }
  0xd9   : > { %v1802_v16 = vadd.f32 %v1801_v35, %v657_v7  ;;  %v5429_v22 = vpop.f32.mrf.mxu0  ;;  %v4687_v7 = vld [vmem:[%s6409_s2 + $0x128] sm:$0xff] }
  0xda   : > { %1041 = vperm.xlu0 %4852, %v579_v63  }
  0xdb   : > { %v2112_v39 = vpack.c.bf16 %v1802_v16, %v1802_v16  ;;  %v5448_v16 = vpop.f32.mrf.mxu3 }
  0xdc   : > { %4169 = vmatmul.msk.bf16.gmra.mxu0 %vm1584_vm0, %v4662_v11  ;;  %4207 = vmatmul.msk.bf16.gmra.mxu2 %vm1584_vm0, %v4700_v33  ;;  %v5443_v46 = vpop.f32.mrf.mxu1  ;;  %6422 = vst [vmem:[#allocation9_spill] sm:$0xff] %v5448_v16 }
  0xdd   : > { %2241 = vst.msk [vmem:[#allocation2 + $0x18] sm:$0xf] %vm2234_vm1, %v2112_v39 }
  0xde   : > { %6421 = vst [vmem:[#allocation8_spill] sm:$0xff] %v5443_v46 }
  0xdf   : > { %v1996_v63 = vpop.f32.mrf.mxu2  ;;  %4194 = vmatmul.msk.bf16.gmra.mxu1 %vm1584_vm0, %v4687_v7 }
  0xe0   : > { %v682_v35 = vpop.permute.xlu1 %681  ;;  %v652_v54 = vpop.permute.xlu2 %651 }
  0xe1   : > { %v1799_v28 = vadd.f32 %v1798_v23, %v652_v54  ;;  %v1808_v5 = vpop.f32.mrf.mxu0  ;;  %v4663_v23 = vld [vmem:[%s6409_s2 + $0x68] sm:$0xff] }
  0xe2   : > { %v1809_v11 = vadd.f32 %v1808_v5, %v672_v52 }
  0xe3   : > { %v2111_v39 = vpack.c.bf16 %v1799_v28, %v1799_v28  ;;  %v5461_v7 = vpop.f32.mrf.mxu3 }
  0xe4   : > { %v2115_v33 = vpack.c.bf16 %v1809_v11, %v1809_v11  ;;  %v5453_v9 = vpop.f32.mrf.mxu1  ;;  %6424 = vst [vmem:[#allocation11_spill] sm:$0xff] %v5461_v7  ;;  %v4701_v11 = vld [vmem:[%s6409_s2 + $0x198] sm:$0xff] }
  0xe5   : > { %2240 = vst.msk [vmem:[#allocation2 + $0x14] sm:$0xf] %vm2234_vm1, %v2111_v39  ;;  %v4713_v39 = vld [vmem:[%s6409_s2 + $0x1f8] sm:$0xff] }
  0xe6   : > { %2244 = vst.msk [vmem:[#allocation2 + $0x24] sm:$0xf] %vm2234_vm1, %v2115_v33  ;;  %4220 = vmatmul.msk.bf16.gmra.mxu3 %vm1584_vm0, %v4713_v39 }
  0xe7   : > { %6423 = vst [vmem:[#allocation10_spill] sm:$0xff] %v5453_v9  ;;  %v5458_v54 = vpop.f32.mrf.mxu2 }
  0xe8   : > { %v1057_v37 = vpop.permute.xlu1 %1056  ;;  %v637_v46 = vpop.permute.xlu2 %636 }
  0xe9   : > { %v1792_v5 = vadd.f32 %v5303_v51, %v637_v46  ;;  %v1811_v52 = vpop.f32.mrf.mxu0 }
  0xea   : > { %v1812_v28 = vadd.f32 %v1811_v52, %v677_v31  ;;  %v2395_v52 = vpop.trf.xlu0 }
  0xeb   : > { %v2108_v33 = vpack.c.bf16 %v1792_v5, %v1792_v5  ;;  %v5476_v5 = vpop.f32.mrf.mxu3 }
  0xec   : > { %v2116_v16 = vpack.c.bf16 %v1812_v28, %v1812_v28  ;;  %4170 = vmatmul.msk.bf16.gmra.mxu0 %vm1584_vm0, %v4663_v23  ;;  %4208 = vmatmul.msk.bf16.gmra.mxu2 %vm1584_vm0, %v4701_v11  ;;  %v5474_v31 = vpop.f32.mrf.mxu1  ;;  %6425 = vst [vmem:[#allocation12_spill] sm:$0xff] %v5476_v5  ;;  %v4721_v11 = vld [vmem:[%s6411_s4 + $0x34] sm:$0xf0] }
  0xed   : > { %2237 = vst.msk [vmem:[#allocation2 + $0x8] sm:$0xf] %vm2234_vm1, %v2108_v33 }
  0xee   : > { %2245 = vst.msk [vmem:[#allocation2 + $0x28] sm:$0xf] %vm2234_vm1, %v2116_v16  ;;  %v4247_v16 = vld [vmem:[%s6411_s4 + $0x28] sm:$0xf] }
  0xef   : > { %v2001_v7 = vpop.f32.mrf.mxu2  ;;  %4253 = vmatmul.msk.bf16.vlgmr.msrb.gmra.mxu1 %vm1584_vm0, %v2395_v52 }
  0xf0   : > { %v662_v51 = vpop.permute.xlu1 %661  ;;  %v2002_v49 = vadd.f32 %v2001_v7, %v1057_v37 }
  0xf1   : > { %v1804_v46 = vadd.f32 %v1803_v55, %v662_v51  ;;  %v1813_v47 = vpop.f32.mrf.mxu0  ;;  %v4248_v55 = vor.u32 %v4721_v11, %v4247_v16  ;;  %v4664_v51 = vld [vmem:[%s6409_s2 + $0x70] sm:$0xff]  ;;  %v4249_v16 = vld [vmem:[%s6411_s4 + $0x38] sm:$0xf0] }
  0xf2   : > { %v1814_v23 = vadd.f32 %v1813_v47, %v682_v35  ;;  %v2192_v39 = vpack.c.bf16 %v2002_v49, %v2002_v49  ;;  %v4231_v47 = vld [vmem:[%s6411_s4 + $0x8] sm:$0xf]  ;;  %v4717_v35 = vld [vmem:[%s6411_s4 + $0x14] sm:$0xf0] }
  0xf3   : > { %v2113_v28 = vpack.c.bf16 %v1804_v46, %v1804_v46  ;;  %2481 = vmatpush.bf16.msrb.mxu3 %v4248_v55  ;;  %v4232_v49 = vor.u32 %v4717_v35, %v4231_v47  ;;  %v4233_v47 = vld [vmem:[%s6411_s4 + $0x18] sm:$0xf0] }
  0xf4   : > { %v2117_v33 = vpack.c.bf16 %v1814_v23, %v1814_v23  ;;  %2321 = vst.msk [vmem:[#allocation2 + $0x158] sm:$0xf] %vm2234_vm1, %v2192_v39  ;;  %v5494_v7 = vpop.f32.mrf.mxu1  ;;  %v4719_v23 = vld [vmem:[%s6411_s4 + $0x2c] sm:$0xf]  ;;  %v5507_v39 = vpop.f32.mrf.mxu3 }
  0xf5   : > { %2242 = vst.msk [vmem:[#allocation2 + $0x1c] sm:$0xf] %vm2234_vm1, %v2113_v28  ;;  %v4252_v55 = vor.u32 %v4719_v23, %v4249_v16 }
  0xf6   : > { %2246 = vst.msk [vmem:[#allocation2 + $0x2c] sm:$0xf] %vm2234_vm1, %v2117_v33 }
  0xf7   : > { %v5499_v28 = vpop.f32.mrf.mxu2  ;;  %6426 = vst [vmem:[#allocation13_spill] sm:$0xff] %v5507_v39  ;;  %2482 = vmatpush.bf16.msrb.mxu3 %v4232_v49  ;;  %2495 = vmatpush.bf16.msra.mxu1 %v4252_v55 }
  0xf8   : > { %v1047_v37 = vpop.permute.xlu1 %1046 }
  0xf9   : > { %v1997_v46 = vadd.f32 %v1996_v63, %v1047_v37  ;;  %v1816_v11 = vpop.f32.mrf.mxu0  ;;  %v4715_v63 = vld [vmem:[%s6411_s4 + $0xc] sm:$0xf] }
  0xfa   : > { %v4236_v35 = vor.u32 %v4715_v63, %v4233_v47  ;;  %4255 = vmatmul.msk.bf16.vlgmr.msrb.gmra.mxu3 %vm1584_vm0, %v2395_v52 }
  0xfb   : > { %v2190_v33 = vpack.c.bf16 %v1997_v46, %v1997_v46 }
  0xfc   : > { %4171 = vmatmul.msk.bf16.gmra.mxu0 %vm1584_vm0, %v4664_v51  ;;  %4254 = vmatmul.msk.bf16.vlgmr.msrb.gmra.mxu2 %vm1584_vm0, %v2395_v52  ;;  %v5519_v37 = vpop.f32.mrf.mxu1  ;;  %v5522_v23 = vpop.f32.mrf.mxu3 }
  0xfd   : > { %2319 = vst.msk [vmem:[#allocation2 + $0x150] sm:$0xf] %vm2234_vm1, %v2190_v33  ;;  %2496 = vmatpush.bf16.msra.mxu1 %v4236_v35 }
  0xfe   : > { %6427 = vst [vmem:[#allocation14_spill] sm:$0xff] %v5522_v23 }
  0xff   : > { %v2006_v49 = vpop.f32.mrf.mxu2 }
 0x100   : > { %v2007_v46 = vadd.f32 %v2006_v49, %v5417_v58  ;;  %4256 = vmatmul.msk.bf16.vlgmr.msra.gmra.mxu1 %vm1584_vm0, %v2395_v52  ;;  %v4665_v58 = vld [vmem:[%s6409_s2 + $0x78] sm:$0xff] }
 0x101   : > { %v1818_v51 = vpop.f32.mrf.mxu0 }
 0x102   : > { %v1819_v16 = vadd.f32 %v1818_v51, %v5369_v18  ;;  %v2194_v55 = vpack.c.bf16 %v2007_v46, %v2007_v46 }
 0x104   : > { %v2119_v33 = vpack.c.bf16 %v1819_v16, %v1819_v16  ;;  %v5526_v63 = vpop.permute.xlu0 %746  ;;  %2323 = vst.msk [vmem:[#allocation2 + $0x160] sm:$0xf] %vm2234_vm1, %v2194_v55  ;;  %v5530_v47 = vpop.f32.mrf.mxu1 }
 0x105   : > { %6428 = vst [vmem:[#allocation15_spill] sm:$0xff] %v5530_v47  ;;  %v5535_v23 = vpop.f32.mrf.mxu3 }
 0x106   : > { %2248 = vst.msk [vmem:[#allocation2 + $0x34] sm:$0xf] %vm2234_vm1, %v2119_v33 }
 0x107   : > { %v2008_v35 = vpop.f32.mrf.mxu2  ;;  %6429 = vst [vmem:[#allocation16_spill] sm:$0xff] %v5535_v23 }
 0x109   : > { %v1821_v49 = vpop.f32.mrf.mxu0 }
 0x10a   : > { %v1822_v18 = vadd.f32 %v1821_v49, %v5344_v6 }
 0x10c   : > { %v2120_v52 = vpack.c.bf16 %v1822_v18, %v1822_v18  ;;  %4172 = vmatmul.msk.bf16.gmra.mxu0 %vm1584_vm0, %v4665_v58  ;;  %v1082_v51 = vpop.permute.xlu0 %1081  ;;  %v5540_v46 = vpop.f32.mrf.mxu1 }
 0x10d   : > { %v5543_v39 = vpop.f32.mrf.mxu3 }
 0x10e   : > { %2249 = vst.msk [vmem:[#allocation2 + $0x38] sm:$0xf] %vm2234_vm1, %v2120_v52 }
 0x10f   : > { %v2011_v16 = vpop.f32.mrf.mxu2  ;;  %6430 = vst [vmem:[#allocation17_spill] sm:$0xff] %v5543_v39 }
 0x110   : > { %v2012_v33 = vadd.f32 %v2011_v16, %v5327_v60 }
 0x111   : > { %v1823_v55 = vpop.f32.mrf.mxu0 }
 0x112   : > { %v1824_v47 = vadd.f32 %v1823_v55, %v5402_v43  ;;  %v2196_v5 = vpack.c.bf16 %v2012_v33, %v2012_v33 }
 0x114   : > { %v2121_v23 = vpack.c.bf16 %v1824_v47, %v1824_v47  ;;  %v687_v9 = vpop.permute.xlu0 %686  ;;  %2325 = vst.msk [vmem:[#allocation2 + $0x168] sm:$0xf] %vm2234_vm1, %v2196_v5  ;;  %v5548_v49 = vpop.f32.mrf.mxu1 }
 0x115   : > { %v1817_v6 = vadd.f32 %v1816_v11, %v687_v9  ;;  %v5551_v16 = vpop.f32.mrf.mxu3 }
 0x116   : > { %2250 = vst.msk [vmem:[#allocation2 + $0x3c] sm:$0xf] %vm2234_vm1, %v2121_v23 }
 0x117   : > { %v2118_v58 = vpack.c.bf16 %v1817_v6, %v1817_v6  ;;  %v2013_v18 = vpop.f32.mrf.mxu2  ;;  %6431 = vst [vmem:[#allocation18_spill] sm:$0xff] %v5551_v16 }
 0x118   : > { %v2014_v60 = vadd.f32 %v2013_v18, %v1082_v51 }
 0x119   : > { %2247 = vst.msk [vmem:[#allocation2 + $0x30] sm:$0xf] %vm2234_vm1, %v2118_v58  ;;  %v1826_v52 = vpop.f32.mrf.mxu0 }
 0x11a   : > { %v1827_v43 = vadd.f32 %v1826_v52, %v5250_v30  ;;  %v2197_v55 = vpack.c.bf16 %v2014_v60, %v2014_v60 }
 0x11c   : > { %v2122_v47 = vpack.c.bf16 %v1827_v43, %v1827_v43  ;;  %v1072_v33 = vpop.permute.xlu0 %1071  ;;  %2326 = vst.msk [vmem:[#allocation2 + $0x16c] sm:$0xf] %vm2234_vm1, %v2197_v55  ;;  %v5556_v23 = vpop.f32.mrf.mxu1 }
 0x11d   : > { %v4729_v9 = vld [vmem:[#allocation2 + $0x38] sm:$0xff]  ;;  %v2009_v11 = vadd.f32 %v2008_v35, %v1072_v33  ;;  %v5561_v52 = vpop.f32.mrf.mxu3 }
 0x11e   : > { %2251 = vst.msk [vmem:[#allocation2 + $0x40] sm:$0xf] %vm2234_vm1, %v2122_v47  ;;  %2593 = vmatpush.bf16.msra.mxu2 %v4729_v9  ;;  %v4727_v47 = vld [vmem:[#allocation2 + $0x28] sm:$0xff] }
 0x11f   : > { %v2195_v5 = vpack.c.bf16 %v2009_v11, %v2009_v11  ;;  %v2016_v51 = vpop.f32.mrf.mxu2  ;;  %6432 = vst [vmem:[#allocation19_spill] sm:$0xff] %v5561_v52 }
 0x120   : > { %v4728_v6 = vld [vmem:[#allocation2 + $0x30] sm:$0xff]  ;;  %v2017_v18 = vadd.f32 %v2016_v51, %v5296_v48 }
 0x121   : > { %v1828_v58 = vpop.f32.mrf.mxu0  ;;  %2324 = vst.msk [vmem:[#allocation2 + $0x164] sm:$0xf] %vm2234_vm1, %v2195_v5 }
 0x122   : > { %v1829_v30 = vadd.f32 %v1828_v58, %v5337_v1  ;;  %2594 = vmatpush.bf16.msra.mxu2 %v4728_v6  ;;  %v2198_v43 = vpack.c.bf16 %v2017_v18, %v2017_v18 }
 0x124   : > { %v2123_v35 = vpack.c.bf16 %v1829_v30, %v1829_v30  ;;  %v667_v60 = vpop.permute.xlu0 %666  ;;  %2327 = vst.msk [vmem:[#allocation2 + $0x170] sm:$0xf] %vm2234_vm1, %v2198_v43  ;;  %v5566_v9 = vpop.f32.mrf.mxu1 }
 0x125   : > { %v1807_v55 = vadd.f32 %v5429_v22, %v667_v60  ;;  %v5571_v6 = vpop.f32.mrf.mxu3 }
 0x126   : > { %2252 = vst.msk [vmem:[#allocation2 + $0x44] sm:$0xf] %vm2234_vm1, %v2123_v35  ;;  %2595 = vmatpush.bf16.msra.mxu2 %v4727_v47 }
 0x127   : > { %v2114_v33 = vpack.c.bf16 %v1807_v55, %v1807_v55  ;;  %v2018_v1 = vpop.f32.mrf.mxu2  ;;  %6433 = vst [vmem:[#allocation20_spill] sm:$0xff] %v5571_v6 }
 0x128   : > { %v2019_v5 = vadd.f32 %v2018_v1, %v5379_v26 }
 0x129   : > { %2243 = vst.msk [vmem:[#allocation2 + $0x20] sm:$0xf] %vm2234_vm1, %v2114_v33  ;;  %v1831_v48 = vpop.f32.mrf.mxu0 }
 0x12a   : > { %v1832_v11 = vadd.f32 %v1831_v48, %v5239_v27  ;;  %v2199_v51 = vpack.c.bf16 %v2019_v5, %v2019_v5  ;;  %v4725_v48 = vld [vmem:[#allocation2 + $0x18] sm:$0xff] }
 0x12c   : > { %v2124_v22 = vpack.c.bf16 %v1832_v11, %v1832_v11  ;;  %v1062_v58 = vpop.permute.xlu0 %1061  ;;  %2328 = vst.msk [vmem:[#allocation2 + $0x174] sm:$0xf] %vm2234_vm1, %v2199_v51  ;;  %v5576_v35 = vpop.f32.mrf.mxu1 }
 0x12d   : > { %v2004_v30 = vadd.f32 %v5499_v28, %v1062_v58  ;;  %v5581_v47 = vpop.f32.mrf.mxu3 }
 0x12e   : > { %2253 = vst.msk [vmem:[#allocation2 + $0x48] sm:$0xf] %vm2234_vm1, %v2124_v22 }
 0x12f   : > { %v2193_v18 = vpack.c.bf16 %v2004_v30, %v2004_v30  ;;  %v2021_v43 = vpop.f32.mrf.mxu2  ;;  %6434 = vst [vmem:[#allocation21_spill] sm:$0xff] %v5581_v47 }
 0x130   : > { %v4726_v60 = vld [vmem:[#allocation2 + $0x20] sm:$0xff]  ;;  %v2022_v55 = vadd.f32 %v2021_v43, %v5279_v41 }
 0x131   : > { %2322 = vst.msk [vmem:[#allocation2 + $0x15c] sm:$0xf] %vm2234_vm1, %v2193_v18  ;;  %v1833_v27 = vpop.f32.mrf.mxu0  ;;  %2596 = vmatpush.bf16.msra.mxu2 %v4726_v60 }
 0x132   : > { %v1834_v26 = vadd.f32 %v1833_v27, %v5320_v57  ;;  %v2200_v1 = vpack.c.bf16 %v2022_v55, %v2022_v55 }
 0x134   : > { %v2125_v28 = vpack.c.bf16 %v1834_v26, %v1834_v26  ;;  %v647_v33 = vpop.permute.xlu0 %646  ;;  %2329 = vst.msk [vmem:[#allocation2 + $0x178] sm:$0xf] %vm2234_vm1, %v2200_v1  ;;  %v5586_v22 = vpop.f32.mrf.mxu1 }
 0x135   : > { %v1797_v11 = vadd.f32 %v5351_v10, %v647_v33  ;;  %2597 = vmatpush.bf16.msra.mxu2 %v4725_v48  ;;  %v5591_v30 = vpop.f32.mrf.mxu3 }
 0x136   : > { %2254 = vst.msk [vmem:[#allocation2 + $0x4c] sm:$0xf] %vm2234_vm1, %v2125_v28 }
 0x137   : > { %v2110_v5 = vpack.c.bf16 %v1797_v11, %v1797_v11  ;;  %v2023_v41 = vpop.f32.mrf.mxu2  ;;  %6435 = vst [vmem:[#allocation22_spill] sm:$0xff] %v5591_v30 }
 0x138   : > { %v2024_v51 = vadd.f32 %v2023_v41, %v5362_v13 }
 0x139   : > { %2239 = vst.msk [vmem:[#allocation2 + $0x10] sm:$0xf] %vm2234_vm1, %v2110_v5  ;;  %v1836_v57 = vpop.f32.mrf.mxu0 }
 0x13a   : > { %v1837_v58 = vadd.f32 %v1836_v57, %v5216_v20  ;;  %v2201_v60 = vpack.c.bf16 %v2024_v51, %v2024_v51 }
 0x13c   : > { %v2126_v18 = vpack.c.bf16 %v1837_v58, %v1837_v58  ;;  %v1052_v10 = vpop.permute.xlu0 %1051  ;;  %2330 = vst.msk [vmem:[#allocation2 + $0x17c] sm:$0xf] %vm2234_vm1, %v2201_v60  ;;  %v5596_v26 = vpop.f32.mrf.mxu1 }
 0x13d   : > { %v1999_v27 = vadd.f32 %v5458_v54, %v1052_v10  ;;  %v5602_v33 = vpop.f32.mrf.mxu3 }
 0x13e   : > { %2255 = vst.msk [vmem:[#allocation2 + $0x50] sm:$0xf] %vm2234_vm1, %v2126_v18 }
 0x13f   : > { %v2191_v43 = vpack.c.bf16 %v1999_v27, %v1999_v27  ;;  %v5599_v28 = vpop.f32.mrf.mxu2  ;;  %6437 = vst [vmem:[#allocation24_spill] sm:$0xff] %v5602_v33 }
 0x140   : > { %v4724_v55 = vld [vmem:[#allocation2 + $0x10] sm:$0xff]  ;;  %6436 = vst [vmem:[#allocation23_spill] sm:$0xff] %v5599_v28 }
 0x141   : > { %2320 = vst.msk [vmem:[#allocation2 + $0x154] sm:$0xf] %vm2234_vm1, %v2191_v43  ;;  %v1838_v20 = vpop.f32.mrf.mxu0  ;;  %2598 = vmatpush.bf16.msra.mxu2 %v4724_v55 }
 0x142   : > { %v1839_v13 = vadd.f32 %v1838_v20, %v5289_v45 }
 0x144   : > { %v2127_v48 = vpack.c.bf16 %v1839_v13, %v1839_v13  ;;  %v627_v54 = vpop.permute.xlu0 %626  ;;  %v5606_v5 = vpop.f32.mrf.mxu1 }
 0x145   : > { %v1787_v1 = vadd.f32 %v5255_v32, %v627_v54  ;;  %v5612_v45 = vpop.f32.mrf.mxu3 }
 0x146   : > { %2256 = vst.msk [vmem:[#allocation2 + $0x54] sm:$0xf] %vm2234_vm1, %v2127_v48 }
 0x147   : > { %v2106_v11 = vpack.c.bf16 %v1787_v1, %v1787_v1  ;;  %v5609_v41 = vpop.f32.mrf.mxu2  ;;  %6439 = vst [vmem:[#allocation26_spill] sm:$0xff] %v5612_v45 }
 0x148   : > { %6438 = vst [vmem:[#allocation25_spill] sm:$0xff] %v5609_v41 }
 0x149   : > { %2235 = vst.msk [vmem:[#allocation2] sm:$0xf] %vm2234_vm1, %v2106_v11  ;;  %v1841_v57 = vpop.f32.mrf.mxu0 }
 0x14a   : > { %v1842_v58 = vadd.f32 %v1841_v57, %v5202_v15 }
 0x14c   : > { %v2128_v51 = vpack.c.bf16 %v1842_v58, %v1842_v58  ;;  %v1042_v18 = vpop.permute.xlu0 %1041  ;;  %v5616_v60 = vpop.f32.mrf.mxu1 }
 0x14d   : > { %v1994_v10 = vadd.f32 %v5427_v12, %v1042_v18  ;;  %v5622_v20 = vpop.f32.mrf.mxu3 }
 0x14e   : > { %2257 = vst.msk [vmem:[#allocation2 + $0x58] sm:$0xf] %vm2234_vm1, %v2128_v51 }
 0x14f   : > { %v2189_v32 = vpack.c.bf16 %v1994_v10, %v1994_v10  ;;  %v5619_v43 = vpop.f32.mrf.mxu2  ;;  %6440 = vst [vmem:[#allocation27_spill] sm:$0xff] %v5622_v20 }
 0x151   : > { %2318 = vst.msk [vmem:[#allocation2 + $0x14c] sm:$0xf] %vm2234_vm1, %v2189_v32  ;;  %v1843_v27 = vpop.f32.mrf.mxu0 }
 0x152   : > { %v1844_v55 = vadd.f32 %v1843_v27, %v5272_v38 }
 0x154   : > { %v2129_v15 = vpack.c.bf16 %v1844_v55, %v1844_v55  ;;  %v5625_v13 = vpop.f32.mrf.mxu1 }
 0x155   : > { %v5630_v1 = vpop.f32.mrf.mxu3 }
 0x156   : > { %2258 = vst.msk [vmem:[#allocation2 + $0x5c] sm:$0xf] %vm2234_vm1, %v2129_v15 }
 0x157   : > { %v5627_v48 = vpop.f32.mrf.mxu2  ;;  %6442 = vst [vmem:[#allocation29_spill] sm:$0xff] %v5630_v1 }
 0x158   : > { %6441 = vst [vmem:[#allocation28_spill] sm:$0xff] %v5627_v48 }
 0x159   : > { %v1846_v12 = vpop.f32.mrf.mxu0 }
 0x15a   : > { %v1847_v54 = vadd.f32 %v1846_v12, %v5526_v63 }
 0x15c   : > { %v2130_v11 = vpack.c.bf16 %v1847_v54, %v1847_v54  ;;  %v5633_v57 = vpop.f32.mrf.mxu1 }
 0x15d   : > { %v5638_v18 = vpop.f32.mrf.mxu3 }
 0x15e   : > { %2259 = vst.msk [vmem:[#allocation2 + $0x60] sm:$0xf] %vm2234_vm1, %v2130_v11 }
 0x15f   : > { %v5635_v58 = vpop.f32.mrf.mxu2  ;;  %6443 = vst [vmem:[#allocation30_spill] sm:$0xff] %v5638_v18 }
 0x161   : > { %v1848_v38 = vpop.f32.mrf.mxu0 }
 0x162   : > { %v1849_v51 = vadd.f32 %v1848_v38, %v5245_v2 }
 0x164   : > { %v2131_v10 = vpack.c.bf16 %v1849_v51, %v1849_v51  ;;  %v5641_v32 = vpop.f32.mrf.mxu1 }
 0x165   : > { %v5646_v15 = vpop.f32.mrf.mxu3 }
 0x166   : > { %2260 = vst.msk [vmem:[#allocation2 + $0x64] sm:$0xf] %vm2234_vm1, %v2131_v10 }
 0x167   : > { %v5643_v27 = vpop.f32.mrf.mxu2  ;;  %6445 = vst [vmem:[#allocation32_spill] sm:$0xff] %v5646_v15 }
 0x168   : > { %6444 = vst [vmem:[#allocation31_spill] sm:$0xff] %v5643_v27 }
 0x169   : > { %v1851_v63 = vpop.f32.mrf.mxu0 }
 0x16a   : > { %v1852_v55 = vadd.f32 %v1851_v63, %v5234_v25  ;;  %v2377_v25 = vld [vmem:[%s6412_s5] sm:$0xf] }
 0x16b   : > { %v2382_v15 = vperm.slane %v2377_v25, 3 }
 0x16c   : > { %v2132_v12 = vpack.c.bf16 %v1852_v55, %v1852_v55  ;;  %v2456_v54 = vpop.f32.mrf.mxu1 }
 0x16d   : > { %v5652_v51 = vpop.f32.mrf.mxu3 }
 0x16e   : > { %2261 = vst.msk [vmem:[#allocation2 + $0x68] sm:$0xf] %vm2234_vm1, %v2132_v12 }
 0x16f   : > { %v5649_v2 = vpop.f32.mrf.mxu2  ;;  %6446 = vst [vmem:[#allocation33_spill] sm:$0xff] %v5652_v51 }
 0x171   : > { %v1853_v11 = vpop.f32.mrf.mxu0 }
 0x172   : > { %v1854_v38 = vadd.f32 %v1853_v11, %v5180_v8  ;;  %v2381_v8 = vperm.slane %v2377_v25, 2 }
 0x174   : > { %v2133_v10 = vpack.c.bf16 %v1854_v38, %v1854_v38  ;;  %v2458_v39 = vpop.f32.mrf.mxu1  ;;  %v2379_v38 = vperm.slane %v2377_v25, 0 }
 0x175   : > { %v5661_v12 = vpop.f32.mrf.mxu3 }
 0x176   : > { %2262 = vst.msk [vmem:[#allocation2 + $0x6c] sm:$0xf] %vm2234_vm1, %v2133_v10  ;;  %v2380_v10 = vperm.slane %v2377_v25, 1  ;;  %v2457_v18 = vadd.f32 %v2456_v54, %v2379_v38 }
 0x177   : > { %v5658_v63 = vpop.f32.mrf.mxu2  ;;  %6447 = vst [vmem:[#allocation34_spill] sm:$0xff] %v5661_v12  ;;  %v2459_v12 = vadd.f32 %v2458_v39, %v2379_v38  ;;  %v4749_v38 = vld [vmem:[#allocation2 + $0x58] sm:$0xff] }
 0x179   : > { %v1856_v30 = vpop.f32.mrf.mxu0 }
 0x17a   : > { %v1857_v55 = vadd.f32 %v1856_v30, %v5148_v61 }
 0x17c   : > { %v2134_v45 = vpack.c.bf16 %v1857_v55, %v1857_v55 }
 0x17d   : > { %v2498_v11 = vpop.f32.mrf.mxu1  ;;  %v2484_v47 = vpop.f32.mrf.mxu3 }
 0x17e   : > { %2263 = vst.msk [vmem:[#allocation2 + $0x70] sm:$0xf] %vm2234_vm1, %v2134_v45  ;;  %v2499_v16 = vadd.f32 %v2498_v11, %v2382_v15  ;;  %v2485_v33 = vadd.f32 %v2484_v47, %v2381_v8 }
 0x17f   : > { %v2470_v6 = vpop.f32.mrf.mxu2 }
 0x180   : > { %v2471_v61 = vadd.f32 %v2470_v6, %v2380_v10  ;;  %v2504_v30 = vpack.c.bf16 %v2499_v16, %v2485_v33 }
 0x181   : > { %v1858_v52 = vpop.f32.mrf.mxu0 }
 0x182   : > { %v1859_v20 = vadd.f32 %v1858_v52, %v5168_v4  ;;  %v2503_v45 = vpack.c.bf16 %v2471_v61, %v2457_v18  ;;  %v3473_v54 = vunpack.c.h.b16 %v2504_v30  ;;  %v4747_v61 = vld [vmem:[#allocation2 + $0x48] sm:$0xff] }
 0x184   : > { %v2135_v1 = vpack.c.bf16 %v1859_v20, %v1859_v20  ;;  %v2541_v52 = vunpack.c.l.b16 %v2503_v45  ;;  %v3162_v20 = vunpack.c.l.b16 %v2504_v30  ;;  %v2789_v30 = vunpack.c.h.b16 %v2503_v45  ;;  %v4670_v45 = vld [vmem:[%s6409_s2 + $0xa0] sm:$0xff] }
 0x185   : > { %v2500_v55 = vpop.f32.mrf.mxu1  ;;  %v2486_v28 = vpop.f32.mrf.mxu3 }
 0x186   : > { %2264 = vst.msk [vmem:[#allocation2 + $0x74] sm:$0xf] %vm2234_vm1, %v2135_v1  ;;  %v2501_v48 = vadd.f32 %v2500_v55, %v2382_v15  ;;  %v2487_v27 = vadd.f32 %v2486_v28, %v2381_v8  ;;  %v4750_v8 = vld [vmem:[#allocation2 + $0x60] sm:$0xff] }
 0x187   : > { %v2472_v41 = vpop.f32.mrf.mxu2 }
 0x188   : > { %v2473_v11 = vadd.f32 %v2472_v41, %v2380_v10  ;;  %v2506_v6 = vpack.c.bf16 %v2501_v48, %v2487_v27  ;;  %v4666_v48 = vld [vmem:[%s6409_s2 + $0x80] sm:$0xff]  ;;  %v4748_v10 = vld [vmem:[#allocation2 + $0x50] sm:$0xff] }
 0x189   : > { %v1861_v51 = vpop.f32.mrf.mxu0  ;;  %4173 = vmatmul.msk.bf16.gmra.mxu0 %vm1584_vm0, %v4666_v48 }
 0x18a   : > { %v1862_v25 = vadd.f32 %v1861_v51, %v5200_v14  ;;  %v2505_v47 = vpack.c.bf16 %v2473_v11, %v2459_v12  ;;  %v3163_v33 = vunpack.c.l.b16 %v2506_v6  ;;  %v3474_v39 = vunpack.c.h.b16 %v2506_v6  ;;  %v4751_v12 = vld [vmem:[#allocation2 + $0x68] sm:$0xff] }
 0x18c   : > { %v2136_v4 = vpack.c.bf16 %v1862_v25, %v1862_v25  ;;  %v2542_v16 = vunpack.c.l.b16 %v2505_v47  ;;  %v5670_v15 = vpack.c.b16 %v3163_v33, %v3162_v20  ;;  %v5672_v14 = vpack.c.b16 %v3474_v39, %v3473_v54  ;;  %v4746_v25 = vld [vmem:[#allocation2 + $0x40] sm:$0xff]  ;;  %v4672_v20 = vld [vmem:[%s6409_s2 + $0xb0] sm:$0xff]  ;;  %v4673_v39 = vld [vmem:[%s6409_s2 + $0xb8] sm:$0xff] }
 0x18d   : > { %v4752_v27 = vld [vmem:[#allocation2 + $0x70] sm:$0xff]  ;;  %v2790_v55 = vunpack.c.h.b16 %v2505_v47  ;;  %v4671_v47 = vld [vmem:[%s6409_s2 + $0xa8] sm:$0xff] }
 0x18e   : > { %2265 = vst.msk [vmem:[#allocation2 + $0x78] sm:$0xf] %vm2234_vm1, %v2136_v4  ;;  %v5668_v1 = vpack.c.b16 %v2542_v16, %v2541_v52  ;;  %v4668_v4 = vld [vmem:[%s6409_s2 + $0x90] sm:$0xff]  ;;  %v4669_v52 = vld [vmem:[%s6409_s2 + $0x98] sm:$0xff] }
 0x18f   : > { %v2791_v11 = vpack.c.b16 %v2790_v55, %v2789_v30  ;;  %v540_v30 = vld [vmem:[%s6410_s3 + $0x160] sm:$0xff] }
 0x191   : > { %v1863_v18 = vpop.f32.mrf.mxu0 }
 0x192   : > { %v1864_v28 = vadd.f32 %v1863_v18, %v5214_v19  ;;  %v4667_v19 = vld [vmem:[%s6409_s2 + $0x88] sm:$0xff] }
 0x193   : > { %v497_v18 = vld [vmem:[%s6410_s3 + $0x8] sm:$0xff] }
 0x194   : > { %v2137_v41 = vpack.c.bf16 %v1864_v28, %v1864_v28 }
 0x196   : > { %2266 = vst.msk [vmem:[#allocation2 + $0x7c] sm:$0xf] %vm2234_vm1, %v2137_v41  ;;  %v576_v41 = vld [vmem:[%s6410_s3 + $0x280] sm:$0xff] }
 0x199   : > { %4174 = vmatmul.msk.bf16.gmra.mxu0 %vm1584_vm0, %v4667_v19  ;;  %v542_v19 = vld [vmem:[%s6410_s3 + $0x170] sm:$0xff] }
 0x19d   : > { %v4753_v51 = vld [vmem:[#allocation2 + $0x78] sm:$0xff] }
 0x19e   : > { %2841 = vmatpush.bf16.msrb.mxu1 %v4753_v51  ;;  %v499_v51 = vld [vmem:[%s6410_s3 + $0x18] sm:$0xff] }
 0x1a2   : > { %2842 = vmatpush.bf16.msrb.mxu1 %v4752_v27  ;;  %v578_v27 = vld [vmem:[%s6410_s3 + $0x290] sm:$0xff] }
 0x1a6   : > { %2843 = vmatpush.bf16.msrb.mxu1 %v4751_v12  ;;  %v577_v12 = vld [vmem:[%s6410_s3 + $0x288] sm:$0xff] }
 0x1a9   : > { %4175 = vmatmul.msk.bf16.gmra.mxu0 %vm1584_vm0, %v4668_v4 }
 0x1aa   : > { %2844 = vmatpush.bf16.msrb.mxu1 %v4750_v8 }
 0x1ae   : > { %2845 = vmatpush.bf16.msrb.mxu1 %v4749_v38 }
 0x1b2   : > { %2846 = vmatpush.bf16.msrb.mxu1 %v4748_v10  ;;  %v543_v10 = vld [vmem:[%s6410_s3 + $0x178] sm:$0xff] }
 0x1b6   : > { %2847 = vmatpush.bf16.msrb.mxu1 %v4747_v61 }
 0x1b9   : > { %4176 = vmatmul.msk.bf16.gmra.mxu0 %vm1584_vm0, %v4669_v52  ;;  %v537_v52 = vld [vmem:[%s6410_s3 + $0x148] sm:$0xff] }
 0x1ba   : > { %2848 = vmatpush.bf16.msrb.mxu1 %v4746_v25  ;;  %v541_v25 = vld [vmem:[%s6410_s3 + $0x168] sm:$0xff] }
 0x1bd   : > { %2849 = vmatmul.bf16.vlgmr.msrb.gmra.mxu1 %v2791_v11  ;;  %v538_v11 = vld [vmem:[%s6410_s3 + $0x150] sm:$0xff] }
 0x1c9   : > { %4177 = vmatmul.msk.bf16.gmra.mxu0 %vm1584_vm0, %v4670_v45 }
 0x1d9   : > { %4178 = vmatmul.msk.bf16.gmra.mxu0 %vm1584_vm0, %v4671_v47  ;;  %v534_v47 = vld [vmem:[%s6410_s3 + $0x130] sm:$0xff] }
 0x1e9   : > { %4179 = vmatmul.msk.bf16.gmra.mxu0 %vm1584_vm0, %v4672_v20 }
 0x1f9   : > { %4180 = vmatmul.msk.bf16.gmra.mxu0 %vm1584_vm0, %v4673_v39 }
 0x206   : > { %v5713_v28 = vpop.f32.mrf.mxu0 }
 0x20e   : > { %v5721_v48 = vpop.f32.mrf.mxu0 }
 0x216   : > { %v5729_v8 = vpop.f32.mrf.mxu0 }
 0x21e   : > { %v5734_v38 = vpop.f32.mrf.mxu0 }
 0x226   : > { %v5739_v61 = vpop.f32.mrf.mxu0 }
 0x22e   : > { %v5744_v55 = vpop.f32.mrf.mxu0 }
 0x236   : > { %v5752_v4 = vpop.f32.mrf.mxu0 }
 0x23a   : > { %v2850_v54 = vpop.f32.mrf.mxu1 }
 0x23b   : > { %v2855_v6 = vsel %vm2607_vm2, %v2850_v54, -inf }
 0x23c   : > { %2856 = vmax.xlane.f32.xlu2 %v2855_v6  ;;  %v535_v6 = vld [vmem:[%s6410_s3 + $0x138] sm:$0xff] }
 0x23e   : > { %v5757_v45 = vpop.f32.mrf.mxu0 }
 0x242   : > { %v2852_v16 = vpop.f32.mrf.mxu1 }
 0x243   : > { %v2858_v33 = vsel %vm2607_vm2, %v2852_v16, -inf }
 0x244   : > { %2859 = vmax.xlane.f32.xlu1 %v2858_v33 }
 0x246   : > { %v5762_v20 = vpop.f32.mrf.mxu0 }
 0x254   : > { %631 = vperm.xlu2 %4851, %v497_v18   ;;  %v5767_v18 = vpop.f32.mrf.mxu0 }
 0x25c   : > { %1026 = vperm.xlu2 %4851, %v576_v41  }
 0x25d   : > { %641 = vperm.xlu1 %4850, %v499_v51   ;;  %v530_v51 = vld [vmem:[%s6410_s3 + $0x110] sm:$0xff] }
 0x265   : > { %1036 = vperm.xlu1 %4850, %v578_v27  }
 0x26d   : > { %1031 = vperm.xlu1 %4850, %v577_v12  }
 0x275   : > { %856 = vperm.xlu1 %4850, %v542_v19  }
 0x27d   : > { %861 = vperm.xlu1 %4850, %v543_v10  }
 0x285   : > { %846 = vperm.xlu1 %4850, %v540_v30  }
 0x28d   : > { %851 = vperm.xlu1 %4850, %v541_v25  }
 0x295   : > { %836 = vperm.xlu1 %4850, %v538_v11  }
 0x29d   : > { %831 = vperm.xlu1 %4850, %v537_v52  }
 0x2a5   : > { %816 = vperm.xlu1 %4850, %v534_v47   ;;  %v5780_v47 = vpop.f32.mrf.mxu0 }
 0x2ad   : > { %821 = vperm.xlu1 %4850, %v535_v6  }
 0x2af   : > { %v2857_v33 = vpop.xlane.xlu2 %2856 }
 0x2b0   : > { %v2861_v39 = vsub.f32 %v2850_v54, %v2857_v33  ;;  %v529_v54 = vld [vmem:[%s6410_s3 + $0x108] sm:$0xff] }
 0x2b2   : > { %v2863_v41 = vmul.f32 1.442695, %v2861_v39 }
 0x2b4   : > { %4854 = vpow2.f32 %v2863_v41  ;;  %v4768_v41 = vld [vmem:[%s6413_s6 + $0x70] sm:$0xff] }
 0x2b5   : > { %796 = vperm.xlu1 %4850, %v530_v51  }
 0x2b7   : > { %v632_v27 = vpop.permute.xlu2 %631  ;;  %v2860_v12 = vpop.xlane.xlu1 %2859 }
 0x2b8   : > { %v1789_v19 = vadd.f32 %v5286_v44, %v632_v27  ;;  %v2862_v10 = vsub.f32 %v2852_v16, %v2860_v12  ;;  %v4769_v44 = vld [vmem:[%s6413_s6 + $0x78] sm:$0xff]  ;;  %v5795_v27 = vpop.f32.mrf.mxu0  ;;  %v4766_v12 = vld [vmem:[%s6413_s6 + $0x60] sm:$0xff] }
 0x2b9   : > { %3052 = vmatpush.bf16.msra.mxu1 %v4769_v44  ;;  %v4764_v44 = vld [vmem:[%s6413_s6 + $0x50] sm:$0xff] }
 0x2ba   : > { %v5773_v30 = vpop.eup %4854  ;;  %v2107_v25 = vpack.c.bf16 %v1789_v19, %v1789_v19  ;;  %v2865_v11 = vmul.f32 1.442695, %v2862_v10  ;;  %v539_v19 = vld [vmem:[%s6410_s3 + $0x158] sm:$0xff] }
 0x2bb   : > { %v2867_v52 = vsel %vm2607_vm2, %v5773_v30, 0.0  ;;  %v4765_v10 = vld [vmem:[%s6413_s6 + $0x58] sm:$0xff] }
 0x2bc   : > { %2236 = vst.msk [vmem:[#allocation2 + $0x4] sm:$0xf] %vm2234_vm1, %v2107_v25  ;;  %4856 = vpow2.f32 %v2865_v11  ;;  %2868 = vadd.xlane.f32.xlu0 %v2867_v52 }
 0x2bd   : > { %791 = vperm.xlu1 %4850, %v529_v54   ;;  %3053 = vmatpush.bf16.msra.mxu1 %v4768_v41  ;;  %v536_v41 = vld [vmem:[%s6410_s3 + $0x140] sm:$0xff] }
 0x2bf   : > { %v1027_v16 = vpop.permute.xlu2 %1026 }
 0x2c0   : > { %v1987_v6 = vadd.f32 %v5371_v21, %v1027_v16  ;;  %v4767_v21 = vld [vmem:[%s6413_s6 + $0x68] sm:$0xff]  ;;  %v1896_v11 = vpop.f32.mrf.mxu0  ;;  %v532_v16 = vld [vmem:[%s6410_s3 + $0x120] sm:$0xff] }
 0x2c1   : > { %3054 = vmatpush.bf16.msra.mxu1 %v4767_v21 }
 0x2c2   : > { %v5787_v33 = vpop.eup %4856  ;;  %v2186_v39 = vpack.c.bf16 %v1987_v6, %v1987_v6  ;;  %v4763_v6 = vld [vmem:[%s6413_s6 + $0x48] sm:$0xff] }
 0x2c3   : > { %v2870_v51 = vsel %vm2607_vm2, %v5787_v33, 0.0 }
 0x2c4   : > { %2315 = vst.msk [vmem:[#allocation2 + $0x140] sm:$0xf] %vm2234_vm1, %v2186_v39  ;;  %2871 = vadd.xlane.f32.xlu2 %v2870_v51 }
 0x2c5   : > { %3055 = vmatpush.bf16.msra.mxu1 %v4766_v12  ;;  %v4762_v12 = vld [vmem:[%s6413_s6 + $0x40] sm:$0xff] }
 0x2c8   : > { %v1898_v51 = vpop.f32.mrf.mxu0 }
 0x2c9   : > { %3056 = vmatpush.bf16.msra.mxu1 %v4765_v10  ;;  %v4761_v10 = vld [vmem:[#allocation2 + $0x178] sm:$0xff] }
 0x2cd   : > { %3057 = vmatpush.bf16.msra.mxu1 %v4764_v44  ;;  %v2971_v44 = vsel %vm2607_vm2, %v4761_v10, 0  ;;  %v557_v10 = vld [vmem:[%s6410_s3 + $0x1e8] sm:$0xff] }
 0x2cf   : > { %v642_v25 = vpop.permute.xlu1 %641 }
 0x2d0   : > { %v1794_v54 = vadd.f32 %v5334_v0, %v642_v25  ;;  %841 = vperm.xlu0 %4852, %v539_v19  }
 0x2d1   : > { %3058 = vmatpush.bf16.msra.mxu1 %v4763_v6 }
 0x2d2   : > { %v2109_v52 = vpack.c.bf16 %v1794_v54, %v1794_v54  ;;  %v4722_v54 = vld [vmem:[#allocation2] sm:$0xff] }
 0x2d4   : > { %2238 = vst.msk [vmem:[#allocation2 + $0xc] sm:$0xf] %vm2234_vm1, %v2109_v52 }
 0x2d5   : > { %3059 = vmatpush.bf16.msra.mxu1 %v4762_v12 }
 0x2d7   : > { %v1037_v39 = vpop.permute.xlu1 %1036 }
 0x2d8   : > { %v1992_v0 = vadd.f32 %v5409_v53, %v1037_v39  ;;  %806 = vperm.xlu0 %4852, %v532_v16   ;;  %v531_v53 = vld [vmem:[%s6410_s3 + $0x118] sm:$0xff]  ;;  %v533_v16 = vld [vmem:[%s6410_s3 + $0x128] sm:$0xff]  ;;  %v1901_v39 = vpop.f32.mrf.mxu0 }
 0x2da   : > { %v2188_v21 = vpack.c.bf16 %v1992_v0, %v1992_v0  ;;  %v4760_v0 = vld [vmem:[#allocation2 + $0x170] sm:$0xff] }
 0x2db   : > { %v4723_v19 = vld [vmem:[#allocation2 + $0x8] sm:$0xff]  ;;  %v2968_v12 = vsel %vm2607_vm2, %v4760_v0, 0 }
 0x2dc   : > { %2317 = vst.msk [vmem:[#allocation2 + $0x148] sm:$0xf] %vm2234_vm1, %v2188_v21  ;;  %826 = vperm.xlu2 %4851, %v536_v41   ;;  %2599 = vmatpush.bf16.msra.mxu2 %v4723_v19  ;;  %v528_v19 = vld [vmem:[%s6410_s3 + $0x100] sm:$0xff] }
 0x2df   : > { %v1032_v25 = vpop.permute.xlu1 %1031 }
 0x2e0   : > { %v1989_v52 = vadd.f32 %v5389_v34, %v1032_v25  ;;  %801 = vperm.xlu0 %4852, %v531_v53   ;;  %2600 = vmatpush.bf16.msra.mxu2 %v4722_v54  ;;  %v558_v34 = vld [vmem:[%s6410_s3 + $0x1f0] sm:$0xff]  ;;  %v4759_v25 = vld [vmem:[#allocation2 + $0x168] sm:$0xff] }
 0x2e2   : > { %v2187_v6 = vpack.c.bf16 %v1989_v52, %v1989_v52 }
 0x2e3   : > { %2601 = vmatmul.bf16.vlgmr.msra.gmra.mxu2 %v5668_v1  ;;  %v1903_v1 = vpop.f32.mrf.mxu0 }
 0x2e4   : > { %2973 = vmatpush.bf16.xpose.msrb.mxu2 %v2971_v44  ;;  %2316 = vst.msk [vmem:[#allocation2 + $0x144] sm:$0xf] %vm2234_vm1, %v2187_v6  ;;  %811 = vperm.xlu2 %4851, %v533_v16   ;;  %v2965_v44 = vsel %vm2607_vm2, %v4759_v25, 0  ;;  %v574_v6 = vld [vmem:[%s6410_s3 + $0x270] sm:$0xff] }
 0x2e7   : > { %v857_v41 = vpop.permute.xlu1 %856 }
 0x2e8   : > { %v1902_v21 = vadd.f32 %v1901_v39, %v857_v41  ;;  %936 = vperm.xlu0 %4852, %v558_v34   ;;  %v4758_v39 = vld [vmem:[#allocation2 + $0x160] sm:$0xff] }
 0x2e9   : > { %v2962_v41 = vsel %vm2607_vm2, %v4758_v39, 0 }
 0x2ea   : > { %v2152_v53 = vpack.c.bf16 %v1902_v21, %v1902_v21 }
 0x2ec   : > { %2974 = vmatpush.bf16.xpose.msrb.mxu2 %v2968_v12  ;;  %2281 = vst.msk [vmem:[#allocation2 + $0xb8] sm:$0xf] %vm2234_vm1, %v2152_v53  ;;  %786 = vperm.xlu2 %4851, %v528_v19   ;;  %v553_v19 = vld [vmem:[%s6410_s3 + $0x1c8] sm:$0xff]  ;;  %v4757_v53 = vld [vmem:[#allocation2 + $0x158] sm:$0xff] }
 0x2ed   : > { %v2959_v25 = vsel %vm2607_vm2, %v4757_v53, 0  ;;  %v572_v53 = vld [vmem:[%s6410_s3 + $0x260] sm:$0xff] }
 0x2ef   : > { %v862_v54 = vpop.permute.xlu1 %861 }
 0x2f0   : > { %v1904_v52 = vadd.f32 %v1903_v1, %v862_v54  ;;  %931 = vperm.xlu0 %4852, %v557_v10   ;;  %v550_v54 = vld [vmem:[%s6410_s3 + $0x1b0] sm:$0xff] }
 0x2f2   : > { %v2153_v16 = vpack.c.bf16 %v1904_v52, %v1904_v52  ;;  %v4756_v52 = vld [vmem:[#allocation2 + $0x150] sm:$0xff] }
 0x2f4   : > { %2975 = vmatpush.bf16.xpose.msrb.mxu2 %v2965_v44  ;;  %2282 = vst.msk [vmem:[#allocation2 + $0xbc] sm:$0xf] %vm2234_vm1, %v2153_v16 }
 0x2f7   : > { %v847_v34 = vpop.permute.xlu1 %846 }
 0x2f8   : > { %v1897_v0 = vadd.f32 %v1896_v11, %v847_v34  ;;  %1016 = vperm.xlu0 %4852, %v574_v6   ;;  %v2956_v6 = vsel %vm2607_vm2, %v4756_v52, 0  ;;  %v551_v34 = vld [vmem:[%s6410_s3 + $0x1b8] sm:$0xff] }
 0x2fa   : > { %v2150_v21 = vpack.c.bf16 %v1897_v0, %v1897_v0  ;;  %v4755_v0 = vld [vmem:[#allocation2 + $0x148] sm:$0xff] }
 0x2fb   : > { %v4777_v12 = vld [vmem:[#allocation2 + $0xb8] sm:$0xff] }
 0x2fc   : > { %2976 = vmatpush.bf16.xpose.msrb.mxu2 %v2962_v41  ;;  %2279 = vst.msk [vmem:[#allocation2 + $0xb0] sm:$0xf] %vm2234_vm1, %v2150_v21  ;;  %3214 = vmatpush.bf16.msrb.mxu1 %v4777_v12 }
 0x2ff   : > { %v852_v1 = vpop.permute.xlu1 %851 }
 0x300   : > { %v1899_v10 = vadd.f32 %v1898_v51, %v852_v1  ;;  %911 = vperm.xlu0 %4852, %v553_v19   ;;  %v4674_v19 = vld [vmem:[%s6409_s2 + $0xc0] sm:$0xff] }
 0x301   : > { %v4754_v1 = vld [vmem:[#allocation2 + $0x140] sm:$0xff]  ;;  %4181 = vmatmul.msk.bf16.gmra.mxu0 %vm1584_vm0, %v4674_v19 }
 0x302   : > { %v2151_v11 = vpack.c.bf16 %v1899_v10, %v1899_v10 }
 0x304   : > { %2977 = vmatpush.bf16.xpose.msrb.mxu2 %v2959_v25  ;;  %2280 = vst.msk [vmem:[#allocation2 + $0xb4] sm:$0xf] %vm2234_vm1, %v2151_v11  ;;  %v2950_v25 = vsel %vm2607_vm2, %v4754_v1, 0 }
 0x307   : > { %v837_v44 = vpop.permute.xlu1 %836 }
 0x308   : > { %v1892_v16 = vadd.f32 %v5780_v47, %v837_v44  ;;  %896 = vperm.xlu0 %4852, %v550_v54   ;;  %v2953_v47 = vsel %vm2607_vm2, %v4755_v0, 0  ;;  %v573_v54 = vld [vmem:[%s6410_s3 + $0x268] sm:$0xff] }
 0x30a   : > { %v2148_v39 = vpack.c.bf16 %v1892_v16, %v1892_v16 }
 0x30b   : > { %v4776_v51 = vld [vmem:[#allocation2 + $0xb0] sm:$0xff] }
 0x30c   : > { %2978 = vmatpush.bf16.xpose.msrb.mxu2 %v2956_v6  ;;  %2277 = vst.msk [vmem:[#allocation2 + $0xa8] sm:$0xf] %vm2234_vm1, %v2148_v39  ;;  %3215 = vmatpush.bf16.msrb.mxu1 %v4776_v51 }
 0x30f   : > { %v832_v41 = vpop.permute.xlu1 %831 }
 0x310   : > { %v1889_v21 = vadd.f32 %v5767_v18, %v832_v41  ;;  %901 = vperm.xlu0 %4852, %v551_v34   ;;  %v546_v34 = vld [vmem:[%s6410_s3 + $0x190] sm:$0xff] }
 0x312   : > { %v2147_v12 = vpack.c.bf16 %v1889_v21, %v1889_v21 }
 0x314   : > { %2979 = vmatpush.bf16.xpose.msrb.mxu2 %v2953_v47  ;;  %2276 = vst.msk [vmem:[#allocation2 + $0xa4] sm:$0xf] %vm2234_vm1, %v2147_v12 }
 0x317   : > { %v817_v10 = vpop.permute.xlu1 %816 }
 0x318   : > { %v1882_v18 = vadd.f32 %v5752_v4, %v817_v10  ;;  %1006 = vperm.xlu0 %4852, %v572_v53   ;;  %v548_v4 = vld [vmem:[%s6410_s3 + $0x1a0] sm:$0xff]  ;;  %v571_v10 = vld [vmem:[%s6410_s3 + $0x258] sm:$0xff] }
 0x31a   : > { %v2144_v11 = vpack.c.bf16 %v1882_v18, %v1882_v18 }
 0x31c   : > { %2980 = vmatpush.bf16.xpose.msrb.mxu2 %v2950_v25  ;;  %2273 = vst.msk [vmem:[#allocation2 + $0x98] sm:$0xf] %vm2234_vm1, %v2144_v11 }
 0x31f   : > { %v822_v52 = vpop.permute.xlu1 %821 }
 0x320   : > { %v1884_v44 = vadd.f32 %v5757_v45, %v822_v52  ;;  %1011 = vperm.xlu0 %4852, %v573_v54  }
 0x322   : > { %v2145_v16 = vpack.c.bf16 %v1884_v44, %v1884_v44 }
 0x324   : > { %2274 = vst.msk [vmem:[#allocation2 + $0x9c] sm:$0xf] %vm2234_vm1, %v2145_v16 }
 0x327   : > { %v797_v6 = vpop.permute.xlu1 %796 }
 0x328   : > { %v1872_v39 = vadd.f32 %v5729_v8, %v797_v6  ;;  %886 = vperm.xlu0 %4852, %v548_v4   ;;  %v570_v8 = vld [vmem:[%s6410_s3 + $0x250] sm:$0xff] }
 0x32a   : > { %v2140_v51 = vpack.c.bf16 %v1872_v39, %v1872_v39 }
 0x32c   : > { %2269 = vst.msk [vmem:[#allocation2 + $0x88] sm:$0xf] %vm2234_vm1, %v2140_v51 }
 0x32f   : > { %v2869_v45 = vpop.xlane.xlu0 %2868  ;;  %v792_v0 = vpop.permute.xlu1 %791 }
 0x330   : > { %4858 = vrcp.f32 %v2869_v45  ;;  %876 = vperm.xlu0 %4852, %v546_v34   ;;  %v1869_v41 = vadd.f32 %v5721_v48, %v792_v0  ;;  %v2884_v54 = vand.u32 2147483648, %v2869_v45  ;;  %vm2878_vm4 = vweird.f32 %v2869_v45 }
 0x331   : > { %v2882_v44 = vand.u32 2147483647, %v2869_v45 }
 0x332   : > { %v2139_v21 = vpack.c.bf16 %v1869_v41, %v1869_v41 }
 0x333   : > { %vm2883_vm7 = vcmp.eq.f32.partialorder %v2882_v44, 8.507059e+37 }
 0x334   : > { %2268 = vst.msk [vmem:[#allocation2 + $0x84] sm:$0xf] %vm2234_vm1, %v2139_v21 }
 0x336   : > { %v4859_v47 = vpop.eup %4858 }
 0x337   : > { %v2874_v12 = vmul.f32 %v4859_v47, %v2869_v45  ;;  %v2872_v19 = vpop.xlane.xlu2 %2871  ;;  %vm2879_vm3 = vweird.f32 %v4859_v47 }
 0x338   : > { %4860 = vrcp.f32 %v2872_v19  ;;  %996 = vperm.xlu0 %4852, %v570_v8   ;;  %vm5905_vm5 = vmor %vm2878_vm4, %vm2879_vm3  ;;  %v2897_v6 = vand.u32 2147483647, %v2872_v19  ;;  %v2899_v39 = vand.u32 2147483648, %v2872_v19  ;;  %vm2893_vm8 = vweird.f32 %v2872_v19 }
 0x339   : > { %v2875_v53 = vsub.f32 1.0, %v2874_v12  ;;  %v545_v12 = vld [vmem:[%s6410_s3 + $0x188] sm:$0xff] }
 0x33a   : > { %vm2898_vm10 = vcmp.eq.f32.partialorder %v2897_v6, 8.507059e+37 }
 0x33b   : > { %v2876_v1 = vmul.f32 %v4859_v47, %v2875_v53 }
 0x33d   : > { %v2877_v48 = vadd.f32 %v4859_v47, %v2876_v1  ;;  %v2900_v1 = vor.u32 1.1754944e-38, %v2899_v39 }
 0x33e   : > { %v4861_v18 = vpop.eup %4860 }
 0x33f   : > { %v2889_v25 = vmul.f32 %v4861_v18, %v2872_v19  ;;  %v827_v11 = vpop.permute.xlu2 %826  ;;  %v2881_v0 = vsel %vm5905_vm5, %v4859_v47, %v2877_v48  ;;  %vm2894_vm6 = vweird.f32 %v4861_v18 }
 0x340   : > { %v1887_v52 = vadd.f32 %v5762_v20, %v827_v11  ;;  %1001 = vperm.xlu0 %4852, %v571_v10   ;;  %v2885_v20 = vor.u32 1.1754944e-38, %v2884_v54  ;;  %vm2895_vm9 = vmor %vm2893_vm8, %vm2894_vm6 }
 0x341   : > { %v2890_v16 = vsub.f32 1.0, %v2889_v25 }
 0x342   : > { %v2146_v51 = vpack.c.bf16 %v1887_v52, %v1887_v52  ;;  %v842_v34 = vpop.permute.xlu0 %841  ;;  %v2886_v53 = vsel %vm2883_vm7, %v2885_v20, %v2881_v0  ;;  %v4773_v0 = vld [vmem:[#allocation2 + $0x98] sm:$0xff] }
 0x343   : > { %v2891_v41 = vmul.f32 %v4861_v18, %v2890_v16  ;;  %v1894_v21 = vadd.f32 %v5795_v27, %v842_v34  ;;  %v2903_v25 = vmul.f32 %v5773_v30, %v2886_v53  ;;  %v566_v16 = vld [vmem:[%s6410_s3 + $0x230] sm:$0xff]  ;;  %v565_v34 = vld [vmem:[%s6410_s3 + $0x228] sm:$0xff] }
 0x344   : > { %2275 = vst.msk [vmem:[#allocation2 + $0xa0] sm:$0xf] %vm2234_vm1, %v2146_v51 }
 0x345   : > { %v2892_v45 = vadd.f32 %v4861_v18, %v2891_v41  ;;  %v2149_v8 = vpack.c.bf16 %v1894_v21, %v1894_v21 }
 0x347   : > { %v2896_v10 = vsel %vm2895_vm9, %v4861_v18, %v2892_v45  ;;  %2278 = vst.msk [vmem:[#allocation2 + $0xac] sm:$0xf] %vm2234_vm1, %v2149_v8  ;;  %v812_v47 = vpop.permute.xlu2 %811 }
 0x348   : > { %v2901_v27 = vsel %vm2898_vm10, %v2900_v1, %v2896_v10  ;;  %v1879_v48 = vadd.f32 %v5744_v55, %v812_v47  ;;  %871 = vperm.xlu0 %4852, %v545_v12  }
 0x349   : > { %v2904_v19 = vmul.f32 %v5787_v33, %v2901_v27 }
 0x34a   : > { %v2143_v11 = vpack.c.bf16 %v1879_v48, %v1879_v48  ;;  %v807_v54 = vpop.permute.xlu0 %806 }
 0x34b   : > { %v2905_v52 = vpack.c.bf16 %v2904_v19, %v2903_v25  ;;  %v1877_v44 = vadd.f32 %v5739_v61, %v807_v54  ;;  %v4774_v61 = vld [vmem:[#allocation2 + $0xa0] sm:$0xff] }
 0x34c   : > { %2272 = vst.msk [vmem:[#allocation2 + $0x94] sm:$0xf] %vm2234_vm1, %v2143_v11 }
 0x34d   : > { %v2142_v18 = vpack.c.bf16 %v1877_v44, %v1877_v44  ;;  %4386 = vmatmul.msk.bf16.vlgmr.msrb.gmra.mxu2 %vm2607_vm2, %v2905_v52 }
 0x34e   : > { %v4775_v55 = vld [vmem:[#allocation2 + $0xa8] sm:$0xff] }
 0x34f   : > { %2271 = vst.msk [vmem:[#allocation2 + $0x90] sm:$0xf] %vm2234_vm1, %v2142_v18  ;;  %v787_v30 = vpop.permute.xlu2 %786  ;;  %3216 = vmatpush.bf16.msrb.mxu1 %v4775_v55 }
 0x350   : > { %v1867_v33 = vadd.f32 %v5713_v28, %v787_v30  ;;  %976 = vperm.xlu0 %4852, %v566_v16   ;;  %v596_v30 = vld [vmem:[%s6410_s3 + $0x320] sm:$0xff] }
 0x352   : > { %v2138_v4 = vpack.c.bf16 %v1867_v33, %v1867_v33  ;;  %v802_v6 = vpop.permute.xlu0 %801 }
 0x353   : > { %v1874_v39 = vadd.f32 %v5734_v38, %v802_v6  ;;  %3217 = vmatpush.bf16.msrb.mxu1 %v4774_v61  ;;  %v562_v38 = vld [vmem:[%s6410_s3 + $0x210] sm:$0xff] }
 0x354   : > { %2267 = vst.msk [vmem:[#allocation2 + $0x80] sm:$0xf] %vm2234_vm1, %v2138_v4  ;;  %v594_v6 = vld [vmem:[%s6410_s3 + $0x310] sm:$0xff] }
 0x355   : > { %v2141_v51 = vpack.c.bf16 %v1874_v39, %v1874_v39 }
 0x356   : > { %v4772_v41 = vld [vmem:[#allocation2 + $0x90] sm:$0xff] }
 0x357   : > { %2270 = vst.msk [vmem:[#allocation2 + $0x8c] sm:$0xf] %vm2234_vm1, %v2141_v51  ;;  %3218 = vmatpush.bf16.msrb.mxu1 %v4773_v0 }
 0x358   : > { %971 = vperm.xlu0 %4852, %v565_v34  }
 0x35a   : > { %v937_v28 = vpop.permute.xlu0 %936 }
 0x35b   : > { %v1942_v21 = vadd.f32 %v5519_v37, %v937_v28  ;;  %3219 = vmatpush.bf16.msrb.mxu1 %v4772_v41  ;;  %v4770_v12 = vld [vmem:[#allocation2 + $0x80] sm:$0xff]  ;;  %v602_v37 = vld [vmem:[%s6410_s3 + $0x350] sm:$0xff] }
 0x35c   : > { %v552_v41 = vld [vmem:[%s6410_s3 + $0x1c0] sm:$0xff] }
 0x35d   : > { %v2168_v20 = vpack.c.bf16 %v1942_v21, %v1942_v21 }
 0x35e   : > { %v4771_v45 = vld [vmem:[#allocation2 + $0x88] sm:$0xff] }
 0x35f   : > { %2297 = vst.msk [vmem:[#allocation2 + $0xf8] sm:$0xf] %vm2234_vm1, %v2168_v20  ;;  %3220 = vmatpush.bf16.msrb.mxu1 %v4771_v45 }
 0x360   : > { %956 = vperm.xlu0 %4852, %v562_v38   ;;  %v547_v38 = vld [vmem:[%s6410_s3 + $0x198] sm:$0xff] }
 0x362   : > { %v932_v8 = vpop.permute.xlu0 %931 }
 0x363   : > { %v1939_v53 = vadd.f32 %v5494_v7, %v932_v8  ;;  %3221 = vmatpush.bf16.msrb.mxu1 %v4770_v12  ;;  %v600_v7 = vld [vmem:[%s6410_s3 + $0x340] sm:$0xff] }
 0x364   : > { %v568_v12 = vld [vmem:[%s6410_s3 + $0x240] sm:$0xff] }
 0x365   : > { %v2167_v1 = vpack.c.bf16 %v1939_v53, %v1939_v53 }
 0x366   : > { %v5944_v10 = vpop.f32.mrf.mxu2 }
 0x367   : > { %2296 = vst.msk [vmem:[#allocation2 + $0xf4] sm:$0xf] %vm2234_vm1, %v2167_v1  ;;  %v2608_v47 = vsel %vm2607_vm2, %v5944_v10, -inf }
 0x368   : > { %1156 = vperm.xlu0 %4852, %v602_v37   ;;  %2609 = vmax.xlane.f32.xlu2 %v2608_v47 }
 0x36a   : > { %v1017_v27 = vpop.permute.xlu0 %1016 }
 0x36b   : > { %v1982_v48 = vadd.f32 %v5329_v62, %v1017_v27  ;;  %v601_v62 = vld [vmem:[%s6410_s3 + $0x348] sm:$0xff] }
 0x36d   : > { %v2184_v25 = vpack.c.bf16 %v1982_v48, %v1982_v48 }
 0x36e   : > { %v5953_v19 = vpop.f32.mrf.mxu2 }
 0x36f   : > { %2313 = vst.msk [vmem:[#allocation2 + $0x138] sm:$0xf] %vm2234_vm1, %v2184_v25  ;;  %v2611_v11 = vsel %vm2607_vm2, %v5953_v19, -inf }
 0x370   : > { %1146 = vperm.xlu0 %4852, %v600_v7   ;;  %2612 = vmax.xlane.f32.xlu1 %v2611_v11 }
 0x372   : > { %v912_v54 = vpop.permute.xlu0 %911 }
 0x373   : > { %v1929_v52 = vadd.f32 %v5422_v3, %v912_v54 }
 0x375   : > { %v2163_v44 = vpack.c.bf16 %v1929_v52, %v1929_v52  ;;  %v563_v52 = vld [vmem:[%s6410_s3 + $0x218] sm:$0xff] }
 0x377   : > { %2292 = vst.msk [vmem:[#allocation2 + $0xe4] sm:$0xf] %vm2234_vm1, %v2163_v44 }
 0x378   : > { %1151 = vperm.xlu0 %4852, %v601_v62  }
 0x37a   : > { %v897_v18 = vpop.permute.xlu0 %896 }
 0x37b   : > { %v1922_v16 = vadd.f32 %v5367_v17, %v897_v18  ;;  %v556_v17 = vld [vmem:[%s6410_s3 + $0x1e0] sm:$0xff] }
 0x37c   : > { %v604_v18 = vld [vmem:[%s6410_s3 + $0x360] sm:$0xff] }
 0x37d   : > { %v2160_v55 = vpack.c.bf16 %v1922_v16, %v1922_v16 }
 0x37e   : > { %v5996_v37 = vpop.f32.mrf.mxu0 }
 0x37f   : > { %2289 = vst.msk [vmem:[#allocation2 + $0xd8] sm:$0xf] %vm2234_vm1, %v2160_v55 }
 0x380   : > { %1126 = vperm.xlu0 %4852, %v596_v30  }
 0x382   : > { %v902_v3 = vpop.permute.xlu0 %901 }
 0x383   : > { %v1924_v33 = vadd.f32 %v5384_v29, %v902_v3  ;;  %v555_v29 = vld [vmem:[%s6410_s3 + $0x1d8] sm:$0xff]  ;;  %v605_v3 = vld [vmem:[%s6410_s3 + $0x368] sm:$0xff] }
 0x385   : > { %v2161_v4 = vpack.c.bf16 %v1924_v33, %v1924_v33 }
 0x386   : > { %v1908_v25 = vpop.f32.mrf.mxu0 }
 0x387   : > { %2290 = vst.msk [vmem:[#allocation2 + $0xdc] sm:$0xf] %vm2234_vm1, %v2161_v4 }
 0x388   : > { %1116 = vperm.xlu0 %4852, %v594_v6  }
 0x389   : > { %926 = vperm.xlu1 %4850, %v556_v17   ;;  %v560_v17 = vld [vmem:[%s6410_s3 + $0x200] sm:$0xff] }
 0x38a   : > { %v1007_v61 = vpop.permute.xlu0 %1006 }
 0x38b   : > { %v1977_v39 = vadd.f32 %v5281_v42, %v1007_v61 }
 0x38d   : > { %v2182_v51 = vpack.c.bf16 %v1977_v39, %v1977_v39 }
 0x38f   : > { %2311 = vst.msk [vmem:[#allocation2 + $0x130] sm:$0xf] %vm2234_vm1, %v2182_v51 }
 0x391   : > { %921 = vperm.xlu1 %4850, %v555_v29  }
 0x392   : > { %v1012_v34 = vpop.permute.xlu0 %1011 }
 0x393   : > { %v1979_v0 = vadd.f32 %v5301_v50, %v1012_v34 }
 0x395   : > { %v2183_v28 = vpack.c.bf16 %v1979_v0, %v1979_v0 }
 0x397   : > { %2312 = vst.msk [vmem:[#allocation2 + $0x134] sm:$0xf] %vm2234_vm1, %v2183_v28 }
 0x399   : > { %906 = vperm.xlu1 %4850, %v552_v41  }
 0x39a   : > { %v887_v21 = vpop.permute.xlu0 %886 }
 0x39b   : > { %v1917_v42 = vadd.f32 %v5325_v59, %v887_v21 }
 0x39d   : > { %v2158_v20 = vpack.c.bf16 %v1917_v42, %v1917_v42 }
 0x39f   : > { %2287 = vst.msk [vmem:[#allocation2 + $0xd0] sm:$0xf] %vm2234_vm1, %v2158_v20 }
 0x3a1   : > { %881 = vperm.xlu1 %4850, %v547_v38  }
 0x3a2   : > { %v877_v45 = vpop.permute.xlu0 %876 }
 0x3a3   : > { %v1912_v50 = vadd.f32 %v5277_v40, %v877_v45  ;;  %v567_v40 = vld [vmem:[%s6410_s3 + $0x238] sm:$0xff] }
 0x3a5   : > { %v2156_v8 = vpack.c.bf16 %v1912_v50, %v1912_v50 }
 0x3a7   : > { %2285 = vst.msk [vmem:[#allocation2 + $0xc8] sm:$0xf] %vm2234_vm1, %v2156_v8 }
 0x3a9   : > { %986 = vperm.xlu1 %4850, %v568_v12  }
 0x3aa   : > { %v997_v53 = vpop.permute.xlu0 %996 }
 0x3ab   : > { %v1972_v59 = vadd.f32 %v5633_v57, %v997_v53  ;;  %v606_v57 = vld [vmem:[%s6410_s3 + $0x370] sm:$0xff] }
 0x3ad   : > { %v2180_v1 = vpack.c.bf16 %v1972_v59, %v1972_v59 }
 0x3af   : > { %2309 = vst.msk [vmem:[#allocation2 + $0x128] sm:$0xf] %vm2234_vm1, %v2180_v1 }
 0x3b1   : > { %981 = vperm.xlu1 %4850, %v567_v40  }
 0x3b2   : > { %v1002_v47 = vpop.permute.xlu0 %1001 }
 0x3b3   : > { %v1974_v27 = vadd.f32 %v5641_v32, %v1002_v47 }
 0x3b5   : > { %v2181_v48 = vpack.c.bf16 %v1974_v27, %v1974_v27 }
 0x3b7   : > { %2310 = vst.msk [vmem:[#allocation2 + $0x12c] sm:$0xf] %vm2234_vm1, %v2181_v48  ;;  %v6450_v48 = vld [vmem:[#allocation10_spill] sm:$0xff] }
 0x3b9   : > { %1176 = vperm.xlu1 %4850, %v606_v57  }
 0x3ba   : > { %v872_v7 = vpop.permute.xlu0 %871 }
 0x3bb   : > { %v1909_v11 = vadd.f32 %v1908_v25, %v872_v7 }
 0x3bd   : > { %v2155_v54 = vpack.c.bf16 %v1909_v11, %v1909_v11  ;;  %v6451_v11 = vld [vmem:[#allocation6_spill] sm:$0xff] }
 0x3bf   : > { %2284 = vst.msk [vmem:[#allocation2 + $0xc4] sm:$0xf] %vm2234_vm1, %v2155_v54 }
 0x3c1   : > { %961 = vperm.xlu1 %4850, %v563_v52   ;;  %v554_v52 = vld [vmem:[%s6410_s3 + $0x1d0] sm:$0xff] }
 0x3c2   : > { %v977_v44 = vpop.permute.xlu0 %976 }
 0x3c3   : > { %v1962_v32 = vadd.f32 %v5596_v26, %v977_v44 }
 0x3c5   : > { %v2176_v62 = vpack.c.bf16 %v1962_v32, %v1962_v32 }
 0x3c7   : > { %2305 = vst.msk [vmem:[#allocation2 + $0x118] sm:$0xf] %vm2234_vm1, %v2176_v62  ;;  %v6452_v62 = vld [vmem:[#allocation3_spill] sm:$0xff] }
 0x3c9   : > { %1166 = vperm.xlu1 %4850, %v604_v18  }
 0x3ca   : > { %v972_v16 = vpop.permute.xlu0 %971 }
 0x3cb   : > { %v1959_v55 = vadd.f32 %v5586_v22, %v972_v16  ;;  %v575_v16 = vld [vmem:[%s6410_s3 + $0x278] sm:$0xff] }
 0x3cd   : > { %v2175_v30 = vpack.c.bf16 %v1959_v55, %v1959_v55 }
 0x3cf   : > { %2304 = vst.msk [vmem:[#allocation2 + $0x114] sm:$0xf] %vm2234_vm1, %v2175_v30 }
 0x3d0   : > { %v2982_v33 = vpop.f32.mrf.mxu2 }
 0x3d1   : > { %1171 = vperm.xlu1 %4850, %v605_v3  }
 0x3d2   : > { %v957_v26 = vpop.permute.xlu0 %956 }
 0x3d3   : > { %v1952_v4 = vadd.f32 %v5556_v23, %v957_v26  ;;  %v561_v23 = vld [vmem:[%s6410_s3 + $0x208] sm:$0xff] }
 0x3d5   : > { %v2172_v6 = vpack.c.bf16 %v1952_v4, %v1952_v4  ;;  %v599_v4 = vld [vmem:[%s6410_s3 + $0x338] sm:$0xff] }
 0x3d7   : > { %2301 = vst.msk [vmem:[#allocation2 + $0x108] sm:$0xf] %vm2234_vm1, %v2172_v6 }
 0x3d8   : > { %v2984_v22 = vpop.f32.mrf.mxu2 }
 0x3d9   : > { %v2987_v61 = vpack.c.bf16 %v2984_v22, %v2982_v33  ;;  %946 = vperm.xlu1 %4850, %v560_v17   ;;  %v549_v33 = vld [vmem:[%s6410_s3 + $0x1a8] sm:$0xff] }
 0x3da   : > { %v1157_v39 = vpop.permute.xlu0 %1156 }
 0x3db   : > { %v2052_v51 = vadd.f32 %v5414_v56, %v1157_v39  ;;  %3060 = vmatmul.bf16.vlgmr.msra.gmra.mxu1 %v2987_v61  ;;  %v2610_v12 = vpop.xlane.xlu2 %2609  ;;  %v6453_v39 = vld [vmem:[#allocation12_spill] sm:$0xff] }
 0x3dd   : > { %v2212_v29 = vpack.c.bf16 %v2052_v51, %v2052_v51 }
 0x3df   : > { %2341 = vst.msk [vmem:[#allocation2 + $0x1a8] sm:$0xf] %vm2234_vm1, %v2212_v29  ;;  %v569_v29 = vld [vmem:[%s6410_s3 + $0x248] sm:$0xff] }
 0x3e1   : > { %951 = vperm.xlu1 %4850, %v561_v23  }
 0x3e2   : > { %v1147_v34 = vpop.permute.xlu0 %1146 }
 0x3e3   : > { %v2047_v0 = vadd.f32 %v5376_v24, %v1147_v34  ;;  %v2613_v28 = vpop.xlane.xlu1 %2612 }
 0x3e4   : > { %v2615_v21 = vsub.f32 %v5953_v19, %v2613_v28 }
 0x3e5   : > { %v2210_v41 = vpack.c.bf16 %v2047_v0, %v2047_v0  ;;  %v564_v0 = vld [vmem:[%s6410_s3 + $0x220] sm:$0xff] }
 0x3e6   : > { %v2618_v42 = vmul.f32 1.442695, %v2615_v21  ;;  %v6454_v21 = vld [vmem:[#allocation9_spill] sm:$0xff] }
 0x3e7   : > { %2339 = vst.msk [vmem:[#allocation2 + $0x1a0] sm:$0xf] %vm2234_vm1, %v2210_v41 }
 0x3e8   : > { %4862 = vpow2.f32 %v2618_v42 }
 0x3ea   : > { %v1152_v56 = vpop.permute.xlu0 %1151 }
 0x3eb   : > { %v2049_v20 = vadd.f32 %v5391_v36, %v1152_v56  ;;  %3222 = vmatmul.bf16.vlgmr.msrb.gmra.mxu1 %v5670_v15  ;;  %v2614_v36 = vsub.f32 %v5944_v10, %v2610_v12  ;;  %v559_v10 = vld [vmem:[%s6410_s3 + $0x1f8] sm:$0xff] }
 0x3ec   : > { %v607_v56 = vld [vmem:[%s6410_s3 + $0x378] sm:$0xff] }
 0x3ed   : > { %v2211_v38 = vpack.c.bf16 %v2049_v20, %v2049_v20  ;;  %v2616_v47 = vmul.f32 1.442695, %v2614_v36  ;;  %v598_v36 = vld [vmem:[%s6410_s3 + $0x330] sm:$0xff] }
 0x3ee   : > { %v6036_v45 = vpop.eup %4862 }
 0x3ef   : > { %2340 = vst.msk [vmem:[#allocation2 + $0x1a4] sm:$0xf] %vm2234_vm1, %v2211_v38  ;;  %v2623_v24 = vsel %vm2607_vm2, %v6036_v45, 0.0  ;;  %4864 = vpow2.f32 %v2616_v47  ;;  %v6455_v38 = vld [vmem:[#allocation11_spill] sm:$0xff] }
 0x3f0   : > { %2624 = vadd.xlane.f32.xlu2 %v2623_v24 }
 0x3f2   : > { %v1127_v50 = vpop.permute.xlu0 %1126 }
 0x3f3   : > { %v2037_v19 = vadd.f32 %v5635_v58, %v1127_v50  ;;  %v603_v50 = vld [vmem:[%s6410_s3 + $0x358] sm:$0xff] }
 0x3f5   : > { %v2206_v8 = vpack.c.bf16 %v2037_v19, %v2037_v19 }
 0x3f7   : > { %2335 = vst.msk [vmem:[#allocation2 + $0x190] sm:$0xf] %vm2234_vm1, %v2206_v8 }
 0x3fa   : > { %v1117_v53 = vpop.permute.xlu0 %1116 }
 0x3fb   : > { %v2032_v15 = vadd.f32 %v5619_v43, %v1117_v53  ;;  %v927_v59 = vpop.permute.xlu1 %926  ;;  %v6052_v43 = vpop.eup %4864 }
 0x3fc   : > { %v1937_v40 = vadd.f32 %v5474_v31, %v927_v59  ;;  %v2620_v31 = vsel %vm2607_vm2, %v6052_v43, 0.0 }
 0x3fd   : > { %v2204_v1 = vpack.c.bf16 %v2032_v15, %v2032_v15 }
 0x3fe   : > { %v2166_v27 = vpack.c.bf16 %v1937_v40, %v1937_v40 }
 0x3ff   : > { %2333 = vst.msk [vmem:[#allocation2 + $0x188] sm:$0xf] %vm2234_vm1, %v2204_v1 }
 0x400   : > { %2295 = vst.msk [vmem:[#allocation2 + $0xf0] sm:$0xf] %vm2234_vm1, %v2166_v27 }
 0x403   : > { %v922_v58 = vpop.permute.xlu1 %921 }
 0x404   : > { %v1934_v57 = vadd.f32 %v6450_v48, %v922_v58  ;;  %v6456_v48 = vld [vmem:[#allocation15_spill] sm:$0xff] }
 0x406   : > { %v2165_v25 = vpack.c.bf16 %v1934_v57, %v1934_v57 }
 0x408   : > { %2294 = vst.msk [vmem:[#allocation2 + $0xec] sm:$0xf] %vm2234_vm1, %v2165_v25  ;;  %941 = vperm.xlu2 %4851, %v559_v10  }
 0x40b   : > { %2621 = vadd.xlane.f32.xlu1 %v2620_v31  ;;  %v907_v7 = vpop.permute.xlu1 %906 }
 0x40c   : > { %v1927_v54 = vadd.f32 %v6451_v11, %v907_v7  ;;  %v6457_v7 = vld [vmem:[#allocation8_spill] sm:$0xff] }
 0x40e   : > { %v2162_v44 = vpack.c.bf16 %v1927_v54, %v1927_v54 }
 0x410   : > { %2291 = vst.msk [vmem:[#allocation2 + $0xe0] sm:$0xf] %vm2234_vm1, %v2162_v44  ;;  %916 = vperm.xlu2 %4851, %v554_v52  }
 0x413   : > { %v882_v32 = vpop.permute.xlu1 %881 }
 0x414   : > { %v1914_v18 = vadd.f32 %v6452_v62, %v882_v32  ;;  %v4800_v62 = vld [vmem:[#allocation2 + $0xf0] sm:$0xff] }
 0x416   : > { %v2157_v55 = vpack.c.bf16 %v1914_v18, %v1914_v18  ;;  %v6458_v18 = vld [vmem:[#allocation5_spill] sm:$0xff] }
 0x418   : > { %2286 = vst.msk [vmem:[#allocation2 + $0xcc] sm:$0xf] %vm2234_vm1, %v2157_v55  ;;  %1021 = vperm.xlu2 %4851, %v575_v16  }
 0x41b   : > { %v987_v30 = vpop.permute.xlu1 %986 }
 0x41c   : > { %v1967_v3 = vadd.f32 %v5616_v60, %v987_v30  ;;  %v544_v60 = vld [vmem:[%s6410_s3 + $0x180] sm:$0xff] }
 0x41e   : > { %v2178_v26 = vpack.c.bf16 %v1967_v3, %v1967_v3  ;;  %v592_v3 = vld [vmem:[%s6410_s3 + $0x300] sm:$0xff] }
 0x420   : > { %2307 = vst.msk [vmem:[#allocation2 + $0x120] sm:$0xf] %vm2234_vm1, %v2178_v26  ;;  %891 = vperm.xlu2 %4851, %v549_v33   ;;  %v4798_v26 = vld [vmem:[#allocation2 + $0xe0] sm:$0xff] }
 0x423   : > { %v982_v6 = vpop.permute.xlu1 %981 }
 0x424   : > { %v1964_v17 = vadd.f32 %v5606_v5, %v982_v6  ;;  %1141 = vperm.xlu1 %4850, %v599_v4   ;;  %v6459_v4 = vld [vmem:[#allocation4_spill] sm:$0xff] }
 0x426   : > { %v2177_v22 = vpack.c.bf16 %v1964_v17, %v1964_v17 }
 0x428   : > { %2306 = vst.msk [vmem:[#allocation2 + $0x11c] sm:$0xf] %vm2234_vm1, %v2177_v22  ;;  %866 = vperm.xlu2 %4851, %v544_v60   ;;  %v4797_v60 = vld [vmem:[#allocation2 + $0xd8] sm:$0xff] }
 0x42b   : > { %v1177_v61 = vpop.permute.xlu1 %1176 }
 0x42c   : > { %v2062_v51 = vadd.f32 %v6453_v39, %v1177_v61 }
 0x42e   : > { %v2216_v23 = vpack.c.bf16 %v2062_v51, %v2062_v51 }
 0x430   : > { %2345 = vst.msk [vmem:[#allocation2 + $0x1b8] sm:$0xf] %vm2234_vm1, %v2216_v23  ;;  %991 = vperm.xlu2 %4851, %v569_v29   ;;  %v4736_v29 = vld [vmem:[#allocation2 + $0x130] sm:$0xff] }
 0x433   : > { %v962_v5 = vpop.permute.xlu1 %961 }
 0x434   : > { %v1954_v34 = vadd.f32 %v5566_v9, %v962_v5 }
 0x436   : > { %v2173_v28 = vpack.c.bf16 %v1954_v34, %v1954_v34  ;;  %v597_v34 = vld [vmem:[%s6410_s3 + $0x328] sm:$0xff] }
 0x438   : > { %2302 = vst.msk [vmem:[#allocation2 + $0x10c] sm:$0xf] %vm2234_vm1, %v2173_v28  ;;  %966 = vperm.xlu2 %4851, %v564_v0   ;;  %v2721_v28 = vsel %vm2607_vm2, %v4736_v29, 0 }
 0x43b   : > { %v1167_v41 = vpop.permute.xlu1 %1166 }
 0x43c   : > { %v2057_v42 = vadd.f32 %v6454_v21, %v1167_v41  ;;  %v4795_v21 = vld [vmem:[#allocation2 + $0xc8] sm:$0xff] }
 0x43e   : > { %v2214_v20 = vpack.c.bf16 %v2057_v42, %v2057_v42  ;;  %v4735_v42 = vld [vmem:[#allocation2 + $0x128] sm:$0xff] }
 0x440   : > { %2343 = vst.msk [vmem:[#allocation2 + $0x1b0] sm:$0xf] %vm2234_vm1, %v2214_v20  ;;  %1181 = vperm.xlu2 %4851, %v607_v56  }
 0x443   : > { %v1172_v9 = vpop.permute.xlu1 %1171 }
 0x444   : > { %v2059_v24 = vadd.f32 %v6455_v38, %v1172_v9  ;;  %v595_v9 = vld [vmem:[%s6410_s3 + $0x318] sm:$0xff] }
 0x446   : > { %v2215_v19 = vpack.c.bf16 %v2059_v24, %v2059_v24 }
 0x448   : > { %2344 = vst.msk [vmem:[#allocation2 + $0x1b4] sm:$0xf] %vm2234_vm1, %v2215_v19  ;;  %1161 = vperm.xlu2 %4851, %v603_v50   ;;  %v2718_v19 = vsel %vm2607_vm2, %v4735_v42, 0 }
 0x44b   : > { %v947_v8 = vpop.permute.xlu1 %946 }
 0x44c   : > { %v1947_v12 = vadd.f32 %v5540_v46, %v947_v8 }
 0x44e   : > { %v2170_v53 = vpack.c.bf16 %v1947_v12, %v1947_v12 }
 0x450   : > { %2299 = vst.msk [vmem:[#allocation2 + $0x100] sm:$0xf] %vm2234_vm1, %v2170_v53  ;;  %1136 = vperm.xlu2 %4851, %v598_v36  }
 0x453   : > { %v952_v15 = vpop.permute.xlu1 %951 }
 0x454   : > { %v1949_v59 = vadd.f32 %v5548_v49, %v952_v15 }
 0x456   : > { %v2171_v1 = vpack.c.bf16 %v1949_v59, %v1949_v59  ;;  %v6460_v59 = vld [vmem:[#allocation13_spill] sm:$0xff] }
 0x458   : > { %v6106_v40 = vpop.f32.mrf.mxu1  ;;  %2300 = vst.msk [vmem:[#allocation2 + $0x104] sm:$0xf] %vm2234_vm1, %v2171_v1 }
 0x460   : > { %v6109_v47 = vpop.f32.mrf.mxu1 }
 0x463   : > { %v6111_v27 = vpop.xlane.xlu2 %2624 }
 0x464   : > { %vm2646_vm15 = vweird.f32 %v6111_v27 }
 0x468   : > { %v6113_v46 = vpop.f32.mrf.mxu1 }
 0x469   : > { %v3228_v44 = vsel %vm2607_vm2, %v6113_v46, -inf }
 0x46b   : > { %v942_v58 = vpop.permute.xlu2 %941 }
 0x46c   : > { %v1944_v57 = vadd.f32 %v6456_v48, %v942_v58  ;;  %v622_v58 = vld [vmem:[%s6410_s3 + $0x3f0] sm:$0xff] }
 0x46e   : > { %v2169_v10 = vpack.c.bf16 %v1944_v57, %v1944_v57 }
 0x470   : > { %v6116_v25 = vpop.f32.mrf.mxu1  ;;  %2298 = vst.msk [vmem:[#allocation2 + $0xfc] sm:$0xf] %vm2234_vm1, %v2169_v10 }
 0x471   : > { %v3231_v49 = vsel %vm2607_vm2, %v6116_v25, -inf }
 0x472   : > { %3232 = vmax.xlane.f32.xlu0 %v3231_v49 }
 0x473   : > { %v917_v31 = vpop.permute.xlu2 %916 }
 0x474   : > { %v1932_v11 = vadd.f32 %v6457_v7, %v917_v31  ;;  %v6461_v31 = vld [vmem:[#allocation7_spill] sm:$0xff] }
 0x476   : > { %v2164_v54 = vpack.c.bf16 %v1932_v11, %v1932_v11 }
 0x477   : > { %v4801_v52 = vld [vmem:[#allocation2 + $0xf8] sm:$0xff] }
 0x478   : > { %2293 = vst.msk [vmem:[#allocation2 + $0xe8] sm:$0xf] %vm2234_vm1, %v2164_v54  ;;  %3525 = vmatpush.bf16.msra.mxu1 %v4801_v52 }
 0x479   : > { %3229 = vmax.xlane.f32.xlu2 %v3228_v44  ;;  %v623_v44 = vld [vmem:[%s6410_s3 + $0x3f8] sm:$0xff] }
 0x47b   : > { %v1022_v32 = vpop.permute.xlu2 %1021 }
 0x47c   : > { %v1984_v16 = vadd.f32 %v6458_v18, %v1022_v32  ;;  %3526 = vmatpush.bf16.msra.mxu1 %v4800_v62 }
 0x47e   : > { %v2185_v55 = vpack.c.bf16 %v1984_v16, %v1984_v16  ;;  %v6134_v23 = vpop.xlane.xlu1 %2621 }
 0x47f   : > { %v4799_v30 = vld [vmem:[#allocation2 + $0xe8] sm:$0xff]  ;;  %4866 = vrcp.f32 %v6134_v23  ;;  %vm2631_vm13 = vweird.f32 %v6134_v23 }
 0x480   : > { %2314 = vst.msk [vmem:[#allocation2 + $0x13c] sm:$0xf] %vm2234_vm1, %v2185_v55  ;;  %3527 = vmatpush.bf16.msra.mxu1 %v4799_v30  ;;  %4868 = vrcp.f32 %v6111_v27 }
 0x483   : > { %v892_v33 = vpop.permute.xlu2 %891 }
 0x484   : > { %v1919_v6 = vadd.f32 %v6459_v4, %v892_v33  ;;  %3528 = vmatpush.bf16.msra.mxu1 %v4798_v26  ;;  %v4731_v4 = vld [vmem:[#allocation2 + $0x108] sm:$0xff] }
 0x485   : > { %v4867_v57 = vpop.eup %4866 }
 0x486   : > { %1106 = vperm.xlu0 %4852, %v592_v3   ;;  %v2159_v17 = vpack.c.bf16 %v1919_v6, %v1919_v6  ;;  %v4869_v49 = vpop.eup %4868  ;;  %v2627_v11 = vmul.f32 %v4867_v57, %v6134_v23  ;;  %v4784_v6 = vld [vmem:[#allocation2 + $0x1b0] sm:$0xff]  ;;  %vm2632_vm11 = vweird.f32 %v4867_v57 }
 0x487   : > { %v4737_v22 = vld [vmem:[#allocation2 + $0x138] sm:$0xff]  ;;  %v2642_v32 = vmul.f32 %v4869_v49, %v6111_v27  ;;  %vm2647_vm12 = vweird.f32 %v4869_v49  ;;  %vm2633_vm14 = vmor %vm2631_vm13, %vm2632_vm11 }
 0x488   : > { %2288 = vst.msk [vmem:[#allocation2 + $0xd4] sm:$0xf] %vm2234_vm1, %v2159_v17  ;;  %3529 = vmatpush.bf16.msra.mxu1 %v4797_v60  ;;  %v2724_v61 = vsel %vm2607_vm2, %v4737_v22, 0  ;;  %v2628_v18 = vsub.f32 1.0, %v2627_v11  ;;  %vm2648_vm0 = vmor %vm2646_vm15, %vm2647_vm12  ;;  %v6464_v11 = vld [vmem:[#allocation28_spill] sm:$0xff] }
 0x489   : > { %2726 = vmatpush.bf16.xpose.msra.mxu3 %v2724_v61  ;;  %v2643_v30 = vsub.f32 1.0, %v2642_v32  ;;  %v2706_v61 = vsel %vm2607_vm2, %v4731_v4, 0 }
 0x48a   : > { %v2629_v26 = vmul.f32 %v4867_v57, %v2628_v18 }
 0x48b   : > { %v867_v39 = vpop.permute.xlu2 %866  ;;  %v2644_v60 = vmul.f32 %v4869_v49, %v2643_v30  ;;  %v6465_v30 = vld [vmem:[#allocation25_spill] sm:$0xff] }
 0x48c   : > { %v1907_v51 = vadd.f32 %v5996_v37, %v867_v39  ;;  %v2630_v22 = vadd.f32 %v4867_v57, %v2629_v26  ;;  %v3341_v39 = vsel %vm2607_vm2, %v4784_v6, 0  ;;  %v619_v6 = vld [vmem:[%s6410_s3 + $0x3d8] sm:$0xff] }
 0x48d   : > { %v2645_v29 = vadd.f32 %v4869_v49, %v2644_v60 }
 0x48e   : > { %v2154_v5 = vpack.c.bf16 %v1907_v51, %v1907_v51  ;;  %v2637_v51 = vand.u32 2147483648, %v6134_v23 }
 0x48f   : > { %v4796_v0 = vld [vmem:[#allocation2 + $0xd0] sm:$0xff] }
 0x490   : > { %2283 = vst.msk [vmem:[#allocation2 + $0xc0] sm:$0xf] %vm2234_vm1, %v2154_v5  ;;  %3530 = vmatpush.bf16.msra.mxu1 %v4796_v0  ;;  %v2652_v5 = vand.u32 2147483648, %v6111_v27  ;;  %v2634_v0 = vsel %vm2633_vm14, %v4867_v57, %v2630_v22  ;;  %v6463_v57 = vld [vmem:[#allocation23_spill] sm:$0xff]  ;;  %v4741_v22 = vld [vmem:[%s6413_s6 + $0x18] sm:$0xff] }
 0x491   : > { %1131 = vperm.xlu2 %4851, %v597_v34   ;;  %2727 = vmatpush.bf16.xpose.msra.mxu3 %v2721_v28  ;;  %v2650_v34 = vand.u32 2147483647, %v6111_v27  ;;  %v4730_v28 = vld [vmem:[#allocation2 + $0x100] sm:$0xff] }
 0x492   : > { %v2653_v42 = vor.u32 1.1754944e-38, %v2652_v5  ;;  %v616_v5 = vld [vmem:[%s6410_s3 + $0x3c0] sm:$0xff] }
 0x493   : > { %v992_v41 = vpop.permute.xlu2 %991  ;;  %vm2651_vm4 = vcmp.eq.f32.partialorder %v2650_v34, 8.507059e+37 }
 0x494   : > { %v1969_v37 = vadd.f32 %v5625_v13, %v992_v41  ;;  %3531 = vmatpush.bf16.msra.mxu1 %v4795_v21  ;;  %v2638_v21 = vor.u32 1.1754944e-38, %v2637_v51  ;;  %v4740_v51 = vld [vmem:[%s6413_s6 + $0x10] sm:$0xff] }
 0x496   : > { %v2179_v56 = vpack.c.bf16 %v1969_v37, %v1969_v37  ;;  %v1142_v20 = vpop.permute.xlu1 %1141  ;;  %v2649_v37 = vsel %vm2648_vm0, %v4869_v49, %v2645_v29 }
 0x497   : > { %v2044_v38 = vadd.f32 %v5658_v63, %v1142_v20  ;;  %v4794_v24 = vld [vmem:[#allocation2 + $0xc0] sm:$0xff]  ;;  %v593_v63 = vld [vmem:[%s6410_s3 + $0x308] sm:$0xff]  ;;  %v2703_v20 = vsel %vm2607_vm2, %v4730_v28, 0 }
 0x498   : > { %2308 = vst.msk [vmem:[#allocation2 + $0x124] sm:$0xf] %vm2234_vm1, %v2179_v56  ;;  %3532 = vmatpush.bf16.msra.mxu1 %v4794_v24  ;;  %v4782_v24 = vld [vmem:[#allocation2 + $0x1a0] sm:$0xff] }
 0x499   : > { %v2209_v50 = vpack.c.bf16 %v2044_v38, %v2044_v38  ;;  %1121 = vperm.xlu2 %4851, %v595_v9   ;;  %2728 = vmatpush.bf16.xpose.msra.mxu3 %v2718_v19  ;;  %v2654_v9 = vsel %vm2651_vm4, %v2653_v42, %v2649_v37  ;;  %v3335_v19 = vsel %vm2607_vm2, %v4782_v24, 0  ;;  %v4738_v37 = vld [vmem:[%s6413_s6] sm:$0xff] }
 0x49a   : > { %v2657_v27 = vmul.f32 %v6036_v45, %v2654_v9 }
 0x49b   : > { %2338 = vst.msk [vmem:[#allocation2 + $0x19c] sm:$0xf] %vm2234_vm1, %v2209_v50  ;;  %v967_v13 = vpop.permute.xlu2 %966  ;;  %3533 = vmatmul.bf16.vlgmr.msra.gmra.mxu1 %v5672_v14 }
 0x49c   : > { %v1957_v8 = vadd.f32 %v5576_v35, %v967_v13  ;;  %v4733_v35 = vld [vmem:[#allocation2 + $0x118] sm:$0xff] }
 0x49d   : > { %v2712_v48 = vsel %vm2607_vm2, %v4733_v35, 0  ;;  %v6462_v35 = vld [vmem:[#allocation31_spill] sm:$0xff] }
 0x49e   : > { %v2174_v12 = vpack.c.bf16 %v1957_v8, %v1957_v8 }
 0x49f   : > { %v4734_v36 = vld [vmem:[#allocation2 + $0x120] sm:$0xff] }
 0x4a0   : > { %2303 = vst.msk [vmem:[#allocation2 + $0x110] sm:$0xf] %vm2234_vm1, %v2174_v12  ;;  %v2715_v53 = vsel %vm2607_vm2, %v4734_v36, 0 }
 0x4a1   : > { %1111 = vperm.xlu2 %4851, %v593_v63   ;;  %2729 = vmatpush.bf16.xpose.msra.mxu3 %v2715_v53 }
 0x4a3   : > { %v1182_v15 = vpop.permute.xlu2 %1181 }
 0x4a4   : > { %v2064_v1 = vadd.f32 %v6460_v59, %v1182_v15 }
 0x4a6   : > { %v2217_v14 = vpack.c.bf16 %v2064_v1, %v2064_v1 }
 0x4a7   : > { %v4732_v54 = vld [vmem:[#allocation2 + $0x110] sm:$0xff] }
 0x4a8   : > { %2346 = vst.msk [vmem:[#allocation2 + $0x1bc] sm:$0xf] %vm2234_vm1, %v2217_v14  ;;  %v2709_v16 = vsel %vm2607_vm2, %v4732_v54, 0 }
 0x4a9   : > { %1256 = vperm.xlu2 %4851, %v622_v58   ;;  %2730 = vmatpush.bf16.xpose.msra.mxu3 %v2712_v48 }
 0x4ab   : > { %v1162_v10 = vpop.permute.xlu2 %1161 }
 0x4ac   : > { %v2054_v7 = vadd.f32 %v6461_v31, %v1162_v10 }
 0x4ae   : > { %v2213_v52 = vpack.c.bf16 %v2054_v7, %v2054_v7  ;;  %v4745_v7 = vld [vmem:[%s6413_s6 + $0x38] sm:$0xff] }
 0x4af   : > { %v4785_v62 = vld [vmem:[#allocation2 + $0x1b8] sm:$0xff] }
 0x4b0   : > { %2342 = vst.msk [vmem:[#allocation2 + $0x1ac] sm:$0xf] %vm2234_vm1, %v2213_v52  ;;  %v3344_v55 = vsel %vm2607_vm2, %v4785_v62, 0  ;;  %v4744_v52 = vld [vmem:[%s6413_s6 + $0x30] sm:$0xff]  ;;  %v620_v62 = vld [vmem:[%s6410_s3 + $0x3e0] sm:$0xff] }
 0x4b1   : > { %1261 = vperm.xlu2 %4851, %v623_v44   ;;  %2731 = vmatpush.bf16.xpose.msra.mxu3 %v2709_v16 }
 0x4b2   : > { %3346 = vmatpush.bf16.xpose.msra.mxu2 %v3344_v55  ;;  %v4743_v55 = vld [vmem:[%s6413_s6 + $0x28] sm:$0xff] }
 0x4b3   : > { %v1137_v3 = vpop.permute.xlu2 %1136 }
 0x4b4   : > { %v2042_v33 = vadd.f32 %v5649_v2, %v1137_v3  ;;  %v2635_v2 = vand.u32 2147483647, %v6134_v23 }
 0x4b6   : > { %v2208_v17 = vpack.c.bf16 %v2042_v33, %v2042_v33  ;;  %vm2636_vm3 = vcmp.eq.f32.partialorder %v2635_v2, 8.507059e+37  ;;  %v4742_v33 = vld [vmem:[%s6413_s6 + $0x20] sm:$0xff] }
 0x4b7   : > { %v4783_v41 = vld [vmem:[#allocation2 + $0x1a8] sm:$0xff]  ;;  %v2639_v56 = vsel %vm2636_vm3, %v2638_v21, %v2634_v0 }
 0x4b8   : > { %2337 = vst.msk [vmem:[#allocation2 + $0x198] sm:$0xf] %vm2234_vm1, %v2208_v17  ;;  %v3338_v23 = vsel %vm2607_vm2, %v4783_v41, 0  ;;  %v2656_v38 = vmul.f32 %v6052_v43, %v2639_v56  ;;  %v4739_v0 = vld [vmem:[%s6413_s6 + $0x8] sm:$0xff]  ;;  %v6467_v41 = vld [vmem:[#allocation34_spill] sm:$0xff] }
 0x4b9   : > { %2732 = vmatpush.bf16.xpose.msra.mxu3 %v2706_v61  ;;  %v6466_v61 = vld [vmem:[#allocation33_spill] sm:$0xff]  ;;  %v4793_v56 = vld [vmem:[%s6413_s6 + $0xb8] sm:$0xff] }
 0x4ba   : > { %3347 = vmatpush.bf16.xpose.msra.mxu2 %v3341_v39  ;;  %v2658_v50 = vpack.c.bf16 %v2657_v27, %v2656_v38  ;;  %v4792_v38 = vld [vmem:[%s6413_s6 + $0xb0] sm:$0xff]  ;;  %v4791_v27 = vld [vmem:[%s6413_s6 + $0xa8] sm:$0xff] }
 0x4bf   : > { %v4781_v13 = vld [vmem:[#allocation2 + $0x198] sm:$0xff] }
 0x4c0   : > { %v3332_v8 = vsel %vm2607_vm2, %v4781_v13, 0  ;;  %v4790_v13 = vld [vmem:[%s6413_s6 + $0xa0] sm:$0xff] }
 0x4c1   : > { %2733 = vmatpush.bf16.xpose.msra.mxu3 %v2703_v20 }
 0x4c2   : > { %3348 = vmatpush.bf16.xpose.msra.mxu2 %v3338_v23  ;;  %v614_v23 = vld [vmem:[%s6410_s3 + $0x3b0] sm:$0xff] }
 0x4c8   : > { %4321 = vmatmul.msk.bf16.vlgmr.msra.gmra.mxu3 %vm2607_vm2, %v2658_v50  ;;  %v613_v50 = vld [vmem:[%s6410_s3 + $0x3a8] sm:$0xff] }
 0x4c9   : > { %3114 = vmatpush.bf16.msrb.mxu3 %v4745_v7 }
 0x4ca   : > { %3349 = vmatpush.bf16.xpose.msra.mxu2 %v3335_v19 }
 0x4cd   : > { %3115 = vmatpush.bf16.msrb.mxu3 %v4744_v52 }
 0x4d1   : > { %3116 = vmatpush.bf16.msrb.mxu3 %v4743_v55 }
 0x4d2   : > { %3350 = vmatpush.bf16.xpose.msra.mxu2 %v3332_v8  ;;  %v4789_v8 = vld [vmem:[%s6413_s6 + $0x98] sm:$0xff] }
 0x4d5   : > { %3117 = vmatpush.bf16.msrb.mxu3 %v4742_v33 }
 0x4d9   : > { %3118 = vmatpush.bf16.msrb.mxu3 %v4741_v22 }
 0x4dd   : > { %3119 = vmatpush.bf16.msrb.mxu3 %v4740_v51 }
 0x4e1   : > { %3120 = vmatpush.bf16.msrb.mxu3 %v4739_v0 }
 0x4e5   : > { %v3233_v12 = vpop.xlane.xlu0 %3232  ;;  %3121 = vmatpush.bf16.msrb.mxu3 %v4738_v37  ;;  %v6469_v37 = vld [vmem:[#allocation29_spill] sm:$0xff] }
 0x4e6   : > { %v3235_v63 = vsub.f32 %v6116_v25, %v3233_v12  ;;  %v608_v12 = vld [vmem:[%s6410_s3 + $0x380] sm:$0xff] }
 0x4e8   : > { %v3238_v36 = vmul.f32 1.442695, %v3235_v63  ;;  %v4788_v63 = vld [vmem:[%s6413_s6 + $0x90] sm:$0xff] }
 0x4e9   : > { %3425 = vmatpush.bf16.msra.mxu3 %v4793_v56 }
 0x4ea   : > { %4870 = vpow2.f32 %v3238_v36  ;;  %v4787_v36 = vld [vmem:[%s6413_s6 + $0x88] sm:$0xff] }
 0x4ec   : > { %v3230_v53 = vpop.xlane.xlu2 %3229 }
 0x4ed   : > { %v3234_v43 = vsub.f32 %v6113_v46, %v3230_v53  ;;  %3426 = vmatpush.bf16.msra.mxu3 %v4792_v38  ;;  %v618_v53 = vld [vmem:[%s6410_s3 + $0x3d0] sm:$0xff] }
 0x4ef   : > { %v3236_v15 = vmul.f32 1.442695, %v3234_v43  ;;  %v4786_v43 = vld [vmem:[%s6413_s6 + $0x80] sm:$0xff] }
 0x4f0   : > { %v6192_v45 = vpop.eup %4870 }
 0x4f1   : > { %v3243_v59 = vsel %vm2607_vm2, %v6192_v45, 0.0  ;;  %4872 = vpow2.f32 %v3236_v15  ;;  %3427 = vmatpush.bf16.msra.mxu3 %v4791_v27  ;;  %v612_v15 = vld [vmem:[%s6410_s3 + $0x3a0] sm:$0xff] }
 0x4f2   : > { %3244 = vadd.xlane.f32.xlu0 %v3243_v59  ;;  %v621_v59 = vld [vmem:[%s6410_s3 + $0x3e8] sm:$0xff] }
 0x4f4   : > { %v1132_v1 = vpop.permute.xlu2 %1131 }
 0x4f5   : > { %v2039_v14 = vadd.f32 %v6462_v35, %v1132_v1  ;;  %3428 = vmatpush.bf16.msra.mxu3 %v4790_v13  ;;  %v611_v1 = vld [vmem:[%s6410_s3 + $0x398] sm:$0xff]  ;;  %v617_v35 = vld [vmem:[%s6410_s3 + $0x3c8] sm:$0xff] }
 0x4f7   : > { %v6197_v58 = vpop.eup %4872  ;;  %v2207_v48 = vpack.c.bf16 %v2039_v14, %v2039_v14  ;;  %v615_v14 = vld [vmem:[%s6410_s3 + $0x3b8] sm:$0xff] }
 0x4f8   : > { %v1107_v25 = vpop.permute.xlu0 %1106  ;;  %v3240_v46 = vsel %vm2607_vm2, %v6197_v58, 0.0 }
 0x4f9   : > { %v2027_v10 = vadd.f32 %v6463_v57, %v1107_v25  ;;  %2336 = vst.msk [vmem:[#allocation2 + $0x194] sm:$0xf] %vm2234_vm1, %v2207_v48  ;;  %3241 = vadd.xlane.f32.xlu1 %v3240_v46  ;;  %3429 = vmatpush.bf16.msra.mxu3 %v4789_v8  ;;  %v610_v25 = vld [vmem:[%s6410_s3 + $0x390] sm:$0xff] }
 0x4fb   : > { %v2202_v49 = vpack.c.bf16 %v2027_v10, %v2027_v10 }
 0x4fc   : > { %v1122_v31 = vpop.permute.xlu2 %1121 }
 0x4fd   : > { %2331 = vst.msk [vmem:[#allocation2 + $0x180] sm:$0xf] %vm2234_vm1, %v2202_v49  ;;  %v2034_v54 = vadd.f32 %v6464_v11, %v1122_v31  ;;  %3430 = vmatpush.bf16.msra.mxu3 %v4788_v63  ;;  %v609_v31 = vld [vmem:[%s6410_s3 + $0x388] sm:$0xff] }
 0x4ff   : > { %v2205_v44 = vpack.c.bf16 %v2034_v54, %v2034_v54 }
 0x500   : > { %v4780_v32 = vld [vmem:[#allocation2 + $0x190] sm:$0xff] }
 0x501   : > { %2334 = vst.msk [vmem:[#allocation2 + $0x18c] sm:$0xf] %vm2234_vm1, %v2205_v44  ;;  %v3329_v18 = vsel %vm2607_vm2, %v4780_v32, 0  ;;  %3431 = vmatpush.bf16.msra.mxu3 %v4787_v36 }
 0x502   : > { %3351 = vmatpush.bf16.xpose.msra.mxu2 %v3329_v18 }
 0x504   : > { %v1112_v16 = vpop.permute.xlu2 %1111 }
 0x505   : > { %v2029_v3 = vadd.f32 %v6465_v30, %v1112_v16  ;;  %3432 = vmatpush.bf16.msra.mxu3 %v4786_v43  ;;  %v6472_v43 = vld [vmem:[#allocation27_spill] sm:$0xff] }
 0x506   : > { %1246 = vperm.xlu0 %4852, %v620_v62  }
 0x507   : > { %v2203_v26 = vpack.c.bf16 %v2029_v3, %v2029_v3 }
 0x508   : > { %v4779_v4 = vld [vmem:[#allocation2 + $0x188] sm:$0xff] }
 0x509   : > { %2332 = vst.msk [vmem:[#allocation2 + $0x184] sm:$0xf] %vm2234_vm1, %v2203_v26  ;;  %v3326_v17 = vsel %vm2607_vm2, %v4779_v4, 0 }
 0x50a   : > { %3352 = vmatpush.bf16.xpose.msra.mxu2 %v3326_v17 }
 0x50c   : > { %v1257_v60 = vpop.permute.xlu2 %1256 }
 0x50d   : > { %v2102_v39 = vadd.f32 %v6466_v61, %v1257_v60  ;;  %v6468_v60 = vld [vmem:[#allocation30_spill] sm:$0xff] }
 0x50e   : > { %1241 = vperm.xlu0 %4852, %v619_v6  }
 0x50f   : > { %v2232_v29 = vpack.c.bf16 %v2102_v39, %v2102_v39 }
 0x510   : > { %v4778_v2 = vld [vmem:[#allocation2 + $0x180] sm:$0xff] }
 0x511   : > { %2361 = vst.msk [vmem:[#allocation2 + $0x1f8] sm:$0xf] %vm2234_vm1, %v2232_v29  ;;  %v3323_v34 = vsel %vm2607_vm2, %v4778_v2, 0 }
 0x512   : > { %3353 = vmatpush.bf16.xpose.msra.mxu2 %v3323_v34 }
 0x514   : > { %v1262_v28 = vpop.permute.xlu2 %1261 }
 0x515   : > { %v2104_v21 = vadd.f32 %v6467_v41, %v1262_v28 }
 0x516   : > { %1226 = vperm.xlu0 %4852, %v616_v5  }
 0x517   : > { %v2233_v42 = vpack.c.bf16 %v2104_v21, %v2104_v21 }
 0x518   : > { %v6251_v20 = vpop.f32.mrf.mxu1 }
 0x519   : > { %2362 = vst.msk [vmem:[#allocation2 + $0x1fc] sm:$0xf] %vm2234_vm1, %v2233_v42  ;;  %v3539_v9 = vsel %vm2607_vm2, %v6251_v20, -inf }
 0x51a   : > { %3540 = vmax.xlane.f32.xlu2 %v3539_v9  ;;  %v6470_v9 = vld [vmem:[#allocation24_spill] sm:$0xff] }
 0x51e   : > { %1216 = vperm.xlu0 %4852, %v614_v23  }
 0x520   : > { %v6264_v24 = vpop.f32.mrf.mxu1  ;;  %v4809_v57 = vld [vmem:[#allocation2 + $0x1f8] sm:$0xff] }
 0x521   : > { %v3542_v19 = vsel %vm2607_vm2, %v6264_v24, -inf  ;;  %v3655_v49 = vsel %vm2607_vm2, %v4809_v57, 0 }
 0x522   : > { %3543 = vmax.xlane.f32.xlu1 %v3542_v19 }
 0x526   : > { %1211 = vperm.xlu0 %4852, %v613_v50  }
 0x52e   : > { %1186 = vperm.xlu0 %4852, %v608_v12  }
 0x532   : > { %1236 = vperm.xlu2 %4851, %v618_v53  }
 0x53a   : > { %1206 = vperm.xlu2 %4851, %v612_v15  }
 0x53b   : > { %1251 = vperm.xlu1 %4850, %v621_v59  }
 0x542   : > { %1201 = vperm.xlu2 %4851, %v611_v1   ;;  %v6473_v1 = vld [vmem:[#allocation20_spill] sm:$0xff] }
 0x543   : > { %1231 = vperm.xlu1 %4850, %v617_v35  }
 0x54b   : > { %1221 = vperm.xlu1 %4850, %v615_v14   ;;  %v2735_v48 = vpop.f32.mrf.mxu3 }
 0x553   : > { %1196 = vperm.xlu1 %4850, %v610_v25   ;;  %v2737_v10 = vpop.f32.mrf.mxu3 }
 0x554   : > { %v2740_v46 = vpack.c.bf16 %v2737_v10, %v2735_v48 }
 0x556   : > { %3122 = vmatmul.bf16.vlgmr.msrb.gmra.mxu3 %v2740_v46 }
 0x557   : > { %3657 = vmatpush.bf16.xpose.msrb.mxu3 %v3655_v49  ;;  %v6474_v49 = vld [vmem:[#allocation19_spill] sm:$0xff] }
 0x55b   : > { %1191 = vperm.xlu1 %4850, %v609_v31   ;;  %v6475_v31 = vld [vmem:[#allocation14_spill] sm:$0xff] }
 0x565   : > { %v3245_v7 = vpop.xlane.xlu0 %3244 }
 0x566   : > { %4874 = vrcp.f32 %v3245_v7  ;;  %v3272_v55 = vand.u32 2147483648, %v3245_v7  ;;  %vm3266_vm6 = vweird.f32 %v3245_v7  ;;  %v3270_v30 = vand.u32 2147483647, %v3245_v7 }
 0x568   : > { %v3273_v61 = vor.u32 1.1754944e-38, %v3272_v55  ;;  %vm3271_vm9 = vcmp.eq.f32.partialorder %v3270_v30, 8.507059e+37  ;;  %v6477_v30 = vld [vmem:[#allocation32_spill] sm:$0xff] }
 0x56c   : > { %v4875_v11 = vpop.eup %4874  ;;  %v3242_v52 = vpop.xlane.xlu1 %3241 }
 0x56d   : > { %v3262_v54 = vmul.f32 %v4875_v11, %v3245_v7  ;;  %4876 = vrcp.f32 %v3242_v52  ;;  %vm3267_vm5 = vweird.f32 %v4875_v11  ;;  %v3255_v33 = vand.u32 2147483647, %v3242_v52 }
 0x56e   : > { %vm3268_vm7 = vmor %vm3266_vm6, %vm3267_vm5  ;;  %v3257_v26 = vand.u32 2147483648, %v3242_v52  ;;  %vm3251_vm10 = vweird.f32 %v3242_v52 }
 0x56f   : > { %v3263_v44 = vsub.f32 1.0, %v3262_v54  ;;  %vm3256_vm12 = vcmp.eq.f32.partialorder %v3255_v33, 8.507059e+37 }
 0x570   : > { %v3258_v2 = vor.u32 1.1754944e-38, %v3257_v26 }
 0x571   : > { %v3264_v32 = vmul.f32 %v4875_v11, %v3263_v44 }
 0x573   : > { %v4877_v62 = vpop.eup %4876  ;;  %v3265_v18 = vadd.f32 %v4875_v11, %v3264_v32 }
 0x574   : > { %v3247_v16 = vmul.f32 %v4877_v62, %v3242_v52  ;;  %vm3252_vm8 = vweird.f32 %v4877_v62 }
 0x575   : > { %v3269_v6 = vsel %vm3268_vm7, %v4875_v11, %v3265_v18  ;;  %vm3253_vm11 = vmor %vm3251_vm10, %vm3252_vm8 }
 0x576   : > { %v3248_v3 = vsub.f32 1.0, %v3247_v16  ;;  %v3274_v29 = vsel %vm3271_vm9, %v3273_v61, %v3269_v6 }
 0x577   : > { %v3277_v0 = vmul.f32 %v6192_v45, %v3274_v29 }
 0x578   : > { %v1247_v4 = vpop.permute.xlu0 %1246  ;;  %v3249_v17 = vmul.f32 %v4877_v62, %v3248_v3 }
 0x579   : > { %v2097_v22 = vadd.f32 %v6468_v60, %v1247_v4  ;;  %v6478_v4 = vld [vmem:[#allocation26_spill] sm:$0xff] }
 0x57a   : > { %v3250_v39 = vadd.f32 %v4877_v62, %v3249_v17 }
 0x57b   : > { %v2230_v51 = vpack.c.bf16 %v2097_v22, %v2097_v22 }
 0x57c   : > { %v3254_v5 = vsel %vm3253_vm11, %v4877_v62, %v3250_v39  ;;  %v6476_v62 = vld [vmem:[#allocation18_spill] sm:$0xff] }
 0x57d   : > { %2359 = vst.msk [vmem:[#allocation2 + $0x1f0] sm:$0xf] %vm2234_vm1, %v2230_v51  ;;  %v3259_v34 = vsel %vm3256_vm12, %v3258_v2, %v3254_v5  ;;  %v6479_v39 = vld [vmem:[#allocation22_spill] sm:$0xff] }
 0x57e   : > { %v3276_v28 = vmul.f32 %v6197_v58, %v3259_v34  ;;  %v6471_v58 = vld [vmem:[#allocation21_spill] sm:$0xff] }
 0x580   : > { %v1242_v41 = vpop.permute.xlu0 %1241  ;;  %v3278_v21 = vpack.c.bf16 %v3277_v0, %v3276_v28  ;;  %v6480_v0 = vld [vmem:[#allocation17_spill] sm:$0xff] }
 0x581   : > { %v2094_v42 = vadd.f32 %v6469_v37, %v1242_v41 }
 0x582   : > { %4515 = vmatmul.msk.bf16.vlgmr.msra.gmra.mxu2 %vm2607_vm2, %v3278_v21 }
 0x583   : > { %v2229_v56 = vpack.c.bf16 %v2094_v42, %v2094_v42 }
 0x585   : > { %2358 = vst.msk [vmem:[#allocation2 + $0x1ec] sm:$0xf] %vm2234_vm1, %v2229_v56  ;;  %v6481_v56 = vld [vmem:[#allocation16_spill] sm:$0xff] }
 0x588   : > { %v1227_v23 = vpop.permute.xlu0 %1226 }
 0x589   : > { %v2087_v38 = vadd.f32 %v6470_v9, %v1227_v23 }
 0x58b   : > { %v2226_v27 = vpack.c.bf16 %v2087_v38, %v2087_v38 }
 0x58d   : > { %2355 = vst.msk [vmem:[#allocation2 + $0x1e0] sm:$0xf] %vm2234_vm1, %v2226_v27  ;;  %v3541_v50 = vpop.xlane.xlu2 %3540 }
 0x58e   : > { %v3545_v45 = vsub.f32 %v6251_v20, %v3541_v50 }
 0x590   : > { %v1217_v19 = vpop.permute.xlu0 %1216  ;;  %v3547_v8 = vmul.f32 1.442695, %v3545_v45 }
 0x591   : > { %v2082_v13 = vadd.f32 %v6471_v58, %v1217_v19 }
 0x592   : > { %4878 = vpow2.f32 %v3547_v8 }
 0x593   : > { %v2224_v12 = vpack.c.bf16 %v2082_v13, %v2082_v13 }
 0x595   : > { %2353 = vst.msk [vmem:[#allocation2 + $0x1d8] sm:$0xf] %vm2234_vm1, %v2224_v12  ;;  %v1237_v63 = vpop.permute.xlu2 %1236  ;;  %v3544_v36 = vpop.xlane.xlu1 %3543 }
 0x596   : > { %v2092_v15 = vadd.f32 %v6472_v43, %v1237_v63  ;;  %v3546_v59 = vsub.f32 %v6264_v24, %v3544_v36 }
 0x598   : > { %v1212_v53 = vpop.permute.xlu0 %1211  ;;  %v6329_v14 = vpop.eup %4878  ;;  %v2228_v48 = vpack.c.bf16 %v2092_v15, %v2092_v15  ;;  %v3549_v20 = vmul.f32 1.442695, %v3546_v59 }
 0x599   : > { %v2079_v35 = vadd.f32 %v6473_v1, %v1212_v53  ;;  %v3551_v57 = vsel %vm2607_vm2, %v6329_v14, 0.0 }
 0x59a   : > { %2357 = vst.msk [vmem:[#allocation2 + $0x1e8] sm:$0xf] %vm2234_vm1, %v2228_v48  ;;  %4880 = vpow2.f32 %v3549_v20  ;;  %3552 = vadd.xlane.f32.xlu2 %v3551_v57 }
 0x59b   : > { %v2223_v25 = vpack.c.bf16 %v2079_v35, %v2079_v35 }
 0x59d   : > { %2352 = vst.msk [vmem:[#allocation2 + $0x1d4] sm:$0xf] %vm2234_vm1, %v2223_v25  ;;  %v1207_v10 = vpop.permute.xlu2 %1206 }
 0x59e   : > { %v2077_v24 = vadd.f32 %v6474_v49, %v1207_v10 }
 0x5a0   : > { %v1187_v46 = vpop.permute.xlu0 %1186  ;;  %v6337_v11 = vpop.eup %4880  ;;  %v2222_v54 = vpack.c.bf16 %v2077_v24, %v2077_v24 }
 0x5a1   : > { %v2067_v7 = vadd.f32 %v6475_v31, %v1187_v46  ;;  %v3554_v44 = vsel %vm2607_vm2, %v6337_v11, 0.0  ;;  %v4807_v29 = vld [vmem:[#allocation2 + $0x1e8] sm:$0xff] }
 0x5a2   : > { %2351 = vst.msk [vmem:[#allocation2 + $0x1d0] sm:$0xf] %vm2234_vm1, %v2222_v54  ;;  %3555 = vadd.xlane.f32.xlu0 %v3554_v44  ;;  %v3649_v5 = vsel %vm2607_vm2, %v4807_v29, 0 }
 0x5a3   : > { %v2218_v52 = vpack.c.bf16 %v2067_v7, %v2067_v7 }
 0x5a5   : > { %2347 = vst.msk [vmem:[#allocation2 + $0x1c0] sm:$0xf] %vm2234_vm1, %v2218_v52  ;;  %v1202_v32 = vpop.permute.xlu2 %1201 }
 0x5a6   : > { %v2074_v18 = vadd.f32 %v6476_v62, %v1202_v32 }
 0x5a8   : > { %v2221_v16 = vpack.c.bf16 %v2074_v18, %v2074_v18 }
 0x5a9   : > { %v4804_v50 = vld [vmem:[#allocation2 + $0x1d0] sm:$0xff] }
 0x5aa   : > { %2350 = vst.msk [vmem:[#allocation2 + $0x1cc] sm:$0xf] %vm2234_vm1, %v2221_v16  ;;  %v3640_v19 = vsel %vm2607_vm2, %v4804_v50, 0 }
 0x5ad   : > { %v1252_v55 = vpop.permute.xlu1 %1251 }
 0x5ae   : > { %v2099_v3 = vadd.f32 %v6477_v30, %v1252_v55 }
 0x5b0   : > { %v2231_v33 = vpack.c.bf16 %v2099_v3, %v2099_v3  ;;  %v4817_v3 = vld [vmem:[%s6413_s6 + $0xf8] sm:$0xff] }
 0x5b1   : > { %3736 = vmatpush.bf16.msrb.mxu1 %v4817_v3 }
 0x5b2   : > { %2360 = vst.msk [vmem:[#allocation2 + $0x1f4] sm:$0xf] %vm2234_vm1, %v2231_v33  ;;  %v4816_v33 = vld [vmem:[%s6413_s6 + $0xf0] sm:$0xff] }
 0x5b5   : > { %v1232_v26 = vpop.permute.xlu1 %1231  ;;  %3737 = vmatpush.bf16.msrb.mxu1 %v4816_v33 }
 0x5b6   : > { %v2089_v6 = vadd.f32 %v6478_v4, %v1232_v26  ;;  %v4815_v26 = vld [vmem:[%s6413_s6 + $0xe8] sm:$0xff]  ;;  %v4813_v4 = vld [vmem:[%s6413_s6 + $0xd8] sm:$0xff] }
 0x5b8   : > { %v2227_v17 = vpack.c.bf16 %v2089_v6, %v2089_v6 }
 0x5b9   : > { %v4808_v60 = vld [vmem:[#allocation2 + $0x1f0] sm:$0xff]  ;;  %3738 = vmatpush.bf16.msrb.mxu1 %v4815_v26 }
 0x5ba   : > { %2356 = vst.msk [vmem:[#allocation2 + $0x1e4] sm:$0xf] %vm2234_vm1, %v2227_v17  ;;  %v3652_v22 = vsel %vm2607_vm2, %v4808_v60, 0  ;;  %v4812_v17 = vld [vmem:[%s6413_s6 + $0xd0] sm:$0xff]  ;;  %v4811_v60 = vld [vmem:[%s6413_s6 + $0xc8] sm:$0xff] }
 0x5bb   : > { %3658 = vmatpush.bf16.xpose.msrb.mxu3 %v3652_v22 }
 0x5bd   : > { %v1222_v61 = vpop.permute.xlu1 %1221 }
 0x5be   : > { %v2084_v51 = vadd.f32 %v6479_v39, %v1222_v61 }
 0x5c0   : > { %v2225_v2 = vpack.c.bf16 %v2084_v51, %v2084_v51  ;;  %v4810_v51 = vld [vmem:[%s6413_s6 + $0xc0] sm:$0xff] }
 0x5c1   : > { %v4806_v41 = vld [vmem:[#allocation2 + $0x1e0] sm:$0xff] }
 0x5c2   : > { %2354 = vst.msk [vmem:[#allocation2 + $0x1dc] sm:$0xf] %vm2234_vm1, %v2225_v2  ;;  %v3646_v37 = vsel %vm2607_vm2, %v4806_v41, 0 }
 0x5c3   : > { %3659 = vmatpush.bf16.xpose.msrb.mxu3 %v3649_v5 }
 0x5c5   : > { %v1197_v34 = vpop.permute.xlu1 %1196 }
 0x5c6   : > { %v2072_v28 = vadd.f32 %v6480_v0, %v1197_v34  ;;  %v4853_v0 = vld [vmem:[%s6414_s7] ss:$0 sm:$0xff] }
 0x5c8   : > { %v2220_v21 = vpack.c.bf16 %v2072_v28, %v2072_v28 }
 0x5c9   : > { %v4805_v9 = vld [vmem:[#allocation2 + $0x1d8] sm:$0xff] }
 0x5ca   : > { %2349 = vst.msk [vmem:[#allocation2 + $0x1c8] sm:$0xf] %vm2234_vm1, %v2220_v21  ;;  %v3643_v27 = vsel %vm2607_vm2, %v4805_v9, 0 }
 0x5cb   : > { %3660 = vmatpush.bf16.xpose.msrb.mxu3 %v3646_v37 }
 0x5cd   : > { %v1192_v42 = vpop.permute.xlu1 %1191 }
 0x5ce   : > { %v2069_v23 = vadd.f32 %v6481_v56, %v1192_v42 }
 0x5d0   : > { %v2219_v38 = vpack.c.bf16 %v2069_v23, %v2069_v23 }
 0x5d1   : > { %v4803_v45 = vld [vmem:[#allocation2 + $0x1c8] sm:$0xff] }
 0x5d2   : > { %2348 = vst.msk [vmem:[#allocation2 + $0x1c4] sm:$0xf] %vm2234_vm1, %v2219_v38  ;;  %v3637_v58 = vsel %vm2607_vm2, %v4803_v45, 0 }
 0x5d3   : > { %3661 = vmatpush.bf16.xpose.msrb.mxu3 %v3643_v27 }
 0x5d9   : > { %v4802_v13 = vld [vmem:[#allocation2 + $0x1c0] sm:$0xff] }
 0x5da   : > { %v3634_v8 = vsel %vm2607_vm2, %v4802_v13, 0 }
 0x5db   : > { %3662 = vmatpush.bf16.xpose.msrb.mxu3 %v3640_v19 }
 0x5e3   : > { %3663 = vmatpush.bf16.xpose.msrb.mxu3 %v3637_v58 }
 0x5eb   : > { %3664 = vmatpush.bf16.xpose.msrb.mxu3 %v3634_v8 }
 0x605   : > { %v3355_v12 = vpop.f32.mrf.mxu2 }
 0x60d   : > { %v3357_v63 = vpop.f32.mrf.mxu2  ;;  %v3553_v53 = vpop.xlane.xlu2 %3552 }
 0x60e   : > { %v3360_v36 = vpack.c.bf16 %v3357_v63, %v3355_v12  ;;  %4882 = vrcp.f32 %v3553_v53  ;;  %v3568_v57 = vand.u32 2147483648, %v3553_v53  ;;  %vm3562_vm13 = vweird.f32 %v3553_v53 }
 0x60f   : > { %v3566_v10 = vand.u32 2147483647, %v3553_v53 }
 0x610   : > { %3433 = vmatmul.bf16.vlgmr.msra.gmra.mxu3 %v3360_v36  ;;  %v3569_v54 = vor.u32 1.1754944e-38, %v3568_v57 }
 0x611   : > { %vm3567_vm0 = vcmp.eq.f32.partialorder %v3566_v10, 8.507059e+37 }
 0x614   : > { %v4883_v43 = vpop.eup %4882 }
 0x615   : > { %v3558_v15 = vmul.f32 %v4883_v43, %v3553_v53  ;;  %v3556_v59 = vpop.xlane.xlu0 %3555  ;;  %vm3563_vm1 = vweird.f32 %v4883_v43 }
 0x616   : > { %4884 = vrcp.f32 %v3556_v59  ;;  %vm3564_vm14 = vmor %vm3562_vm13, %vm3563_vm1  ;;  %v3583_v49 = vand.u32 2147483648, %v3556_v59  ;;  %v3581_v7 = vand.u32 2147483647, %v3556_v59  ;;  %vm3577_vm3 = vweird.f32 %v3556_v59 }
 0x617   : > { %v3559_v1 = vsub.f32 1.0, %v3558_v15 }
 0x618   : > { %v3584_v32 = vor.u32 1.1754944e-38, %v3583_v49  ;;  %vm3582_vm5 = vcmp.eq.f32.partialorder %v3581_v7, 8.507059e+37 }
 0x619   : > { %v3560_v35 = vmul.f32 %v4883_v43, %v3559_v1 }
 0x61b   : > { %v3561_v20 = vadd.f32 %v4883_v43, %v3560_v35 }
 0x61c   : > { %v4885_v48 = vpop.eup %4884 }
 0x61d   : > { %v3573_v25 = vmul.f32 %v4885_v48, %v3556_v59  ;;  %v3565_v24 = vsel %vm3564_vm14, %v4883_v43, %v3561_v20  ;;  %vm3578_vm15 = vweird.f32 %v4885_v48 }
 0x61e   : > { %v3570_v44 = vsel %vm3567_vm0, %v3569_v54, %v3565_v24  ;;  %vm3579_vm4 = vmor %vm3577_vm3, %vm3578_vm15 }
 0x61f   : > { %v3574_v46 = vsub.f32 1.0, %v3573_v25  ;;  %v3587_v16 = vmul.f32 %v6329_v14, %v3570_v44  ;;  %v3123_v14 = vpop.f32.mrf.mxu3 }
 0x620   : > { %v3124_v22 = vadd.f32 %v3123_v14, %v6106_v40 }
 0x621   : > { %v3575_v31 = vmul.f32 %v4885_v48, %v3574_v46 }
 0x623   : > { %v3576_v52 = vadd.f32 %v4885_v48, %v3575_v31 }
 0x625   : > { %v3580_v62 = vsel %vm3579_vm4, %v4885_v48, %v3576_v52 }
 0x626   : > { %v3585_v18 = vsel %vm3582_vm5, %v3584_v32, %v3580_v62 }
 0x627   : > { %v3588_v55 = vmul.f32 %v6337_v11, %v3585_v18  ;;  %v4814_v11 = vld [vmem:[%s6413_s6 + $0xe0] sm:$0xff]  ;;  %v3125_v6 = vpop.f32.mrf.mxu3 }
 0x628   : > { %3739 = vmatpush.bf16.msrb.mxu1 %v4814_v11  ;;  %v3126_v21 = vadd.f32 %v3125_v6, %v6109_v47 }
 0x629   : > { %v3589_v30 = vpack.c.bf16 %v3588_v55, %v3587_v16 }
 0x62b   : > { %4612 = vmatmul.msk.bf16.vlgmr.msrb.gmra.mxu3 %vm2607_vm2, %v3589_v30  ;;  %vm3790_vm2 = vcmask 130048  }
 0x62c   : > { %3740 = vmatpush.bf16.msrb.mxu1 %v4813_v4 }
 0x630   : > { %3741 = vmatpush.bf16.msrb.mxu1 %v4812_v17 }
 0x634   : > { %3742 = vmatpush.bf16.msrb.mxu1 %v4811_v60 }
 0x638   : > { %3743 = vmatpush.bf16.msrb.mxu1 %v4810_v51 }
 0x693   : > { %v3434_v61 = vpop.f32.mrf.mxu3 }
 0x694   : > { %v3439_v39 = vadd.f32 %v3434_v61, %v3124_v22 }
 0x69b   : > { %v3436_v29 = vpop.f32.mrf.mxu3 }
 0x69c   : > { %v3440_v37 = vadd.f32 %v3436_v29, %v3126_v21 }
 0x6ae   : > { %v3666_v2 = vpop.f32.mrf.mxu3 }
 0x6b6   : > { %v3668_v5 = vpop.f32.mrf.mxu3 }
 0x6b7   : > { %v3671_v34 = vpack.c.bf16 %v3668_v5, %v3666_v2 }
 0x6b9   : > { %3744 = vmatmul.bf16.vlgmr.msrb.gmra.mxu1 %v3671_v34 }
 0x736   : > { %v3745_v28 = vpop.f32.mrf.mxu1 }
 0x737   : > { %v3750_v40 = vadd.f32 %v3745_v28, %v3439_v39 }
 0x739   : > { %v3756_v41 = vadd.f32 %v4853_v0, %v3750_v40 }
 0x73b   : > { %3758 = vxpose.xlu1.b32.start [1/2] (short) (narrow) %v3756_v41, 32 }
 0x73e   : > { %v3747_v42 = vpop.f32.mrf.mxu1 }
 0x73f   : > { %v3751_v56 = vadd.f32 %v3747_v42, %v3440_v37 }
 0x741   : > { %v3757_v23 = vadd.f32 %v4853_v0, %v3751_v56 }
 0x743   : > { %3759 = vxpose.xlu1.b32.end [2/2] (short) (narrow) %v3757_v23, 32 }
 0x7df   : > { %v3774_v9 = vpop.trf.xlu1 }
 0x7e0   : > { %3791 = vst.msk [vmem:[%s356_s17] sm:$0xff] %vm3790_vm2, %v3774_v9 }
 0x7e7   : > { %v3775_v38 = vpop.trf.xlu1 }
 0x7e8   : > { %3792 = vst.msk [vmem:[%s356_s17 + $0x8] sm:$0xff] %vm3790_vm2, %v3775_v38 }
 0x7ef   : > { %v3776_v27 = vpop.trf.xlu1 }
 0x7f0   : > { %3793 = vst.msk [vmem:[%s356_s17 + $0x10] sm:$0xff] %vm3790_vm2, %v3776_v27 }
 0x7f7   : > { %v3777_v50 = vpop.trf.xlu1 }
 0x7f8   : > { %3794 = vst.msk [vmem:[%s356_s17 + $0x18] sm:$0xff] %vm3790_vm2, %v3777_v50 }
 0x7f9 PF: > { %s18_s29 = sadd.s32 1, %s4908_s29   ;;  %s6482_s27 = smov %s4904_s28 }
 0x7fa   : > { %p15_p5 = scmp.ge.s32.totalorder %s18_s29, 4   ;;  %s6483_s28 = smov %s6485_s30 }
 0x7fc   :  { %17 = sbr.rel (!%p15_p5) target bundleno = 2 (0x2), region = 89 }

</bundles_post_ra>
